<compile_context>
chip_gen: v7x
topology: tpu7x:2x2x1
jax: 0.10.0
libtpu: 0.0.40
codegen_flags: <defaults>
</compile_context>

<pallas_src>
import functools

import jax
import jax.numpy as jnp
from jax import lax
from jax.experimental import pallas as pl
from jax.experimental.pallas import tpu as pltpu


# ----------------------------------------------------------------------------
# Pallas kernel: channel-major rgb+depth compressor -> combiner chain.
# ----------------------------------------------------------------------------
def _encoder_kernel(xr_ref, xd_ref, gb_ref,
                    w1_ref, b1_ref, w2_ref, b2_ref,
                    wc1_ref, wc2_ref, bc2_ref,
                    out_ref, *, bb, ch2):
    """One grid step: `bb` batch elements x `tm` spatial columns, both branches.

    Activations stay channel-major (channels on sublanes, pixels on lanes), so
    every dot has MXU N == tm and the store is lane-dense with no transpose.
    Weight refs are stacked on a leading branch axis: 0 = rgb, 1 = depth.
    """
    f32 = jnp.float32
    bf16 = jnp.bfloat16
    for i in range(bb):                                       # static unroll
        for p, img_ref in enumerate((xr_ref, xd_ref)):        # 0: rgb, 1: depth
            x = img_ref[i].astype(bf16)                       # (C, tm)

            # compressor Conv2d(C, HID1, 1) + ReLU
            h = jnp.dot(w1_ref[p], x, preferred_element_type=f32)
            h = jnp.maximum(h + b1_ref[p], 0.0).astype(bf16)  # (HID1, tm)

            # compressor Conv2d(HID1, HID2, 1) + ReLU
            c = jnp.dot(w2_ref[p], h, preferred_element_type=f32)
            c = jnp.maximum(c + b2_ref[p], 0.0).astype(bf16)  # (HID2, tm)

            # combiner Conv2d(HID2+GE, CH1, 1) + ReLU; the goal half of the
            # concat (constant per batch element) is the precomputed gb term
            # folded in the wrapper (includes this conv's bias).
            h2 = jnp.dot(wc1_ref[p], c, preferred_element_type=f32)
            h2 = jnp.maximum(h2 + gb_ref[i, p], 0.0).astype(bf16)  # (CH1, tm)

            # combiner Conv2d(CH1, CH2, 1), no ReLU
            y = jnp.dot(wc2_ref[p], h2, preferred_element_type=f32) + bc2_ref[p]

            # lane-dense channel-major store into this batch element's slice.
            out_ref[i, p * ch2:(p + 1) * ch2, :] = y.astype(out_ref.dtype)


# ----------------------------------------------------------------------------
# Blocking heuristic.
# ----------------------------------------------------------------------------
_TM_CAP = 2048     # max tile columns per grid step (VMEM headroom incl. v7x)
_MIN_COLS = 1024   # target columns per grid step (amortize ~0.35us step cost)


def _choose_blocking(B, HW):
    # Column tile within one batch element's H*W plane.
    if HW % 128 == 0 and HW > _TM_CAP:
        tm = _TM_CAP
        while HW % tm != 0:          # largest x128 divisor of HW <= _TM_CAP
            tm -= 128
    else:
        # Full plane: one fully contiguous DMA per (batch, channel) row.
        # NOTE: if HW is not a multiple of 128 this implies masked lane stores
        # (perf trap flagged in review) but remains correct.
        tm = HW
    # Batch block: only worthwhile when one plane is a small tile; keep >= 2
    # grid steps so v7x's two TensorCores both get work.
    bb = 1
    if tm == HW and HW < _MIN_COLS:
        for cand in range(B, 0, -1):
            if B % cand == 0 and cand * HW <= _MIN_COLS and B // cand >= 2:
                bb = cand
                break
    return bb, tm


# ----------------------------------------------------------------------------
# Wrapper: goal fold, weight staging (bf16), layout plumbing (free views only).
# ----------------------------------------------------------------------------
@functools.partial(jax.jit, static_argnames=("tm", "bb", "out_dtype"))
def goal_encoder_forward(rgb, depth, goal, params, *, tm=None, bb=None,
                         out_dtype=jnp.float32):
    """rgb, depth: (nstep, nsampler, C, H, W) f32; goal: (nstep, nsampler) i32."""
    nstep, nsampler = rgb.shape[:2]
    C, H, W = rgb.shape[-3:]
    B = nstep * nsampler
    HW = H * W

    auto_bb, auto_tm = _choose_blocking(B, HW)
    if tm is None:
        tm = auto_tm
    if bb is None:
        bb = auto_bb if tm == HW else 1
    assert HW % tm == 0, "tm must divide H*W"
    assert tm % 128 == 0 or tm == HW, "tm must be x128 lane-aligned or == H*W"
    assert B % bb == 0 and (bb == 1 or tm == HW)

    HID2 = params["rgb_c2_w"].shape[0]    # 32
    CH1 = params["rgb_m1_w"].shape[0]     # 128
    CH2 = params["rgb_m2_w"].shape[0]     # 32
    GE = params["embed"].shape[1]
    assert params["rgb_m1_w"].shape[1] == HID2 + GE

    # native channel-major (B, C, HW) views: free reshapes, no transposes.
    xr = rgb.reshape(B, C, HW)
    xd = depth.reshape(B, C, HW)

    # torch Conv2d 1x1 weights are (Cout, Cin) == exactly the LHS of the
    # channel-major chain, so they are used untransposed; rgb/depth branches
    # are stacked on a leading axis (0: rgb, 1: depth); matmul weights -> bf16.
    def _stack(name):
        return jnp.stack([params[f"rgb_{name}"], params[f"depth_{name}"]])

    w1 = _stack("c1_w").astype(jnp.bfloat16)                 # (2, HID1, C)
    b1 = _stack("c1_b")[..., None]                           # (2, HID1, 1) f32
    w2 = _stack("c2_w").astype(jnp.bfloat16)                 # (2, HID2, HID1)
    b2 = _stack("c2_b")[..., None]                           # (2, HID2, 1)
    wc1 = _stack("m1_w")[:, :, :HID2].astype(jnp.bfloat16)   # (2, CH1, HID2)
    wc2 = _stack("m2_w").astype(jnp.bfloat16)                 # (2, CH2, CH1)
    bc2 = _stack("m2_b")[..., None]                           # (2, CH2, 1)

    # per-batch goal fold: nn.Embedding gather + goal half of the combiner's
    # first conv + its bias, done once per batch element outside the kernel.
    g_emb = params["embed"][goal.reshape(B)]                  # (B, GE)
    wg = _stack("m1_w")[:, :, HID2:]                          # (2, CH1, GE)
    bg = _stack("m1_b")                                       # (2, CH1)
    gb = (jnp.einsum("bg,pcg->bpc", g_emb, wg,
                     precision=lax.Precision.HIGHEST)
          + bg[None])[..., None]                              # (B, 2, CH1, 1)

    grid = (B // bb, HW // tm)
    img_spec = pl.BlockSpec((bb, C, tm), lambda b, t: (b, 0, t))
    gb_spec = pl.BlockSpec((bb, 2, CH1, 1), lambda b, t: (b, 0, 0, 0))
    out_spec = pl.BlockSpec((bb, 2 * CH2, tm), lambda b, t: (b, 0, t))

    def _full(a):
        return pl.BlockSpec(a.shape, lambda b, t: (0,) * a.ndim)

    out = pl.pallas_call(
        functools.partial(_encoder_kernel, bb=bb, ch2=CH2),
        out_shape=jax.ShapeDtypeStruct((B, 2 * CH2, HW), out_dtype),
        grid_spec=pltpu.PrefetchScalarGridSpec(
            num_scalar_prefetch=0,
            grid=grid,
            in_specs=[img_spec, img_spec, gb_spec,
                      _full(w1), _full(b1), _full(w2), _full(b2),
                      _full(wc1), _full(wc2), _full(bc2)],
            out_specs=out_spec),
        compiler_params=pltpu.CompilerParams(
            dimension_semantics=("parallel", "parallel"),
            vmem_limit_bytes=32 * 1024 * 1024),
    )(xr, xd, gb, w1, b1, w2, b2, wc1, wc2, bc2)

    # (B, 2*CH2, HW) already equals torch's channel-major
    # cat([rgb_x, depth_x], dim=1).reshape(B, -1) layout -> flatten is a view.
    return out.reshape(nstep, nsampler, -1)


# ----------------------------------------------------------------------------
# Plain-JAX reference replicating the PyTorch (NCHW, f32) semantics.
# ----------------------------------------------------------------------------
def reference_forward(rgb, depth, goal, params):
    nstep, nsampler = rgb.shape[:2]
    C, H, W = rgb.shape[-3:]
    B = nstep * nsampler
    r = rgb.reshape(B, C, H, W)
    d = depth.reshape(B, C, H, W)

    def conv1x1(x, w, b):  # x (B,Cin,H,W), w (Cout,Cin), b (Cout,)
        return jnp.einsum("bchw,oc->bohw", x, w) + b[None, :, None, None]

    g_emb = params["embed"][goal.reshape(B)]                       # (B, GE)
    tgt = jnp.broadcast_to(g_emb[:, :, None, None], (B, g_emb.shape[1], H, W))

    def branch(x, p):
        h = jax.nn.relu(conv1x1(x, params[f"{p}_c1_w"], params[f"{p}_c1_b"]))
        c = jax.nn.relu(conv1x1(h, params[f"{p}_c2_w"], params[f"{p}_c2_b"]))
        cat = jnp.concatenate([c, tgt], axis=1)
        h2 = jax.nn.relu(conv1x1(cat, params[f"{p}_m1_w"], params[f"{p}_m1_b"]))
        return conv1x1(h2, params[f"{p}_m2_w"], params[f"{p}_m2_b"])

    x = jnp.concatenate([branch(r, "rgb"), branch(d, "depth")], axis=1)
    return x.reshape(B, -1).reshape(nstep, nsampler, -1)


# ----------------------------------------------------------------------------
# Deterministic synthetic parameters (torch layout: Conv2d weight (Cout, Cin)).
# ----------------------------------------------------------------------------
def make_params(key, C, num_goals=10, goal_embed_dims=32,
                resnet_hid=(128, 32), combine_hid=(128, 32)):
    keys = jax.random.split(key, 20)
    ki = iter(keys)

    def w(shape, scale=0.05):
        return (scale * jax.random.normal(next(ki), shape)).astype(jnp.float32)

    p = {"embed": w((num_goals, goal_embed_dims), 0.1)}
    comb_in = resnet_hid[1] + goal_embed_dims
    for prefix in ("rgb", "depth"):
        p[f"{prefix}_c1_w"] = w((resnet_hid[0], C))
        p[f"{prefix}_c1_b"] = w((resnet_hid[0],))
        p[f"{prefix}_c2_w"] = w((resnet_hid[1], resnet_hid[0]))
        p[f"{prefix}_c2_b"] = w((resnet_hid[1],))
        p[f"{prefix}_m1_w"] = w((combine_hid[0], comb_in))
        p[f"{prefix}_m1_b"] = w((combine_hid[0],))
        p[f"{prefix}_m2_w"] = w((combine_hid[1], combine_hid[0]))
        p[f"{prefix}_m2_b"] = w((combine_hid[1],))
    return p


if __name__ == "__main__":
    key = jax.random.PRNGKey(0)
    nstep, nsampler = 2, 3
    C, H, W = 8, 16, 16       # small synthetic "resnet tensor" shape (HW=256)
    num_goals = 10

    kp, kr, kd, kg = jax.random.split(key, 4)
    params = make_params(kp, C, num_goals=num_goals)

    rgb = jax.random.normal(kr, (nstep, nsampler, C, H, W), dtype=jnp.float32)
    depth = jax.random.normal(kd, (nstep, nsampler, C, H, W), dtype=jnp.float32)
    goal = jax.random.randint(kg, (nstep, nsampler), 0, num_goals, dtype=jnp.int32)

    out = goal_encoder_forward(rgb, depth, goal, params)
    out = jax.block_until_ready(out)

    ref = reference_forward(rgb, depth, goal, params)
    assert out.shape == (nstep, nsampler, 2 * 32 * H * W), out.shape
    # bf16 MXU operands (f32 accumulation) -> loosened tolerance vs f32 ref.
    assert jnp.allclose(out, ref, atol=2e-2, rtol=2e-2), \
        float(jnp.abs(out - ref).max())

    print("KERNEL_OK")
</pallas_src>

<mosaic_0001>
module attributes {stable_mosaic.version = 11 : i64} {
  func.func @_encoder_kernel(%arg0: i32, %arg1: i32, %arg2: memref<3x8x256xf32, #tpu.memory_space<vmem>>, %arg3: memref<3x8x256xf32, #tpu.memory_space<vmem>>, %arg4: memref<3x2x128x1xf32, #tpu.memory_space<vmem>>, %arg5: memref<2x128x8xbf16, #tpu.memory_space<vmem>>, %arg6: memref<2x128x1xf32, #tpu.memory_space<vmem>>, %arg7: memref<2x32x128xbf16, #tpu.memory_space<vmem>>, %arg8: memref<2x32x1xf32, #tpu.memory_space<vmem>>, %arg9: memref<2x128x32xbf16, #tpu.memory_space<vmem>>, %arg10: memref<2x32x128xbf16, #tpu.memory_space<vmem>>, %arg11: memref<2x32x1xf32, #tpu.memory_space<vmem>>, %arg12: memref<3x64x256xf32, #tpu.memory_space<vmem>>) attributes {dimension_semantics = [#tpu.dimension_semantics<parallel>, #tpu.dimension_semantics<parallel>], iteration_bounds = array<i64: 2, 1>, scalar_prefetch = 0 : i64, scratch_operands = 0 : i64, tpu.core_type = #tpu.core_type<tc>, window_params = [{transform_indices = @transform_0, window_bounds = array<i64: 3, 8, 256>}, {transform_indices = @transform_1, window_bounds = array<i64: 3, 8, 256>}, {transform_indices = @transform_2, window_bounds = array<i64: 3, 2, 128, 1>}, {pipeline_mode = #tpu.pipeline_mode<synchronous>, transform_indices = @transform_3, window_bounds = array<i64: 2, 128, 8>}, {pipeline_mode = #tpu.pipeline_mode<synchronous>, transform_indices = @transform_4, window_bounds = array<i64: 2, 128, 1>}, {pipeline_mode = #tpu.pipeline_mode<synchronous>, transform_indices = @transform_5, window_bounds = array<i64: 2, 32, 128>}, {pipeline_mode = #tpu.pipeline_mode<synchronous>, transform_indices = @transform_6, window_bounds = array<i64: 2, 32, 1>}, {pipeline_mode = #tpu.pipeline_mode<synchronous>, transform_indices = @transform_7, window_bounds = array<i64: 2, 128, 32>}, {pipeline_mode = #tpu.pipeline_mode<synchronous>, transform_indices = @transform_8, window_bounds = array<i64: 2, 32, 128>}, {pipeline_mode = #tpu.pipeline_mode<synchronous>, transform_indices = @transform_9, window_bounds = array<i64: 2, 32, 1>}, {transform_indices = @transform_10, window_bounds = array<i64: 3, 64, 256>}]} {
    %c0 = arith.constant 0 : index
    %c0_0 = arith.constant 0 : index
    %c0_1 = arith.constant 0 : index
    %0 = vector.load %arg2[%c0, %c0_0, %c0_1] : memref<3x8x256xf32, #tpu.memory_space<vmem>>, vector<1x8x256xf32>
    %1 = vector.shape_cast %0 : vector<1x8x256xf32> to vector<8x256xf32>
    %2 = arith.truncf %1 : vector<8x256xf32> to vector<8x256xbf16>
    %c0_2 = arith.constant 0 : index
    %c0_3 = arith.constant 0 : index
    %c0_4 = arith.constant 0 : index
    %3 = vector.load %arg5[%c0_2, %c0_3, %c0_4] : memref<2x128x8xbf16, #tpu.memory_space<vmem>>, vector<1x128x8xbf16>
    %4 = vector.shape_cast %3 : vector<1x128x8xbf16> to vector<128x8xbf16>
    %cst = arith.constant dense<0.000000e+00> : vector<128x256xf32>
    %5 = tpu.matmul %4, %2, %cst {dimension_numbers = #tpu.dot_dimension_numbers<[1], [0], [0], [1], [0, 0, 1, 1], [], []>} : vector<128x8xbf16>, vector<8x256xbf16>, vector<128x256xf32> -> vector<128x256xf32>
    %c0_5 = arith.constant 0 : index
    %c0_6 = arith.constant 0 : index
    %c0_7 = arith.constant 0 : index
    %6 = vector.load %arg6[%c0_5, %c0_6, %c0_7] : memref<2x128x1xf32, #tpu.memory_space<vmem>>, vector<1x128x1xf32>
    %7 = vector.shape_cast %6 : vector<1x128x1xf32> to vector<128x1xf32>
    %8 = vector.broadcast %7 : vector<128x1xf32> to vector<128x256xf32>
    %9 = arith.addf %5, %8 : vector<128x256xf32>
    %cst_8 = arith.constant 0.000000e+00 : f32
    %10 = vector.broadcast %cst_8 : f32 to vector<128x256xf32>
    %11 = arith.maximumf %9, %10 : vector<128x256xf32>
    %12 = arith.truncf %11 : vector<128x256xf32> to vector<128x256xbf16>
    %c0_9 = arith.constant 0 : index
    %c0_10 = arith.constant 0 : index
    %c0_11 = arith.constant 0 : index
    %13 = vector.load %arg7[%c0_9, %c0_10, %c0_11] : memref<2x32x128xbf16, #tpu.memory_space<vmem>>, vector<1x32x128xbf16>
    %14 = vector.shape_cast %13 : vector<1x32x128xbf16> to vector<32x128xbf16>
    %cst_12 = arith.constant dense<0.000000e+00> : vector<32x256xf32>
    %15 = tpu.matmul %14, %12, %cst_12 {dimension_numbers = #tpu.dot_dimension_numbers<[1], [0], [0], [1], [0, 0, 1, 1], [], []>} : vector<32x128xbf16>, vector<128x256xbf16>, vector<32x256xf32> -> vector<32x256xf32>
    %c0_13 = arith.constant 0 : index
    %c0_14 = arith.constant 0 : index
    %c0_15 = arith.constant 0 : index
    %16 = vector.load %arg8[%c0_13, %c0_14, %c0_15] : memref<2x32x1xf32, #tpu.memory_space<vmem>>, vector<1x32x1xf32>
    %17 = vector.shape_cast %16 : vector<1x32x1xf32> to vector<32x1xf32>
    %18 = vector.broadcast %17 : vector<32x1xf32> to vector<32x256xf32>
    %19 = arith.addf %15, %18 : vector<32x256xf32>
    %cst_16 = arith.constant 0.000000e+00 : f32
    %20 = vector.broadcast %cst_16 : f32 to vector<32x256xf32>
    %21 = arith.maximumf %19, %20 : vector<32x256xf32>
    %22 = arith.truncf %21 : vector<32x256xf32> to vector<32x256xbf16>
    %c0_17 = arith.constant 0 : index
    %c0_18 = arith.constant 0 : index
    %c0_19 = arith.constant 0 : index
    %23 = vector.load %arg9[%c0_17, %c0_18, %c0_19] : memref<2x128x32xbf16, #tpu.memory_space<vmem>>, vector<1x128x32xbf16>
    %24 = vector.shape_cast %23 : vector<1x128x32xbf16> to vector<128x32xbf16>
    %cst_20 = arith.constant dense<0.000000e+00> : vector<128x256xf32>
    %25 = tpu.matmul %24, %22, %cst_20 {dimension_numbers = #tpu.dot_dimension_numbers<[1], [0], [0], [1], [0, 0, 1, 1], [], []>} : vector<128x32xbf16>, vector<32x256xbf16>, vector<128x256xf32> -> vector<128x256xf32>
    %c0_21 = arith.constant 0 : index
    %c0_22 = arith.constant 0 : index
    %c0_23 = arith.constant 0 : index
    %c0_24 = arith.constant 0 : index
    %26 = vector.load %arg4[%c0_21, %c0_22, %c0_23, %c0_24] : memref<3x2x128x1xf32, #tpu.memory_space<vmem>>, vector<1x1x128x1xf32>
    %27 = vector.shape_cast %26 : vector<1x1x128x1xf32> to vector<128x1xf32>
    %28 = vector.broadcast %27 : vector<128x1xf32> to vector<128x256xf32>
    %29 = arith.addf %25, %28 : vector<128x256xf32>
    %cst_25 = arith.constant 0.000000e+00 : f32
    %30 = vector.broadcast %cst_25 : f32 to vector<128x256xf32>
    %31 = arith.maximumf %29, %30 : vector<128x256xf32>
    %32 = arith.truncf %31 : vector<128x256xf32> to vector<128x256xbf16>
    %c0_26 = arith.constant 0 : index
    %c0_27 = arith.constant 0 : index
    %c0_28 = arith.constant 0 : index
    %33 = vector.load %arg10[%c0_26, %c0_27, %c0_28] : memref<2x32x128xbf16, #tpu.memory_space<vmem>>, vector<1x32x128xbf16>
    %34 = vector.shape_cast %33 : vector<1x32x128xbf16> to vector<32x128xbf16>
    %cst_29 = arith.constant dense<0.000000e+00> : vector<32x256xf32>
    %35 = tpu.matmul %34, %32, %cst_29 {dimension_numbers = #tpu.dot_dimension_numbers<[1], [0], [0], [1], [0, 0, 1, 1], [], []>} : vector<32x128xbf16>, vector<128x256xbf16>, vector<32x256xf32> -> vector<32x256xf32>
    %c0_30 = arith.constant 0 : index
    %c0_31 = arith.constant 0 : index
    %c0_32 = arith.constant 0 : index
    %36 = vector.load %arg11[%c0_30, %c0_31, %c0_32] : memref<2x32x1xf32, #tpu.memory_space<vmem>>, vector<1x32x1xf32>
    %37 = vector.shape_cast %36 : vector<1x32x1xf32> to vector<32x1xf32>
    %38 = vector.broadcast %37 : vector<32x1xf32> to vector<32x256xf32>
    %39 = arith.addf %35, %38 : vector<32x256xf32>
    %c0_33 = arith.constant 0 : index
    %c0_34 = arith.constant 0 : index
    %c0_35 = arith.constant 0 : index
    %40 = vector.load %arg12[%c0_33, %c0_34, %c0_35] : memref<3x64x256xf32, #tpu.memory_space<vmem>>, vector<1x32x256xf32>
    %41 = vector.shape_cast %40 : vector<1x32x256xf32> to vector<32x256xf32>
    %42 = vector.shape_cast %39 : vector<32x256xf32> to vector<1x32x256xf32>
    tpu.vector_store %arg12[%c0_33, %c0_34, %c0_35], %42 {strides = array<i32>} : memref<3x64x256xf32, #tpu.memory_space<vmem>>, vector<1x32x256xf32>,
    %c0_36 = arith.constant 0 : index
    %c0_37 = arith.constant 0 : index
    %c0_38 = arith.constant 0 : index
    %43 = vector.load %arg3[%c0_36, %c0_37, %c0_38] : memref<3x8x256xf32, #tpu.memory_space<vmem>>, vector<1x8x256xf32>
    %44 = vector.shape_cast %43 : vector<1x8x256xf32> to vector<8x256xf32>
    %45 = arith.truncf %44 : vector<8x256xf32> to vector<8x256xbf16>
    %c1 = arith.constant 1 : index
    %c0_39 = arith.constant 0 : index
    %c0_40 = arith.constant 0 : index
    %46 = vector.load %arg5[%c1, %c0_39, %c0_40] : memref<2x128x8xbf16, #tpu.memory_space<vmem>>, vector<1x128x8xbf16>
    %47 = vector.shape_cast %46 : vector<1x128x8xbf16> to vector<128x8xbf16>
    %cst_41 = arith.constant dense<0.000000e+00> : vector<128x256xf32>
    %48 = tpu.matmul %47, %45, %cst_41 {dimension_numbers = #tpu.dot_dimension_numbers<[1], [0], [0], [1], [0, 0, 1, 1], [], []>} : vector<128x8xbf16>, vector<8x256xbf16>, vector<128x256xf32> -> vector<128x256xf32>
    %c1_42 = arith.constant 1 : index
    %c0_43 = arith.constant 0 : index
    %c0_44 = arith.constant 0 : index
    %49 = vector.load %arg6[%c1_42, %c0_43, %c0_44] : memref<2x128x1xf32, #tpu.memory_space<vmem>>, vector<1x128x1xf32>
    %50 = vector.shape_cast %49 : vector<1x128x1xf32> to vector<128x1xf32>
    %51 = vector.broadcast %50 : vector<128x1xf32> to vector<128x256xf32>
    %52 = arith.addf %48, %51 : vector<128x256xf32>
    %cst_45 = arith.constant 0.000000e+00 : f32
    %53 = vector.broadcast %cst_45 : f32 to vector<128x256xf32>
    %54 = arith.maximumf %52, %53 : vector<128x256xf32>
    %55 = arith.truncf %54 : vector<128x256xf32> to vector<128x256xbf16>
    %c1_46 = arith.constant 1 : index
    %c0_47 = arith.constant 0 : index
    %c0_48 = arith.constant 0 : index
    %56 = vector.load %arg7[%c1_46, %c0_47, %c0_48] : memref<2x32x128xbf16, #tpu.memory_space<vmem>>, vector<1x32x128xbf16>
    %57 = vector.shape_cast %56 : vector<1x32x128xbf16> to vector<32x128xbf16>
    %cst_49 = arith.constant dense<0.000000e+00> : vector<32x256xf32>
    %58 = tpu.matmul %57, %55, %cst_49 {dimension_numbers = #tpu.dot_dimension_numbers<[1], [0], [0], [1], [0, 0, 1, 1], [], []>} : vector<32x128xbf16>, vector<128x256xbf16>, vector<32x256xf32> -> vector<32x256xf32>
    %c1_50 = arith.constant 1 : index
    %c0_51 = arith.constant 0 : index
    %c0_52 = arith.constant 0 : index
    %59 = vector.load %arg8[%c1_50, %c0_51, %c0_52] : memref<2x32x1xf32, #tpu.memory_space<vmem>>, vector<1x32x1xf32>
    %60 = vector.shape_cast %59 : vector<1x32x1xf32> to vector<32x1xf32>
    %61 = vector.broadcast %60 : vector<32x1xf32> to vector<32x256xf32>
    %62 = arith.addf %58, %61 : vector<32x256xf32>
    %cst_53 = arith.constant 0.000000e+00 : f32
    %63 = vector.broadcast %cst_53 : f32 to vector<32x256xf32>
    %64 = arith.maximumf %62, %63 : vector<32x256xf32>
    %65 = arith.truncf %64 : vector<32x256xf32> to vector<32x256xbf16>
    %c1_54 = arith.constant 1 : index
    %c0_55 = arith.constant 0 : index
    %c0_56 = arith.constant 0 : index
    %66 = vector.load %arg9[%c1_54, %c0_55, %c0_56] : memref<2x128x32xbf16, #tpu.memory_space<vmem>>, vector<1x128x32xbf16>
    %67 = vector.shape_cast %66 : vector<1x128x32xbf16> to vector<128x32xbf16>
    %cst_57 = arith.constant dense<0.000000e+00> : vector<128x256xf32>
    %68 = tpu.matmul %67, %65, %cst_57 {dimension_numbers = #tpu.dot_dimension_numbers<[1], [0], [0], [1], [0, 0, 1, 1], [], []>} : vector<128x32xbf16>, vector<32x256xbf16>, vector<128x256xf32> -> vector<128x256xf32>
    %c0_58 = arith.constant 0 : index
    %c1_59 = arith.constant 1 : index
    %c0_60 = arith.constant 0 : index
    %c0_61 = arith.constant 0 : index
    %69 = vector.load %arg4[%c0_58, %c1_59, %c0_60, %c0_61] : memref<3x2x128x1xf32, #tpu.memory_space<vmem>>, vector<1x1x128x1xf32>
    %70 = vector.shape_cast %69 : vector<1x1x128x1xf32> to vector<128x1xf32>
    %71 = vector.broadcast %70 : vector<128x1xf32> to vector<128x256xf32>
    %72 = arith.addf %68, %71 : vector<128x256xf32>
    %cst_62 = arith.constant 0.000000e+00 : f32
    %73 = vector.broadcast %cst_62 : f32 to vector<128x256xf32>
    %74 = arith.maximumf %72, %73 : vector<128x256xf32>
    %75 = arith.truncf %74 : vector<128x256xf32> to vector<128x256xbf16>
    %c1_63 = arith.constant 1 : index
    %c0_64 = arith.constant 0 : index
    %c0_65 = arith.constant 0 : index
    %76 = vector.load %arg10[%c1_63, %c0_64, %c0_65] : memref<2x32x128xbf16, #tpu.memory_space<vmem>>, vector<1x32x128xbf16>
    %77 = vector.shape_cast %76 : vector<1x32x128xbf16> to vector<32x128xbf16>
    %cst_66 = arith.constant dense<0.000000e+00> : vector<32x256xf32>
    %78 = tpu.matmul %77, %75, %cst_66 {dimension_numbers = #tpu.dot_dimension_numbers<[1], [0], [0], [1], [0, 0, 1, 1], [], []>} : vector<32x128xbf16>, vector<128x256xbf16>, vector<32x256xf32> -> vector<32x256xf32>
    %c1_67 = arith.constant 1 : index
    %c0_68 = arith.constant 0 : index
    %c0_69 = arith.constant 0 : index
    %79 = vector.load %arg11[%c1_67, %c0_68, %c0_69] : memref<2x32x1xf32, #tpu.memory_space<vmem>>, vector<1x32x1xf32>
    %80 = vector.shape_cast %79 : vector<1x32x1xf32> to vector<32x1xf32>
    %81 = vector.broadcast %80 : vector<32x1xf32> to vector<32x256xf32>
    %82 = arith.addf %78, %81 : vector<32x256xf32>
    %c0_70 = arith.constant 0 : index
    %c32 = arith.constant 32 : index
    %c0_71 = arith.constant 0 : index
    %83 = vector.load %arg12[%c0_70, %c32, %c0_71] : memref<3x64x256xf32, #tpu.memory_space<vmem>>, vector<1x32x256xf32>
    %84 = vector.shape_cast %83 : vector<1x32x256xf32> to vector<32x256xf32>
    %85 = vector.shape_cast %82 : vector<32x256xf32> to vector<1x32x256xf32>
    tpu.vector_store %arg12[%c0_70, %c32, %c0_71], %85 {strides = array<i32>} : memref<3x64x256xf32, #tpu.memory_space<vmem>>, vector<1x32x256xf32>,
    %c1_72 = arith.constant 1 : index
    %c0_73 = arith.constant 0 : index
    %c0_74 = arith.constant 0 : index
    %86 = vector.load %arg2[%c1_72, %c0_73, %c0_74] : memref<3x8x256xf32, #tpu.memory_space<vmem>>, vector<1x8x256xf32>
    %87 = vector.shape_cast %86 : vector<1x8x256xf32> to vector<8x256xf32>
    %88 = arith.truncf %87 : vector<8x256xf32> to vector<8x256xbf16>
    %c0_75 = arith.constant 0 : index
    %c0_76 = arith.constant 0 : index
    %c0_77 = arith.constant 0 : index
    %89 = vector.load %arg5[%c0_75, %c0_76, %c0_77] : memref<2x128x8xbf16, #tpu.memory_space<vmem>>, vector<1x128x8xbf16>
    %90 = vector.shape_cast %89 : vector<1x128x8xbf16> to vector<128x8xbf16>
    %cst_78 = arith.constant dense<0.000000e+00> : vector<128x256xf32>
    %91 = tpu.matmul %90, %88, %cst_78 {dimension_numbers = #tpu.dot_dimension_numbers<[1], [0], [0], [1], [0, 0, 1, 1], [], []>} : vector<128x8xbf16>, vector<8x256xbf16>, vector<128x256xf32> -> vector<128x256xf32>
    %c0_79 = arith.constant 0 : index
    %c0_80 = arith.constant 0 : index
    %c0_81 = arith.constant 0 : index
    %92 = vector.load %arg6[%c0_79, %c0_80, %c0_81] : memref<2x128x1xf32, #tpu.memory_space<vmem>>, vector<1x128x1xf32>
    %93 = vector.shape_cast %92 : vector<1x128x1xf32> to vector<128x1xf32>
    %94 = vector.broadcast %93 : vector<128x1xf32> to vector<128x256xf32>
    %95 = arith.addf %91, %94 : vector<128x256xf32>
    %cst_82 = arith.constant 0.000000e+00 : f32
    %96 = vector.broadcast %cst_82 : f32 to vector<128x256xf32>
    %97 = arith.maximumf %95, %96 : vector<128x256xf32>
    %98 = arith.truncf %97 : vector<128x256xf32> to vector<128x256xbf16>
    %c0_83 = arith.constant 0 : index
    %c0_84 = arith.constant 0 : index
    %c0_85 = arith.constant 0 : index
    %99 = vector.load %arg7[%c0_83, %c0_84, %c0_85] : memref<2x32x128xbf16, #tpu.memory_space<vmem>>, vector<1x32x128xbf16>
    %100 = vector.shape_cast %99 : vector<1x32x128xbf16> to vector<32x128xbf16>
    %cst_86 = arith.constant dense<0.000000e+00> : vector<32x256xf32>
    %101 = tpu.matmul %100, %98, %cst_86 {dimension_numbers = #tpu.dot_dimension_numbers<[1], [0], [0], [1], [0, 0, 1, 1], [], []>} : vector<32x128xbf16>, vector<128x256xbf16>, vector<32x256xf32> -> vector<32x256xf32>
    %c0_87 = arith.constant 0 : index
    %c0_88 = arith.constant 0 : index
    %c0_89 = arith.constant 0 : index
    %102 = vector.load %arg8[%c0_87, %c0_88, %c0_89] : memref<2x32x1xf32, #tpu.memory_space<vmem>>, vector<1x32x1xf32>
    %103 = vector.shape_cast %102 : vector<1x32x1xf32> to vector<32x1xf32>
    %104 = vector.broadcast %103 : vector<32x1xf32> to vector<32x256xf32>
    %105 = arith.addf %101, %104 : vector<32x256xf32>
    %cst_90 = arith.constant 0.000000e+00 : f32
    %106 = vector.broadcast %cst_90 : f32 to vector<32x256xf32>
    %107 = arith.maximumf %105, %106 : vector<32x256xf32>
    %108 = arith.truncf %107 : vector<32x256xf32> to vector<32x256xbf16>
    %c0_91 = arith.constant 0 : index
    %c0_92 = arith.constant 0 : index
    %c0_93 = arith.constant 0 : index
    %109 = vector.load %arg9[%c0_91, %c0_92, %c0_93] : memref<2x128x32xbf16, #tpu.memory_space<vmem>>, vector<1x128x32xbf16>
    %110 = vector.shape_cast %109 : vector<1x128x32xbf16> to vector<128x32xbf16>
    %cst_94 = arith.constant dense<0.000000e+00> : vector<128x256xf32>
    %111 = tpu.matmul %110, %108, %cst_94 {dimension_numbers = #tpu.dot_dimension_numbers<[1], [0], [0], [1], [0, 0, 1, 1], [], []>} : vector<128x32xbf16>, vector<32x256xbf16>, vector<128x256xf32> -> vector<128x256xf32>
    %c1_95 = arith.constant 1 : index
    %c0_96 = arith.constant 0 : index
    %c0_97 = arith.constant 0 : index
    %c0_98 = arith.constant 0 : index
    %112 = vector.load %arg4[%c1_95, %c0_96, %c0_97, %c0_98] : memref<3x2x128x1xf32, #tpu.memory_space<vmem>>, vector<1x1x128x1xf32>
    %113 = vector.shape_cast %112 : vector<1x1x128x1xf32> to vector<128x1xf32>
    %114 = vector.broadcast %113 : vector<128x1xf32> to vector<128x256xf32>
    %115 = arith.addf %111, %114 : vector<128x256xf32>
    %cst_99 = arith.constant 0.000000e+00 : f32
    %116 = vector.broadcast %cst_99 : f32 to vector<128x256xf32>
    %117 = arith.maximumf %115, %116 : vector<128x256xf32>
    %118 = arith.truncf %117 : vector<128x256xf32> to vector<128x256xbf16>
    %c0_100 = arith.constant 0 : index
    %c0_101 = arith.constant 0 : index
    %c0_102 = arith.constant 0 : index
    %119 = vector.load %arg10[%c0_100, %c0_101, %c0_102] : memref<2x32x128xbf16, #tpu.memory_space<vmem>>, vector<1x32x128xbf16>
    %120 = vector.shape_cast %119 : vector<1x32x128xbf16> to vector<32x128xbf16>
    %cst_103 = arith.constant dense<0.000000e+00> : vector<32x256xf32>
    %121 = tpu.matmul %120, %118, %cst_103 {dimension_numbers = #tpu.dot_dimension_numbers<[1], [0], [0], [1], [0, 0, 1, 1], [], []>} : vector<32x128xbf16>, vector<128x256xbf16>, vector<32x256xf32> -> vector<32x256xf32>
    %c0_104 = arith.constant 0 : index
    %c0_105 = arith.constant 0 : index
    %c0_106 = arith.constant 0 : index
    %122 = vector.load %arg11[%c0_104, %c0_105, %c0_106] : memref<2x32x1xf32, #tpu.memory_space<vmem>>, vector<1x32x1xf32>
    %123 = vector.shape_cast %122 : vector<1x32x1xf32> to vector<32x1xf32>
    %124 = vector.broadcast %123 : vector<32x1xf32> to vector<32x256xf32>
    %125 = arith.addf %121, %124 : vector<32x256xf32>
    %c1_107 = arith.constant 1 : index
    %c0_108 = arith.constant 0 : index
    %c0_109 = arith.constant 0 : index
    %126 = vector.load %arg12[%c1_107, %c0_108, %c0_109] : memref<3x64x256xf32, #tpu.memory_space<vmem>>, vector<1x32x256xf32>
    %127 = vector.shape_cast %126 : vector<1x32x256xf32> to vector<32x256xf32>
    %128 = vector.shape_cast %125 : vector<32x256xf32> to vector<1x32x256xf32>
    tpu.vector_store %arg12[%c1_107, %c0_108, %c0_109], %128 {strides = array<i32>} : memref<3x64x256xf32, #tpu.memory_space<vmem>>, vector<1x32x256xf32>,
    %c1_110 = arith.constant 1 : index
    %c0_111 = arith.constant 0 : index
    %c0_112 = arith.constant 0 : index
    %129 = vector.load %arg3[%c1_110, %c0_111, %c0_112] : memref<3x8x256xf32, #tpu.memory_space<vmem>>, vector<1x8x256xf32>
    %130 = vector.shape_cast %129 : vector<1x8x256xf32> to vector<8x256xf32>
    %131 = arith.truncf %130 : vector<8x256xf32> to vector<8x256xbf16>
    %c1_113 = arith.constant 1 : index
    %c0_114 = arith.constant 0 : index
    %c0_115 = arith.constant 0 : index
    %132 = vector.load %arg5[%c1_113, %c0_114, %c0_115] : memref<2x128x8xbf16, #tpu.memory_space<vmem>>, vector<1x128x8xbf16>
    %133 = vector.shape_cast %132 : vector<1x128x8xbf16> to vector<128x8xbf16>
    %cst_116 = arith.constant dense<0.000000e+00> : vector<128x256xf32>
    %134 = tpu.matmul %133, %131, %cst_116 {dimension_numbers = #tpu.dot_dimension_numbers<[1], [0], [0], [1], [0, 0, 1, 1], [], []>} : vector<128x8xbf16>, vector<8x256xbf16>, vector<128x256xf32> -> vector<128x256xf32>
    %c1_117 = arith.constant 1 : index
    %c0_118 = arith.constant 0 : index
    %c0_119 = arith.constant 0 : index
    %135 = vector.load %arg6[%c1_117, %c0_118, %c0_119] : memref<2x128x1xf32, #tpu.memory_space<vmem>>, vector<1x128x1xf32>
    %136 = vector.shape_cast %135 : vector<1x128x1xf32> to vector<128x1xf32>
    %137 = vector.broadcast %136 : vector<128x1xf32> to vector<128x256xf32>
    %138 = arith.addf %134, %137 : vector<128x256xf32>
    %cst_120 = arith.constant 0.000000e+00 : f32
    %139 = vector.broadcast %cst_120 : f32 to vector<128x256xf32>
    %140 = arith.maximumf %138, %139 : vector<128x256xf32>
    %141 = arith.truncf %140 : vector<128x256xf32> to vector<128x256xbf16>
    %c1_121 = arith.constant 1 : index
    %c0_122 = arith.constant 0 : index
    %c0_123 = arith.constant 0 : index
    %142 = vector.load %arg7[%c1_121, %c0_122, %c0_123] : memref<2x32x128xbf16, #tpu.memory_space<vmem>>, vector<1x32x128xbf16>
    %143 = vector.shape_cast %142 : vector<1x32x128xbf16> to vector<32x128xbf16>
    %cst_124 = arith.constant dense<0.000000e+00> : vector<32x256xf32>
    %144 = tpu.matmul %143, %141, %cst_124 {dimension_numbers = #tpu.dot_dimension_numbers<[1], [0], [0], [1], [0, 0, 1, 1], [], []>} : vector<32x128xbf16>, vector<128x256xbf16>, vector<32x256xf32> -> vector<32x256xf32>
    %c1_125 = arith.constant 1 : index
    %c0_126 = arith.constant 0 : index
    %c0_127 = arith.constant 0 : index
    %145 = vector.load %arg8[%c1_125, %c0_126, %c0_127] : memref<2x32x1xf32, #tpu.memory_space<vmem>>, vector<1x32x1xf32>
    %146 = vector.shape_cast %145 : vector<1x32x1xf32> to vector<32x1xf32>
    %147 = vector.broadcast %146 : vector<32x1xf32> to vector<32x256xf32>
    %148 = arith.addf %144, %147 : vector<32x256xf32>
    %cst_128 = arith.constant 0.000000e+00 : f32
    %149 = vector.broadcast %cst_128 : f32 to vector<32x256xf32>
    %150 = arith.maximumf %148, %149 : vector<32x256xf32>
    %151 = arith.truncf %150 : vector<32x256xf32> to vector<32x256xbf16>
    %c1_129 = arith.constant 1 : index
    %c0_130 = arith.constant 0 : index
    %c0_131 = arith.constant 0 : index
    %152 = vector.load %arg9[%c1_129, %c0_130, %c0_131] : memref<2x128x32xbf16, #tpu.memory_space<vmem>>, vector<1x128x32xbf16>
    %153 = vector.shape_cast %152 : vector<1x128x32xbf16> to vector<128x32xbf16>
    %cst_132 = arith.constant dense<0.000000e+00> : vector<128x256xf32>
    %154 = tpu.matmul %153, %151, %cst_132 {dimension_numbers = #tpu.dot_dimension_numbers<[1], [0], [0], [1], [0, 0, 1, 1], [], []>} : vector<128x32xbf16>, vector<32x256xbf16>, vector<128x256xf32> -> vector<128x256xf32>
    %c1_133 = arith.constant 1 : index
    %c1_134 = arith.constant 1 : index
    %c0_135 = arith.constant 0 : index
    %c0_136 = arith.constant 0 : index
    %155 = vector.load %arg4[%c1_133, %c1_134, %c0_135, %c0_136] : memref<3x2x128x1xf32, #tpu.memory_space<vmem>>, vector<1x1x128x1xf32>
    %156 = vector.shape_cast %155 : vector<1x1x128x1xf32> to vector<128x1xf32>
    %157 = vector.broadcast %156 : vector<128x1xf32> to vector<128x256xf32>
    %158 = arith.addf %154, %157 : vector<128x256xf32>
    %cst_137 = arith.constant 0.000000e+00 : f32
    %159 = vector.broadcast %cst_137 : f32 to vector<128x256xf32>
    %160 = arith.maximumf %158, %159 : vector<128x256xf32>
    %161 = arith.truncf %160 : vector<128x256xf32> to vector<128x256xbf16>
    %c1_138 = arith.constant 1 : index
    %c0_139 = arith.constant 0 : index
    %c0_140 = arith.constant 0 : index
    %162 = vector.load %arg10[%c1_138, %c0_139, %c0_140] : memref<2x32x128xbf16, #tpu.memory_space<vmem>>, vector<1x32x128xbf16>
    %163 = vector.shape_cast %162 : vector<1x32x128xbf16> to vector<32x128xbf16>
    %cst_141 = arith.constant dense<0.000000e+00> : vector<32x256xf32>
    %164 = tpu.matmul %163, %161, %cst_141 {dimension_numbers = #tpu.dot_dimension_numbers<[1], [0], [0], [1], [0, 0, 1, 1], [], []>} : vector<32x128xbf16>, vector<128x256xbf16>, vector<32x256xf32> -> vector<32x256xf32>
    %c1_142 = arith.constant 1 : index
    %c0_143 = arith.constant 0 : index
    %c0_144 = arith.constant 0 : index
    %165 = vector.load %arg11[%c1_142, %c0_143, %c0_144] : memref<2x32x1xf32, #tpu.memory_space<vmem>>, vector<1x32x1xf32>
    %166 = vector.shape_cast %165 : vector<1x32x1xf32> to vector<32x1xf32>
    %167 = vector.broadcast %166 : vector<32x1xf32> to vector<32x256xf32>
    %168 = arith.addf %164, %167 : vector<32x256xf32>
    %c1_145 = arith.constant 1 : index
    %c32_146 = arith.constant 32 : index
    %c0_147 = arith.constant 0 : index
    %169 = vector.load %arg12[%c1_145, %c32_146, %c0_147] : memref<3x64x256xf32, #tpu.memory_space<vmem>>, vector<1x32x256xf32>
    %170 = vector.shape_cast %169 : vector<1x32x256xf32> to vector<32x256xf32>
    %171 = vector.shape_cast %168 : vector<32x256xf32> to vector<1x32x256xf32>
    tpu.vector_store %arg12[%c1_145, %c32_146, %c0_147], %171 {strides = array<i32>} : memref<3x64x256xf32, #tpu.memory_space<vmem>>, vector<1x32x256xf32>,
    %c2 = arith.constant 2 : index
    %c0_148 = arith.constant 0 : index
    %c0_149 = arith.constant 0 : index
    %172 = vector.load %arg2[%c2, %c0_148, %c0_149] : memref<3x8x256xf32, #tpu.memory_space<vmem>>, vector<1x8x256xf32>
    %173 = vector.shape_cast %172 : vector<1x8x256xf32> to vector<8x256xf32>
    %174 = arith.truncf %173 : vector<8x256xf32> to vector<8x256xbf16>
    %c0_150 = arith.constant 0 : index
    %c0_151 = arith.constant 0 : index
    %c0_152 = arith.constant 0 : index
    %175 = vector.load %arg5[%c0_150, %c0_151, %c0_152] : memref<2x128x8xbf16, #tpu.memory_space<vmem>>, vector<1x128x8xbf16>
    %176 = vector.shape_cast %175 : vector<1x128x8xbf16> to vector<128x8xbf16>
    %cst_153 = arith.constant dense<0.000000e+00> : vector<128x256xf32>
    %177 = tpu.matmul %176, %174, %cst_153 {dimension_numbers = #tpu.dot_dimension_numbers<[1], [0], [0], [1], [0, 0, 1, 1], [], []>} : vector<128x8xbf16>, vector<8x256xbf16>, vector<128x256xf32> -> vector<128x256xf32>
    %c0_154 = arith.constant 0 : index
    %c0_155 = arith.constant 0 : index
    %c0_156 = arith.constant 0 : index
    %178 = vector.load %arg6[%c0_154, %c0_155, %c0_156] : memref<2x128x1xf32, #tpu.memory_space<vmem>>, vector<1x128x1xf32>
    %179 = vector.shape_cast %178 : vector<1x128x1xf32> to vector<128x1xf32>
    %180 = vector.broadcast %179 : vector<128x1xf32> to vector<128x256xf32>
    %181 = arith.addf %177, %180 : vector<128x256xf32>
    %cst_157 = arith.constant 0.000000e+00 : f32
    %182 = vector.broadcast %cst_157 : f32 to vector<128x256xf32>
    %183 = arith.maximumf %181, %182 : vector<128x256xf32>
    %184 = arith.truncf %183 : vector<128x256xf32> to vector<128x256xbf16>
    %c0_158 = arith.constant 0 : index
    %c0_159 = arith.constant 0 : index
    %c0_160 = arith.constant 0 : index
    %185 = vector.load %arg7[%c0_158, %c0_159, %c0_160] : memref<2x32x128xbf16, #tpu.memory_space<vmem>>, vector<1x32x128xbf16>
    %186 = vector.shape_cast %185 : vector<1x32x128xbf16> to vector<32x128xbf16>
    %cst_161 = arith.constant dense<0.000000e+00> : vector<32x256xf32>
    %187 = tpu.matmul %186, %184, %cst_161 {dimension_numbers = #tpu.dot_dimension_numbers<[1], [0], [0], [1], [0, 0, 1, 1], [], []>} : vector<32x128xbf16>, vector<128x256xbf16>, vector<32x256xf32> -> vector<32x256xf32>
    %c0_162 = arith.constant 0 : index
    %c0_163 = arith.constant 0 : index
    %c0_164 = arith.constant 0 : index
    %188 = vector.load %arg8[%c0_162, %c0_163, %c0_164] : memref<2x32x1xf32, #tpu.memory_space<vmem>>, vector<1x32x1xf32>
    %189 = vector.shape_cast %188 : vector<1x32x1xf32> to vector<32x1xf32>
    %190 = vector.broadcast %189 : vector<32x1xf32> to vector<32x256xf32>
    %191 = arith.addf %187, %190 : vector<32x256xf32>
    %cst_165 = arith.constant 0.000000e+00 : f32
    %192 = vector.broadcast %cst_165 : f32 to vector<32x256xf32>
    %193 = arith.maximumf %191, %192 : vector<32x256xf32>
    %194 = arith.truncf %193 : vector<32x256xf32> to vector<32x256xbf16>
    %c0_166 = arith.constant 0 : index
    %c0_167 = arith.constant 0 : index
    %c0_168 = arith.constant 0 : index
    %195 = vector.load %arg9[%c0_166, %c0_167, %c0_168] : memref<2x128x32xbf16, #tpu.memory_space<vmem>>, vector<1x128x32xbf16>
    %196 = vector.shape_cast %195 : vector<1x128x32xbf16> to vector<128x32xbf16>
    %cst_169 = arith.constant dense<0.000000e+00> : vector<128x256xf32>
    %197 = tpu.matmul %196, %194, %cst_169 {dimension_numbers = #tpu.dot_dimension_numbers<[1], [0], [0], [1], [0, 0, 1, 1], [], []>} : vector<128x32xbf16>, vector<32x256xbf16>, vector<128x256xf32> -> vector<128x256xf32>
    %c2_170 = arith.constant 2 : index
    %c0_171 = arith.constant 0 : index
    %c0_172 = arith.constant 0 : index
    %c0_173 = arith.constant 0 : index
    %198 = vector.load %arg4[%c2_170, %c0_171, %c0_172, %c0_173] : memref<3x2x128x1xf32, #tpu.memory_space<vmem>>, vector<1x1x128x1xf32>
    %199 = vector.shape_cast %198 : vector<1x1x128x1xf32> to vector<128x1xf32>
    %200 = vector.broadcast %199 : vector<128x1xf32> to vector<128x256xf32>
    %201 = arith.addf %197, %200 : vector<128x256xf32>
    %cst_174 = arith.constant 0.000000e+00 : f32
    %202 = vector.broadcast %cst_174 : f32 to vector<128x256xf32>
    %203 = arith.maximumf %201, %202 : vector<128x256xf32>
    %204 = arith.truncf %203 : vector<128x256xf32> to vector<128x256xbf16>
    %c0_175 = arith.constant 0 : index
    %c0_176 = arith.constant 0 : index
    %c0_177 = arith.constant 0 : index
    %205 = vector.load %arg10[%c0_175, %c0_176, %c0_177] : memref<2x32x128xbf16, #tpu.memory_space<vmem>>, vector<1x32x128xbf16>
    %206 = vector.shape_cast %205 : vector<1x32x128xbf16> to vector<32x128xbf16>
    %cst_178 = arith.constant dense<0.000000e+00> : vector<32x256xf32>
    %207 = tpu.matmul %206, %204, %cst_178 {dimension_numbers = #tpu.dot_dimension_numbers<[1], [0], [0], [1], [0, 0, 1, 1], [], []>} : vector<32x128xbf16>, vector<128x256xbf16>, vector<32x256xf32> -> vector<32x256xf32>
    %c0_179 = arith.constant 0 : index
    %c0_180 = arith.constant 0 : index
    %c0_181 = arith.constant 0 : index
    %208 = vector.load %arg11[%c0_179, %c0_180, %c0_181] : memref<2x32x1xf32, #tpu.memory_space<vmem>>, vector<1x32x1xf32>
    %209 = vector.shape_cast %208 : vector<1x32x1xf32> to vector<32x1xf32>
    %210 = vector.broadcast %209 : vector<32x1xf32> to vector<32x256xf32>
    %211 = arith.addf %207, %210 : vector<32x256xf32>
    %c2_182 = arith.constant 2 : index
    %c0_183 = arith.constant 0 : index
    %c0_184 = arith.constant 0 : index
    %212 = vector.load %arg12[%c2_182, %c0_183, %c0_184] : memref<3x64x256xf32, #tpu.memory_space<vmem>>, vector<1x32x256xf32>
    %213 = vector.shape_cast %212 : vector<1x32x256xf32> to vector<32x256xf32>
    %214 = vector.shape_cast %211 : vector<32x256xf32> to vector<1x32x256xf32>
    tpu.vector_store %arg12[%c2_182, %c0_183, %c0_184], %214 {strides = array<i32>} : memref<3x64x256xf32, #tpu.memory_space<vmem>>, vector<1x32x256xf32>,
    %c2_185 = arith.constant 2 : index
    %c0_186 = arith.constant 0 : index
    %c0_187 = arith.constant 0 : index
    %215 = vector.load %arg3[%c2_185, %c0_186, %c0_187] : memref<3x8x256xf32, #tpu.memory_space<vmem>>, vector<1x8x256xf32>
    %216 = vector.shape_cast %215 : vector<1x8x256xf32> to vector<8x256xf32>
    %217 = arith.truncf %216 : vector<8x256xf32> to vector<8x256xbf16>
    %c1_188 = arith.constant 1 : index
    %c0_189 = arith.constant 0 : index
    %c0_190 = arith.constant 0 : index
    %218 = vector.load %arg5[%c1_188, %c0_189, %c0_190] : memref<2x128x8xbf16, #tpu.memory_space<vmem>>, vector<1x128x8xbf16>
    %219 = vector.shape_cast %218 : vector<1x128x8xbf16> to vector<128x8xbf16>
    %cst_191 = arith.constant dense<0.000000e+00> : vector<128x256xf32>
    %220 = tpu.matmul %219, %217, %cst_191 {dimension_numbers = #tpu.dot_dimension_numbers<[1], [0], [0], [1], [0, 0, 1, 1], [], []>} : vector<128x8xbf16>, vector<8x256xbf16>, vector<128x256xf32> -> vector<128x256xf32>
    %c1_192 = arith.constant 1 : index
    %c0_193 = arith.constant 0 : index
    %c0_194 = arith.constant 0 : index
    %221 = vector.load %arg6[%c1_192, %c0_193, %c0_194] : memref<2x128x1xf32, #tpu.memory_space<vmem>>, vector<1x128x1xf32>
    %222 = vector.shape_cast %221 : vector<1x128x1xf32> to vector<128x1xf32>
    %223 = vector.broadcast %222 : vector<128x1xf32> to vector<128x256xf32>
    %224 = arith.addf %220, %223 : vector<128x256xf32>
    %cst_195 = arith.constant 0.000000e+00 : f32
    %225 = vector.broadcast %cst_195 : f32 to vector<128x256xf32>
    %226 = arith.maximumf %224, %225 : vector<128x256xf32>
    %227 = arith.truncf %226 : vector<128x256xf32> to vector<128x256xbf16>
    %c1_196 = arith.constant 1 : index
    %c0_197 = arith.constant 0 : index
    %c0_198 = arith.constant 0 : index
    %228 = vector.load %arg7[%c1_196, %c0_197, %c0_198] : memref<2x32x128xbf16, #tpu.memory_space<vmem>>, vector<1x32x128xbf16>
    %229 = vector.shape_cast %228 : vector<1x32x128xbf16> to vector<32x128xbf16>
    %cst_199 = arith.constant dense<0.000000e+00> : vector<32x256xf32>
    %230 = tpu.matmul %229, %227, %cst_199 {dimension_numbers = #tpu.dot_dimension_numbers<[1], [0], [0], [1], [0, 0, 1, 1], [], []>} : vector<32x128xbf16>, vector<128x256xbf16>, vector<32x256xf32> -> vector<32x256xf32>
    %c1_200 = arith.constant 1 : index
    %c0_201 = arith.constant 0 : index
    %c0_202 = arith.constant 0 : index
    %231 = vector.load %arg8[%c1_200, %c0_201, %c0_202] : memref<2x32x1xf32, #tpu.memory_space<vmem>>, vector<1x32x1xf32>
    %232 = vector.shape_cast %231 : vector<1x32x1xf32> to vector<32x1xf32>
    %233 = vector.broadcast %232 : vector<32x1xf32> to vector<32x256xf32>
    %234 = arith.addf %230, %233 : vector<32x256xf32>
    %cst_203 = arith.constant 0.000000e+00 : f32
    %235 = vector.broadcast %cst_203 : f32 to vector<32x256xf32>
    %236 = arith.maximumf %234, %235 : vector<32x256xf32>
    %237 = arith.truncf %236 : vector<32x256xf32> to vector<32x256xbf16>
    %c1_204 = arith.constant 1 : index
    %c0_205 = arith.constant 0 : index
    %c0_206 = arith.constant 0 : index
    %238 = vector.load %arg9[%c1_204, %c0_205, %c0_206] : memref<2x128x32xbf16, #tpu.memory_space<vmem>>, vector<1x128x32xbf16>
    %239 = vector.shape_cast %238 : vector<1x128x32xbf16> to vector<128x32xbf16>
    %cst_207 = arith.constant dense<0.000000e+00> : vector<128x256xf32>
    %240 = tpu.matmul %239, %237, %cst_207 {dimension_numbers = #tpu.dot_dimension_numbers<[1], [0], [0], [1], [0, 0, 1, 1], [], []>} : vector<128x32xbf16>, vector<32x256xbf16>, vector<128x256xf32> -> vector<128x256xf32>
    %c2_208 = arith.constant 2 : index
    %c1_209 = arith.constant 1 : index
    %c0_210 = arith.constant 0 : index
    %c0_211 = arith.constant 0 : index
    %241 = vector.load %arg4[%c2_208, %c1_209, %c0_210, %c0_211] : memref<3x2x128x1xf32, #tpu.memory_space<vmem>>, vector<1x1x128x1xf32>
    %242 = vector.shape_cast %241 : vector<1x1x128x1xf32> to vector<128x1xf32>
    %243 = vector.broadcast %242 : vector<128x1xf32> to vector<128x256xf32>
    %244 = arith.addf %240, %243 : vector<128x256xf32>
    %cst_212 = arith.constant 0.000000e+00 : f32
    %245 = vector.broadcast %cst_212 : f32 to vector<128x256xf32>
    %246 = arith.maximumf %244, %245 : vector<128x256xf32>
    %247 = arith.truncf %246 : vector<128x256xf32> to vector<128x256xbf16>
    %c1_213 = arith.constant 1 : index
    %c0_214 = arith.constant 0 : index
    %c0_215 = arith.constant 0 : index
    %248 = vector.load %arg10[%c1_213, %c0_214, %c0_215] : memref<2x32x128xbf16, #tpu.memory_space<vmem>>, vector<1x32x128xbf16>
    %249 = vector.shape_cast %248 : vector<1x32x128xbf16> to vector<32x128xbf16>
    %cst_216 = arith.constant dense<0.000000e+00> : vector<32x256xf32>
    %250 = tpu.matmul %249, %247, %cst_216 {dimension_numbers = #tpu.dot_dimension_numbers<[1], [0], [0], [1], [0, 0, 1, 1], [], []>} : vector<32x128xbf16>, vector<128x256xbf16>, vector<32x256xf32> -> vector<32x256xf32>
    %c1_217 = arith.constant 1 : index
    %c0_218 = arith.constant 0 : index
    %c0_219 = arith.constant 0 : index
    %251 = vector.load %arg11[%c1_217, %c0_218, %c0_219] : memref<2x32x1xf32, #tpu.memory_space<vmem>>, vector<1x32x1xf32>
    %252 = vector.shape_cast %251 : vector<1x32x1xf32> to vector<32x1xf32>
    %253 = vector.broadcast %252 : vector<32x1xf32> to vector<32x256xf32>
    %254 = arith.addf %250, %253 : vector<32x256xf32>
    %c2_220 = arith.constant 2 : index
    %c32_221 = arith.constant 32 : index
    %c0_222 = arith.constant 0 : index
    %255 = vector.load %arg12[%c2_220, %c32_221, %c0_222] : memref<3x64x256xf32, #tpu.memory_space<vmem>>, vector<1x32x256xf32>
    %256 = vector.shape_cast %255 : vector<1x32x256xf32> to vector<32x256xf32>
    %257 = vector.shape_cast %254 : vector<32x256xf32> to vector<1x32x256xf32>
    tpu.vector_store %arg12[%c2_220, %c32_221, %c0_222], %257 {strides = array<i32>} : memref<3x64x256xf32, #tpu.memory_space<vmem>>, vector<1x32x256xf32>,
    return
  }
  func.func @transform_0(%arg0: i32, %arg1: i32) -> (i32, i32, i32) {
    %c0_i32 = arith.constant 0 : i32
    %c0_i32_0 = arith.constant 0 : i32
    return %arg0, %c0_i32, %arg1 : i32, i32, i32
  }
  func.func @transform_1(%arg0: i32, %arg1: i32) -> (i32, i32, i32) {
    %c0_i32 = arith.constant 0 : i32
    %c0_i32_0 = arith.constant 0 : i32
    return %arg0, %c0_i32, %arg1 : i32, i32, i32
  }
  func.func @transform_2(%arg0: i32, %arg1: i32) -> (i32, i32, i32, i32) {
    %c0_i32 = arith.constant 0 : i32
    %c0_i32_0 = arith.constant 0 : i32
    %c0_i32_1 = arith.constant 0 : i32
    %c0_i32_2 = arith.constant 0 : i32
    return %arg0, %c0_i32, %c0_i32_0, %c0_i32_1 : i32, i32, i32, i32
  }
  func.func @transform_3(%arg0: i32, %arg1: i32) -> (i32, i32, i32) {
    %c0_i32 = arith.constant 0 : i32
    %c0_i32_0 = arith.constant 0 : i32
    %c0_i32_1 = arith.constant 0 : i32
    %c0_i32_2 = arith.constant 0 : i32
    return %c0_i32, %c0_i32_0, %c0_i32_1 : i32, i32, i32
  }
  func.func @transform_4(%arg0: i32, %arg1: i32) -> (i32, i32, i32) {
    %c0_i32 = arith.constant 0 : i32
    %c0_i32_0 = arith.constant 0 : i32
    %c0_i32_1 = arith.constant 0 : i32
    %c0_i32_2 = arith.constant 0 : i32
    return %c0_i32, %c0_i32_0, %c0_i32_1 : i32, i32, i32
  }
  func.func @transform_5(%arg0: i32, %arg1: i32) -> (i32, i32, i32) {
    %c0_i32 = arith.constant 0 : i32
    %c0_i32_0 = arith.constant 0 : i32
    %c0_i32_1 = arith.constant 0 : i32
    %c0_i32_2 = arith.constant 0 : i32
    return %c0_i32, %c0_i32_0, %c0_i32_1 : i32, i32, i32
  }
  func.func @transform_6(%arg0: i32, %arg1: i32) -> (i32, i32, i32) {
    %c0_i32 = arith.constant 0 : i32
    %c0_i32_0 = arith.constant 0 : i32
    %c0_i32_1 = arith.constant 0 : i32
    %c0_i32_2 = arith.constant 0 : i32
    return %c0_i32, %c0_i32_0, %c0_i32_1 : i32, i32, i32
  }
  func.func @transform_7(%arg0: i32, %arg1: i32) -> (i32, i32, i32) {
    %c0_i32 = arith.constant 0 : i32
    %c0_i32_0 = arith.constant 0 : i32
    %c0_i32_1 = arith.constant 0 : i32
    %c0_i32_2 = arith.constant 0 : i32
    return %c0_i32, %c0_i32_0, %c0_i32_1 : i32, i32, i32
  }
  func.func @transform_8(%arg0: i32, %arg1: i32) -> (i32, i32, i32) {
    %c0_i32 = arith.constant 0 : i32
    %c0_i32_0 = arith.constant 0 : i32
    %c0_i32_1 = arith.constant 0 : i32
    %c0_i32_2 = arith.constant 0 : i32
    return %c0_i32, %c0_i32_0, %c0_i32_1 : i32, i32, i32
  }
  func.func @transform_9(%arg0: i32, %arg1: i32) -> (i32, i32, i32) {
    %c0_i32 = arith.constant 0 : i32
    %c0_i32_0 = arith.constant 0 : i32
    %c0_i32_1 = arith.constant 0 : i32
    %c0_i32_2 = arith.constant 0 : i32
    return %c0_i32, %c0_i32_0, %c0_i32_1 : i32, i32, i32
  }
  func.func @transform_10(%arg0: i32, %arg1: i32) -> (i32, i32, i32) {
    %c0_i32 = arith.constant 0 : i32
    %c0_i32_0 = arith.constant 0 : i32
    return %arg0, %c0_i32, %arg1 : i32, i32, i32
  }
}

</mosaic_0001>

<bundles_post_ra>
// kernel: goal_encoder_forward.1
= control target key start
LH: loop header
LB: loop body
LE: loop exit
PB: predicated region body
PF: predicated region fallthrough
CT: control target
= control target key end

     0   :  { %s6735_s13 = smov 0   ;;  %s6737_s14 = smov 0   ;;  %s8825_s0 = inlined_call_operand.vmem [shape: f32[6,8,256], index: 0, kind: input, shape index: {}]   ;;  %s8826_s1 = inlined_call_operand.vmem [shape: f32[6,8,256], index: 1, kind: input, shape index: {}]   ;;  %s8827_s2 = inlined_call_operand.vmem [shape: f32[6,2,128,1], index: 2, kind: input, shape index: {}]   ;;  %s8828_s3 = inlined_call_operand.vmem [shape: bf16[2,128,8], index: 3, kind: input, shape index: {}]   ;;  %s8829_s4 = inlined_call_operand.vmem [shape: f32[2,128,1], index: 4, kind: input, shape index: {}]   ;;  %s8830_s5 = inlined_call_operand.vmem [shape: bf16[2,32,128], index: 5, kind: input, shape index: {}]   ;;  %s8831_s6 = inlined_call_operand.vmem [shape: f32[2,32,1], index: 6, kind: input, shape index: {}]   ;;  %s8832_s7 = inlined_call_operand.vmem [shape: bf16[2,128,32], index: 7, kind: input, shape index: {}]   ;;  %s8833_s8 = inlined_call_operand.vmem [shape: bf16[2,32,128], index: 8, kind: input, shape index: {}]   ;;  %s8834_s9 = inlined_call_operand.vmem [shape: f32[2,32,1], index: 9, kind: input, shape index: {}]   ;;  %s8835_s10 = inlined_call_operand.vmem [shape: f32[6,64,256], index: 10, kind: output, shape index: {}]  }
   0x1   :  { %s6739_s15 = smov 0  }
   0x2 LB: > { %s32_s16 = sadd.s32 1, %s6673_s14  ;;  %p5959_p0 = scmp.ge.s32.totalorder %s6677_s15, 1  ;;  %s6677_s15 = sphi %s6739_s15, %s20_s15   ;;  %s6673_s14 = sphi %s6737_s14, %s9263_s14   ;;  %s6669_s13 = sphi %s6735_s13, %s9262_s13  }
   0x3   : > { %p34_p1 = scmp.ge.s32.totalorder %s32_s16, 2  ;;  %p366_p2 = scmp.lt.s32.totalorder %s6677_s15, 3 }
   0x5   : > { %s9265_s16 = smov (%p34_p1, %s32_s16), 0  ;;  %p367_p3 = pnand %p5959_p0, %p366_p2 }
   0x7   : > { %370 = sbr.rel (%p367_p3) target bundleno = 5105 (0x13f1), region = 60 }
   0xe   : > { %v6756_v0 = vld [vmem:[%s8829_s4 + $0x10] sm:$0xff]  ;;  %v6761_v1 = vld [vmem:[%s8829_s4] sm:$0xff]  ;;  %s430_s21 = smul.u32 3, %s6669_s13  ;;  %v8836_v2 = vmov 0   ;;  %v6770_v3 = vld [vmem:[%s8829_s4 + $0x18] sm:$0xff]  ;;  %vm655_vm0 = vcmask 1043456  }
   0xf   : > { %6534 = vset.pattern.permute.xlu1 %v8836_v2  ;;  %6533 = vset.pattern.permute.xlu0 %v8836_v2  ;;  %v6775_v4 = vld [vmem:[%s8829_s4 + $0x8] sm:$0xff]  ;;  %v6792_v6 = vld [vmem:[%s8829_s4 + $0x20] sm:$0xff]  ;;  %v6810_v12 = vld [vmem:[%s8829_s4 + $0x38] sm:$0xff]  ;;  %vm630_vm1 = vcmask 64512   ;;  %vm1080_vm2 = vcmask 261120  }
  0x10   : > { %522 = vperm.xlu1 %6534, %v6756_v0   ;;  %512 = vperm.xlu0 %6533, %v6761_v1   ;;  %p432_p4 = scmp.lt.s32.totalorder %s430_s21, 5  ;;  %v6786_v5 = vld [vmem:[%s8829_s4 + $0x28] sm:$0xff]  ;;  %v6815_v13 = vld [vmem:[%s8829_s4 + $0x30] sm:$0xff]  ;;  %v6535_v14 = vld [vmem:[%s8828_s3] sm:$0xff]  }
  0x11   : > { %694 = vmatprep.mubr.bf16.mxu0 %v8836_v2  ;;  %895 = vmatprep.mubr.bf16.mxu1 %v8836_v2  ;;  %v6825_v15 = vld [vmem:[%s8829_s4 + $0x48] sm:$0xff]  ;;  %v6831_v16 = vld [vmem:[%s8829_s4 + $0x40] sm:$0xff]  ;;  %v6839_v17 = vld [vmem:[%s8829_s4 + $0x58] sm:$0xff] }
  0x12   : > { %s9267_s21 = smov (!%p432_p4, %s430_s21), 5  ;;  %v6844_v18 = vld [vmem:[%s8829_s4 + $0x50] sm:$0xff]  ;;  %v6536_v19 = vld [vmem:[%s8828_s3 + $0x8] sm:$0xff]   ;;  %v6860_v21 = vld [vmem:[%s8829_s4 + $0x60] sm:$0xff] }
  0x13   : > { %s6504_s28 = sshll.u32 %s9267_s21, 4  ;;  %v6855_v20 = vld [vmem:[%s8829_s4 + $0x68] sm:$0xff]  ;;  %v6868_v22 = vld [vmem:[%s8829_s4 + $0x78] sm:$0xff]  ;;  %v6873_v23 = vld [vmem:[%s8829_s4 + $0x70] sm:$0xff]  ;;  %s6506_s11 = sshll.u32 %s9267_s21, 8 }
  0x14   : > { %527 = vperm.xlu1 %6534, %v6770_v3   ;;  %517 = vperm.xlu0 %6533, %v6775_v4   ;;  %s6799_s13 = scalar_lea.vmem %s8825_s0, %s6504_s28  ;;  %v6537_v24 = vld [vmem:[%s8828_s3 + $0x10] sm:$0xff]   ;;  %v6885_v25 = vld [vmem:[%s8831_s6 + $0x8] sm:$0xff]  ;;  %v6890_v26 = vld [vmem:[%s8831_s6] sm:$0xff]  ;;  %s6909_s30 = scalar_lea.vmem %s8827_s2, %s6506_s11 }
  0x15   : > { %v475_v7 = vld [vmem:[%s6799_s13 + $0x8] sm:$0xff]  ;;  %v474_v8 = vld [vmem:[%s6799_s13] sm:$0xff]  ;;  %v6896_v27 = vld [vmem:[%s8831_s6 + $0x18] sm:$0xff]  ;;  %s6507_s11 = sshll.u32 %s9267_s21, 7 }
  0x16   : > { %v477_v9 = vpack.c.bf16 %v475_v7, %v475_v7  ;;  %v476_v10 = vpack.c.bf16 %v474_v8, %v474_v8  ;;  %v6901_v28 = vld [vmem:[%s8831_s6 + $0x10] sm:$0xff]  ;;  %v6538_v29 = vld [vmem:[%s8828_s3 + $0x18] sm:$0xff]   ;;  %v945_v30 = vld [vmem:[%s6909_s30 + $0x8] sm:$0xff]  ;;  %s7952_s18 = scalar_lea.vmem %s8835_s10, %s6507_s11 }
  0x17   : > { %v944_v31 = vld [vmem:[%s6909_s30] sm:$0xff]  ;;  %v947_v32 = vld [vmem:[%s6909_s30 + $0x18] sm:$0xff]  ;;  %v946_v33 = vld [vmem:[%s6909_s30 + $0x10] sm:$0xff] }
  0x18   : > { %537 = vperm.xlu1 %6534, %v6786_v5   ;;  %532 = vperm.xlu0 %6533, %v6792_v6   ;;  %v657_v11 = vsel %vm655_vm0, %v476_v10, 0  ;;  %v6539_v34 = vld [vmem:[%s8828_s3 + $0x20] sm:$0xff]   ;;  %v949_v35 = vld [vmem:[%s6909_s30 + $0x28] sm:$0xff]  ;;  %v951_v37 = vld [vmem:[%s6909_s30 + $0x38] sm:$0xff] }
  0x19   : > { %5976 = vmatprep.subr.msk.bf16.mxu0 %vm655_vm0, %v477_v9  ;;  %v948_v36 = vld [vmem:[%s6909_s30 + $0x20] sm:$0xff]  ;;  %v950_v38 = vld [vmem:[%s6909_s30 + $0x30] sm:$0xff]  ;;  %v6540_v39 = vld [vmem:[%s8828_s3 + $0x28] sm:$0xff]  }
  0x1a   : > { %663 = vmatpush1.bf16.msra.mxu0 %v657_v11  ;;  %v953_v40 = vld [vmem:[%s6909_s30 + $0x48] sm:$0xff]  ;;  %v952_v41 = vld [vmem:[%s6909_s30 + $0x40] sm:$0xff]  ;;  %v955_v42 = vld [vmem:[%s6909_s30 + $0x58] sm:$0xff] }
  0x1b   : > { %v954_v43 = vld [vmem:[%s6909_s30 + $0x50] sm:$0xff]  ;;  %v957_v45 = vld [vmem:[%s6909_s30 + $0x68] sm:$0xff]  ;;  %v956_v46 = vld [vmem:[%s6909_s30 + $0x60] sm:$0xff] }
  0x1c   : > { %547 = vperm.xlu1 %6534, %v6810_v12   ;;  %542 = vperm.xlu0 %6533, %v6815_v13   ;;  %v6541_v44 = vld [vmem:[%s8828_s3 + $0x30] sm:$0xff]   ;;  %v959_v47 = vld [vmem:[%s6909_s30 + $0x78] sm:$0xff]  ;;  %v6954_v50 = vld [vmem:[%s8829_s4 + $0x88] sm:$0xff] }
  0x1d   : > { %5977 = vmatmul.mubr.msk.bf16.vlgmr.msra.gmra.mrb[0].mxu0 %vm630_vm1, %v6535_v14  ;;  %v958_v48 = vld [vmem:[%s6909_s30 + $0x70] sm:$0xff]  ;;  %v6542_v49 = vld [vmem:[%s8828_s3 + $0x38] sm:$0xff]   ;;  %v6959_v51 = vld [vmem:[%s8829_s4 + $0x80] sm:$0xff] }
  0x1e   : > { %704 = vmatprep.mubr.bf16.mxu0 %v8836_v2  ;;  %v6966_v52 = vld [vmem:[%s8829_s4 + $0x98] sm:$0xff]  ;;  %v6971_v53 = vld [vmem:[%s8829_s4 + $0x90] sm:$0xff]  ;;  %v6978_v54 = vld [vmem:[%s8829_s4 + $0xa8] sm:$0xff] }
  0x1f   : > { %v6983_v55 = vld [vmem:[%s8829_s4 + $0xa0] sm:$0xff]  ;;  %v6990_v56 = vld [vmem:[%s8829_s4 + $0xb8] sm:$0xff]  ;;  %v6995_v57 = vld [vmem:[%s8829_s4 + $0xb0] sm:$0xff] }
  0x20   : > { %557 = vperm.xlu1 %6534, %v6825_v15   ;;  %552 = vperm.xlu0 %6533, %v6831_v16   ;;  %v7002_v58 = vld [vmem:[%s8829_s4 + $0xc8] sm:$0xff]  ;;  %v7007_v59 = vld [vmem:[%s8829_s4 + $0xc0] sm:$0xff]  ;;  %v7014_v60 = vld [vmem:[%s8829_s4 + $0xd8] sm:$0xff] }
  0x21   : > { %v7019_v61 = vld [vmem:[%s8829_s4 + $0xd0] sm:$0xff]  ;;  %v7026_v62 = vld [vmem:[%s8829_s4 + $0xe8] sm:$0xff]  ;;  %v7031_v63 = vld [vmem:[%s8829_s4 + $0xe0] sm:$0xff] }
  0x22   : > { %v7038_v7 = vld [vmem:[%s8829_s4 + $0xf8] sm:$0xff]  ;;  %v7043_v8 = vld [vmem:[%s8829_s4 + $0xf0] sm:$0xff]  ;;  %v7050_v9 = vld [vmem:[%s8831_s6 + $0x28] sm:$0xff] }
  0x23   : > { %v7055_v10 = vld [vmem:[%s8831_s6 + $0x20] sm:$0xff]  ;;  %v7062_v11 = vld [vmem:[%s8831_s6 + $0x38] sm:$0xff]  ;;  %v7067_v14 = vld [vmem:[%s8831_s6 + $0x30] sm:$0xff] }
  0x24   : > { %567 = vperm.xlu1 %6534, %v6839_v17   ;;  %562 = vperm.xlu0 %6533, %v6844_v18  }
  0x25   : > { %5978 = vmatmul.mubr.msk.bf16.gmra.mrb[4].mxu0 %vm630_vm1, %v6536_v19  ;;  %v6081_v19 = vld [vmem:[%s6909_s30 + $0x88] sm:$0xff] }
  0x26   : > { %714 = vmatprep.mubr.bf16.mxu0 %v8836_v2 }
  0x28   : > { %577 = vperm.xlu1 %6534, %v6855_v20   ;;  %572 = vperm.xlu0 %6533, %v6860_v21  }
  0x2c   : > { %587 = vperm.xlu1 %6534, %v6868_v22   ;;  %582 = vperm.xlu0 %6533, %v6873_v23  }
  0x2d   : > { %5979 = vmatmul.mubr.msk.bf16.gmra.mrb[8].mxu0 %vm630_vm1, %v6537_v24  ;;  %v6080_v24 = vld [vmem:[%s6909_s30 + $0x80] sm:$0xff] }
  0x2e   : > { %724 = vmatprep.mubr.bf16.mxu0 %v8836_v2 }
  0x30   : > { %838 = vperm.xlu1 %6534, %v6885_v25   ;;  %833 = vperm.xlu0 %6533, %v6890_v26  }
  0x34   : > { %848 = vperm.xlu1 %6534, %v6896_v27   ;;  %843 = vperm.xlu0 %6533, %v6901_v28  }
  0x35   : > { %5980 = vmatmul.mubr.msk.bf16.gmra.mrb[12].mxu0 %vm630_vm1, %v6538_v29  ;;  %v6083_v29 = vld [vmem:[%s6909_s30 + $0x98] sm:$0xff] }
  0x36   : > { %734 = vmatprep.mubr.bf16.mxu0 %v8836_v2 }
  0x38   : > { %967 = vperm.xlu1 %6534, %v945_v30   ;;  %962 = vperm.xlu0 %6533, %v944_v31   ;;  %v6082_v30 = vld [vmem:[%s6909_s30 + $0x90] sm:$0xff]  ;;  %v6085_v31 = vld [vmem:[%s6909_s30 + $0xa8] sm:$0xff] }
  0x3c   : > { %977 = vperm.xlu1 %6534, %v947_v32   ;;  %972 = vperm.xlu0 %6533, %v946_v33   ;;  %v6084_v32 = vld [vmem:[%s6909_s30 + $0xa0] sm:$0xff]  ;;  %v6087_v33 = vld [vmem:[%s6909_s30 + $0xb8] sm:$0xff] }
  0x3d   : > { %5981 = vmatmul.mubr.msk.bf16.gmra.mrb[16].mxu0 %vm630_vm1, %v6539_v34  ;;  %v6086_v34 = vld [vmem:[%s6909_s30 + $0xb0] sm:$0xff] }
  0x3e   : > { %744 = vmatprep.mubr.bf16.mxu0 %v8836_v2 }
  0x40   : > { %987 = vperm.xlu1 %6534, %v949_v35   ;;  %982 = vperm.xlu0 %6533, %v948_v36   ;;  %v6089_v35 = vld [vmem:[%s6909_s30 + $0xc8] sm:$0xff]  ;;  %v6088_v36 = vld [vmem:[%s6909_s30 + $0xc0] sm:$0xff] }
  0x44   : > { %997 = vperm.xlu1 %6534, %v951_v37   ;;  %992 = vperm.xlu0 %6533, %v950_v38  }
  0x45   : > { %5982 = vmatmul.mubr.msk.bf16.gmra.mrb[20].mxu0 %vm630_vm1, %v6540_v39  ;;  %v6091_v39 = vld [vmem:[%s6909_s30 + $0xd8] sm:$0xff] }
  0x46   : > { %754 = vmatprep.mubr.bf16.mxu0 %v8836_v2 }
  0x48   : > { %1007 = vperm.xlu1 %6534, %v953_v40   ;;  %1002 = vperm.xlu0 %6533, %v952_v41   ;;  %v6090_v40 = vld [vmem:[%s6909_s30 + $0xd0] sm:$0xff] }
  0x4c   : > { %1017 = vperm.xlu1 %6534, %v955_v42   ;;  %1012 = vperm.xlu0 %6533, %v954_v43   ;;  %v6093_v43 = vld [vmem:[%s6909_s30 + $0xe8] sm:$0xff] }
  0x4d   : > { %5983 = vmatmul.mubr.msk.bf16.gmra.mrb[24].mxu0 %vm630_vm1, %v6541_v44  ;;  %v6092_v44 = vld [vmem:[%s6909_s30 + $0xe0] sm:$0xff] }
  0x4e   : > { %764 = vmatprep.mubr.bf16.mxu0 %v8836_v2 }
  0x50   : > { %1027 = vperm.xlu1 %6534, %v957_v45   ;;  %1022 = vperm.xlu0 %6533, %v956_v46  }
  0x54   : > { %1037 = vperm.xlu1 %6534, %v959_v47   ;;  %1032 = vperm.xlu0 %6533, %v958_v48   ;;  %v6095_v47 = vld [vmem:[%s6909_s30 + $0xf8] sm:$0xff]  ;;  %v6094_v48 = vld [vmem:[%s6909_s30 + $0xf0] sm:$0xff] }
  0x55   : > { %5984 = vmatmul.mubr.msk.bf16.gmra.mrb[28].mxu0 %vm630_vm1, %v6542_v49 }
  0x56   : > { %1338 = vmatprep.mubr.bf16.mxu0 %v8836_v2 }
  0x58   : > { %1412 = vperm.xlu1 %6534, %v6954_v50   ;;  %1407 = vperm.xlu0 %6533, %v6959_v51  }
  0x5c   : > { %1422 = vperm.xlu1 %6534, %v6966_v52   ;;  %1417 = vperm.xlu0 %6533, %v6971_v53  }
  0x60   : > { %1432 = vperm.xlu1 %6534, %v6978_v54   ;;  %1427 = vperm.xlu0 %6533, %v6983_v55  }
  0x64   : > { %1442 = vperm.xlu1 %6534, %v6990_v56   ;;  %1437 = vperm.xlu0 %6533, %v6995_v57  }
  0x68   : > { %1452 = vperm.xlu1 %6534, %v7002_v58   ;;  %1447 = vperm.xlu0 %6533, %v7007_v59  }
  0x6c   : > { %1462 = vperm.xlu1 %6534, %v7014_v60   ;;  %1457 = vperm.xlu0 %6533, %v7019_v61  }
  0x70   : > { %1472 = vperm.xlu1 %6534, %v7026_v62   ;;  %1467 = vperm.xlu0 %6533, %v7031_v63  }
  0x74   : > { %1482 = vperm.xlu1 %6534, %v7038_v7   ;;  %1477 = vperm.xlu0 %6533, %v7043_v8  }
  0x78   : > { %1733 = vperm.xlu1 %6534, %v7050_v9   ;;  %1728 = vperm.xlu0 %6533, %v7055_v10  }
  0x7c   : > { %1743 = vperm.xlu1 %6534, %v7062_v11   ;;  %1738 = vperm.xlu0 %6533, %v7067_v14  }
  0x80   : > { %1864 = vperm.xlu1 %6534, %v6081_v19   ;;  %1859 = vperm.xlu0 %6533, %v6080_v24  }
  0x84   : > { %1874 = vperm.xlu1 %6534, %v6083_v29   ;;  %1869 = vperm.xlu0 %6533, %v6082_v30  }
  0x88   : > { %1884 = vperm.xlu1 %6534, %v6085_v31   ;;  %1879 = vperm.xlu0 %6533, %v6084_v32  }
  0x8c   : > { %1894 = vperm.xlu1 %6534, %v6087_v33   ;;  %1889 = vperm.xlu0 %6533, %v6086_v34  }
  0x8f   : > { %v7083_v37 = vpop.permute.xlu1 %522  ;;  %v7085_v38 = vpop.permute.xlu0 %512 }
  0x90   : > { %1904 = vperm.xlu1 %6534, %v6089_v35   ;;  %1899 = vperm.xlu0 %6533, %v6088_v36  }
  0x93   : > { %v7089_v41 = vpop.permute.xlu1 %527  ;;  %v7091_v42 = vpop.permute.xlu0 %517 }
  0x94   : > { %1914 = vperm.xlu1 %6534, %v6091_v39   ;;  %1909 = vperm.xlu0 %6533, %v6090_v40  }
  0x97   : > { %v7095_v45 = vpop.permute.xlu1 %537  ;;  %v7097_v46 = vpop.permute.xlu0 %532 }
  0x98   : > { %1924 = vperm.xlu1 %6534, %v6093_v43   ;;  %1919 = vperm.xlu0 %6533, %v6092_v44   ;;  %v6150_v44 = vld [vmem:[%s6909_s30 + $0x138] sm:$0xff] }
  0x9b   : > { %v7101_v49 = vpop.permute.xlu1 %547  ;;  %v7103_v19 = vpop.permute.xlu0 %542 }
  0x9c   : > { %1934 = vperm.xlu1 %6534, %v6095_v47   ;;  %1929 = vperm.xlu0 %6533, %v6094_v48   ;;  %v6149_v47 = vld [vmem:[%s6909_s30 + $0x130] sm:$0xff] }
  0x9f   : > { %v7105_v24 = vpop.permute.xlu1 %557  ;;  %v7107_v29 = vpop.permute.xlu0 %552 }
  0xa0   : > { %2309 = vperm.xlu1 %6534, %v6775_v4   ;;  %2304 = vperm.xlu0 %6533, %v6761_v1  }
  0xa3   : > { %v7111_v30 = vpop.permute.xlu1 %567  ;;  %v7113_v31 = vpop.permute.xlu0 %562 }
  0xa4   : > { %2319 = vperm.xlu1 %6534, %v6770_v3   ;;  %2314 = vperm.xlu0 %6533, %v6756_v0  }
  0xa7   : > { %v7117_v32 = vpop.permute.xlu1 %577  ;;  %v7119_v33 = vpop.permute.xlu0 %572 }
  0xa8   : > { %2329 = vperm.xlu1 %6534, %v6786_v5   ;;  %2324 = vperm.xlu0 %6533, %v6792_v6  }
  0xab   : > { %v7123_v34 = vpop.permute.xlu1 %587  ;;  %v7125_v4 = vpop.permute.xlu0 %582 }
  0xac   : > { %2339 = vperm.xlu1 %6534, %v6810_v12   ;;  %2334 = vperm.xlu0 %6533, %v6815_v13  }
  0xaf   : > { %v7129_v1 = vpop.permute.xlu1 %838  ;;  %v7131_v3 = vpop.permute.xlu0 %833 }
  0xb0   : > { %2349 = vperm.xlu1 %6534, %v6825_v15   ;;  %2344 = vperm.xlu0 %6533, %v6831_v16  }
  0xb3   : > { %v7135_v0 = vpop.permute.xlu1 %848  ;;  %v7137_v5 = vpop.permute.xlu0 %843 }
  0xb4   : > { %2359 = vperm.xlu1 %6534, %v6839_v17   ;;  %2354 = vperm.xlu0 %6533, %v6844_v18  }
  0xb7   : > { %v7141_v6 = vpop.permute.xlu1 %967  ;;  %v7143_v12 = vpop.permute.xlu0 %962 }
  0xb8   : > { %2369 = vperm.xlu1 %6534, %v6855_v20   ;;  %2364 = vperm.xlu0 %6533, %v6860_v21   ;;  %v6144_v21 = vld [vmem:[%s6909_s30 + $0x108] sm:$0xff] }
  0xbb   : > { %v7147_v13 = vpop.permute.xlu1 %977  ;;  %v7149_v15 = vpop.permute.xlu0 %972 }
  0xbc   : > { %2379 = vperm.xlu1 %6534, %v6868_v22   ;;  %2374 = vperm.xlu0 %6533, %v6873_v23   ;;  %v6143_v22 = vld [vmem:[%s6909_s30 + $0x100] sm:$0xff] }
  0xbf   : > { %v7153_v16 = vpop.permute.xlu1 %987  ;;  %v7155_v17 = vpop.permute.xlu0 %982 }
  0xc0   : > { %2628 = vperm.xlu1 %6534, %v6885_v25   ;;  %2623 = vperm.xlu0 %6533, %v6890_v26   ;;  %v6146_v25 = vld [vmem:[%s6909_s30 + $0x118] sm:$0xff]  ;;  %v6145_v26 = vld [vmem:[%s6909_s30 + $0x110] sm:$0xff] }
  0xc3   : > { %v7159_v18 = vpop.permute.xlu1 %997  ;;  %v7161_v20 = vpop.permute.xlu0 %992 }
  0xc4   : > { %2638 = vperm.xlu1 %6534, %v6896_v27   ;;  %2633 = vperm.xlu0 %6533, %v6901_v28   ;;  %v6148_v27 = vld [vmem:[%s6909_s30 + $0x128] sm:$0xff]  ;;  %v6147_v28 = vld [vmem:[%s6909_s30 + $0x120] sm:$0xff] }
  0xc7   : > { %v7167_v23 = vpop.permute.xlu1 %1007  ;;  %v7169_v35 = vpop.permute.xlu0 %1002 }
  0xc8   : > { %2758 = vperm.xlu1 %6534, %v6144_v21   ;;  %2753 = vperm.xlu0 %6533, %v6143_v22   ;;  %v6152_v22 = vld [vmem:[%s6909_s30 + $0x148] sm:$0xff] }
  0xcb   : > { %v7173_v36 = vpop.permute.xlu1 %1017  ;;  %v7175_v39 = vpop.permute.xlu0 %1012 }
  0xcc   : > { %2768 = vperm.xlu1 %6534, %v6146_v25   ;;  %2763 = vperm.xlu0 %6533, %v6145_v26   ;;  %v6151_v25 = vld [vmem:[%s6909_s30 + $0x140] sm:$0xff] }
  0xcf   : > { %v7179_v40 = vpop.permute.xlu1 %1027  ;;  %v7181_v43 = vpop.permute.xlu0 %1022 }
  0xd0   : > { %8979 = vst [vmem:[#allocation2_spill] sm:$0xff] %v7179_v40  ;;  %8980 = vst [vmem:[#allocation3_spill] sm:$0xff] %v7181_v43  ;;  %2778 = vperm.xlu1 %6534, %v6148_v27   ;;  %2773 = vperm.xlu0 %6533, %v6147_v28   ;;  %v6154_v27 = vld [vmem:[%s6909_s30 + $0x158] sm:$0xff]  ;;  %v6153_v28 = vld [vmem:[%s6909_s30 + $0x150] sm:$0xff] }
  0xd3   : > { %v7185_v48 = vpop.permute.xlu1 %1037  ;;  %v7187_v21 = vpop.permute.xlu0 %1032 }
  0xd4   : > { %8981 = vst [vmem:[#allocation4_spill] sm:$0xff] %v7185_v48  ;;  %8982 = vst [vmem:[#allocation5_spill] sm:$0xff] %v7187_v21  ;;  %2788 = vperm.xlu1 %6534, %v6150_v44   ;;  %2783 = vperm.xlu0 %6533, %v6149_v47   ;;  %v6156_v44 = vld [vmem:[%s6909_s30 + $0x168] sm:$0xff]  ;;  %v6155_v47 = vld [vmem:[%s6909_s30 + $0x160] sm:$0xff] }
  0xd7   : > { %v7191_v26 = vpop.permute.xlu1 %1412  ;;  %v7193_v2 = vpop.permute.xlu0 %1407 }
  0xd8   : > { %8983 = vst [vmem:[#allocation6_spill] sm:$0xff] %v7191_v26  ;;  %8984 = vst [vmem:[#allocation7_spill] sm:$0xff] %v7193_v2  ;;  %2798 = vperm.xlu1 %6534, %v6152_v22   ;;  %2793 = vperm.xlu0 %6533, %v6151_v25   ;;  %v6158_v26 = vld [vmem:[%s6909_s30 + $0x178] sm:$0xff]  ;;  %v6157_v2 = vld [vmem:[%s6909_s30 + $0x170] sm:$0xff] }
  0xdb   : > { %v7197_v40 = vpop.permute.xlu1 %1422  ;;  %v7199_v48 = vpop.permute.xlu0 %1417 }
  0xdc   : > { %8985 = vst [vmem:[#allocation8_spill] sm:$0xff] %v7197_v40  ;;  %2808 = vperm.xlu1 %6534, %v6154_v27   ;;  %2803 = vperm.xlu0 %6533, %v6153_v28  }
  0xdf   : > { %v7203_v21 = vpop.permute.xlu1 %1432  ;;  %v7205_v43 = vpop.permute.xlu0 %1427 }
  0xe0   : > { %2818 = vperm.xlu1 %6534, %v6156_v44   ;;  %2813 = vperm.xlu0 %6533, %v6155_v47  }
  0xe3   : > { %v7209_v22 = vpop.permute.xlu1 %1442  ;;  %v7211_v25 = vpop.permute.xlu0 %1437 }
  0xe4   : > { %8986 = vst [vmem:[#allocation9_spill] sm:$0xff] %v7209_v22  ;;  %2828 = vperm.xlu1 %6534, %v6158_v26   ;;  %2823 = vperm.xlu0 %6533, %v6157_v2  }
  0xe7   : > { %v7213_v40 = vpop.permute.xlu1 %1452  ;;  %v7215_v27 = vpop.permute.xlu0 %1447 }
  0xe8   : > { %8987 = vst [vmem:[#allocation10_spill] sm:$0xff] %v7213_v40  ;;  %8988 = vst [vmem:[#allocation11_spill] sm:$0xff] %v7215_v27  ;;  %3202 = vperm.xlu1 %6534, %v6954_v50   ;;  %3197 = vperm.xlu0 %6533, %v6959_v51  }
  0xeb   : > { %v7219_v28 = vpop.permute.xlu1 %1462  ;;  %v7221_v44 = vpop.permute.xlu0 %1457 }
  0xec   : > { %8989 = vst [vmem:[#allocation12_spill] sm:$0xff] %v7219_v28  ;;  %8990 = vst [vmem:[#allocation13_spill] sm:$0xff] %v7221_v44  ;;  %3212 = vperm.xlu1 %6534, %v6966_v52   ;;  %3207 = vperm.xlu0 %6533, %v6971_v53  }
  0xef   : > { %v7225_v47 = vpop.permute.xlu1 %1472  ;;  %v7227_v26 = vpop.permute.xlu0 %1467 }
  0xf0   : > { %8991 = vst [vmem:[#allocation14_spill] sm:$0xff] %v7225_v47  ;;  %8992 = vst [vmem:[#allocation15_spill] sm:$0xff] %v7227_v26  ;;  %3222 = vperm.xlu1 %6534, %v6978_v54   ;;  %3217 = vperm.xlu0 %6533, %v6983_v55   ;;  %v696_v2 = vpop.f32.mrb[0].mxu0 }
  0xf1   : > { %v697_v50 = vadd.f32 %v696_v2, %v7085_v38  ;;  %v698_v51 = vpop.f32.mrb[1].mxu0 }
  0xf2   : > { %v700_v40 = vpop.f32.mrb[2].mxu0  ;;  %v699_v28 = vadd.f32 %v698_v51, %v7085_v38 }
  0xf3   : > { %v701_v44 = vadd.f32 %v700_v40, %v7091_v42  ;;  %v7234_v52 = vpop.permute.xlu1 %1482  ;;  %v7236_v53 = vpop.permute.xlu0 %1477  ;;  %v775_v54 = vmax.f32 %v697_v50, 0.0 }
  0xf4   : > { %8993 = vst [vmem:[#allocation16_spill] sm:$0xff] %v7234_v52  ;;  %v702_v47 = vpop.f32.mrb[3].mxu0  ;;  %3232 = vperm.xlu1 %6534, %v6990_v56   ;;  %3227 = vperm.xlu0 %6533, %v6995_v57   ;;  %v776_v2 = vmax.f32 %v699_v28, 0.0 }
  0xf5   : > { %v777_v55 = vmax.f32 %v701_v44, 0.0  ;;  %v703_v26 = vadd.f32 %v702_v47, %v7091_v42 }
  0xf7   : > { %v778_v27 = vmax.f32 %v703_v26, 0.0  ;;  %v7241_v22 = vpop.permute.xlu1 %1733  ;;  %v7243_v38 = vpop.permute.xlu0 %1728  ;;  %v807_v40 = vpack.c.bf16 %v777_v55, %v775_v54 }
  0xf8   : > { %3242 = vperm.xlu1 %6534, %v7002_v58   ;;  %3237 = vperm.xlu0 %6533, %v7007_v59   ;;  %v706_v51 = vpop.f32.mrb[4].mxu0 }
  0xf9   : > { %v707_v56 = vadd.f32 %v706_v51, %v7083_v37  ;;  %v708_v52 = vpop.f32.mrb[5].mxu0  ;;  %v808_v57 = vpack.c.bf16 %v778_v27, %v776_v2 }
  0xfa   : > { %v710_v50 = vpop.f32.mrb[6].mxu0  ;;  %v709_v44 = vadd.f32 %v708_v52, %v7083_v37 }
  0xfb   : > { %v711_v42 = vadd.f32 %v710_v50, %v7089_v41  ;;  %863 = vmatprep.subr.bf16.mxu1 %v808_v57  ;;  %v7250_v28 = vpop.permute.xlu1 %1743  ;;  %v7252_v47 = vpop.permute.xlu0 %1738  ;;  %v779_v58 = vmax.f32 %v707_v56, 0.0 }
  0xfc   : > { %v712_v26 = vpop.f32.mrb[7].mxu0  ;;  %864 = vmatpush1.bf16.msra.mxu1 %v807_v40  ;;  %3252 = vperm.xlu1 %6534, %v7014_v60   ;;  %v780_v27 = vmax.f32 %v709_v44, 0.0 }
  0xfd   : > { %v781_v59 = vmax.f32 %v711_v42, 0.0  ;;  %v713_v54 = vadd.f32 %v712_v26, %v7089_v41  ;;  %3247 = vperm.xlu0 %6533, %v7019_v61  }
  0xff   : > { %v809_v55 = vpack.c.bf16 %v781_v59, %v779_v58  ;;  %v782_v37 = vmax.f32 %v713_v54, 0.0  ;;  %v7257_v52 = vpop.permute.xlu1 %1864  ;;  %v7259_v2 = vpop.permute.xlu0 %1859 }
 0x100   : > { %3262 = vperm.xlu1 %6534, %v7026_v62   ;;  %v716_v51 = vpop.f32.mrb[8].mxu0 }
 0x101   : > { %v810_v57 = vpack.c.bf16 %v782_v37, %v780_v27  ;;  %3257 = vperm.xlu0 %6533, %v7031_v63   ;;  %v717_v60 = vadd.f32 %v716_v51, %v7097_v46  ;;  %v718_v40 = vpop.f32.mrb[9].mxu0 }
 0x102   : > { %v720_v56 = vpop.f32.mrb[10].mxu0  ;;  %v719_v41 = vadd.f32 %v718_v40, %v7097_v46 }
 0x103   : > { %v721_v61 = vadd.f32 %v720_v56, %v7095_v45  ;;  %865 = vmatprep.subr.bf16.mxu1 %v810_v57  ;;  %v7266_v50 = vpop.permute.xlu1 %1874  ;;  %v7268_v44 = vpop.permute.xlu0 %1869  ;;  %v783_v62 = vmax.f32 %v717_v60, 0.0 }
 0x104   : > { %v722_v42 = vpop.f32.mrb[11].mxu0  ;;  %866 = vmatpush1.bf16.msra.mxu1 %v809_v55  ;;  %3272 = vperm.xlu1 %6534, %v7038_v7   ;;  %v784_v58 = vmax.f32 %v719_v41, 0.0 }
 0x105   : > { %v785_v26 = vmax.f32 %v721_v61, 0.0  ;;  %v723_v63 = vadd.f32 %v722_v42, %v7095_v45  ;;  %3267 = vperm.xlu0 %6533, %v7043_v8   ;;  %v6262_v61 = vld [vmem:[%s6909_s30 + $0x180] sm:$0xff] }
 0x107   : > { %v811_v59 = vpack.c.bf16 %v785_v26, %v783_v62  ;;  %v786_v46 = vmax.f32 %v723_v63, 0.0  ;;  %v7273_v54 = vpop.permute.xlu1 %1884  ;;  %v7275_v27 = vpop.permute.xlu0 %1879 }
 0x108   : > { %3521 = vperm.xlu1 %6534, %v7050_v9   ;;  %v726_v37 = vpop.f32.mrb[12].mxu0 }
 0x109   : > { %v812_v51 = vpack.c.bf16 %v786_v46, %v784_v58  ;;  %3516 = vperm.xlu0 %6533, %v7055_v10   ;;  %v727_v7 = vadd.f32 %v726_v37, %v7103_v19  ;;  %v728_v45 = vpop.f32.mrb[13].mxu0 }
 0x10a   : > { %v730_v55 = vpop.f32.mrb[14].mxu0  ;;  %v729_v8 = vadd.f32 %v728_v45, %v7103_v19  ;;  %v6263_v19 = vld [vmem:[%s6909_s30 + $0x188] sm:$0xff] }
 0x10b   : > { %v731_v57 = vadd.f32 %v730_v55, %v7101_v49  ;;  %867 = vmatprep.subr.bf16.mxu1 %v812_v51  ;;  %v7282_v60 = vpop.permute.xlu1 %1894  ;;  %v7284_v40 = vpop.permute.xlu0 %1889  ;;  %v787_v10 = vmax.f32 %v727_v7, 0.0  ;;  %v6264_v51 = vld [vmem:[%s6909_s30 + $0x190] sm:$0xff] }
 0x10c   : > { %v732_v9 = vpop.f32.mrb[15].mxu0  ;;  %868 = vmatpush1.bf16.msra.mxu1 %v811_v59  ;;  %3531 = vperm.xlu1 %6534, %v7062_v11   ;;  %v788_v42 = vmax.f32 %v729_v8, 0.0 }
 0x10d   : > { %v789_v56 = vmax.f32 %v731_v57, 0.0  ;;  %v733_v41 = vadd.f32 %v732_v9, %v7101_v49  ;;  %3526 = vperm.xlu0 %6533, %v7067_v14   ;;  %v6265_v49 = vld [vmem:[%s6909_s30 + $0x198] sm:$0xff] }
 0x10f   : > { %v813_v62 = vpack.c.bf16 %v789_v56, %v787_v10  ;;  %v790_v26 = vmax.f32 %v733_v41, 0.0  ;;  %v7291_v63 = vpop.permute.xlu1 %1904  ;;  %v7293_v58 = vpop.permute.xlu0 %1899  ;;  %v6267_v41 = vld [vmem:[%s6909_s30 + $0x1a8] sm:$0xff] }
 0x110   : > { %3651 = vperm.xlu1 %6534, %v6263_v19   ;;  %v736_v59 = vpop.f32.mrb[16].mxu0  ;;  %v6266_v19 = vld [vmem:[%s6909_s30 + $0x1a0] sm:$0xff] }
 0x111   : > { %v814_v11 = vpack.c.bf16 %v790_v26, %v788_v42  ;;  %3646 = vperm.xlu0 %6533, %v6262_v61   ;;  %v737_v46 = vadd.f32 %v736_v59, %v7107_v29  ;;  %v738_v37 = vpop.f32.mrb[17].mxu0 }
 0x112   : > { %v740_v14 = vpop.f32.mrb[18].mxu0  ;;  %v739_v7 = vadd.f32 %v738_v37, %v7107_v29 }
 0x113   : > { %v741_v45 = vadd.f32 %v740_v14, %v7105_v24  ;;  %869 = vmatprep.subr.bf16.mxu1 %v814_v11  ;;  %v7300_v55 = vpop.permute.xlu1 %1914  ;;  %v7302_v8 = vpop.permute.xlu0 %1909  ;;  %v791_v9 = vmax.f32 %v737_v46, 0.0  ;;  %v6268_v14 = vld [vmem:[%s6909_s30 + $0x1b0] sm:$0xff] }
 0x114   : > { %v742_v57 = vpop.f32.mrb[19].mxu0  ;;  %870 = vmatpush1.bf16.msra.mxu1 %v813_v62  ;;  %3661 = vperm.xlu1 %6534, %v6265_v49   ;;  %v792_v29 = vmax.f32 %v739_v7, 0.0 }
 0x115   : > { %v793_v10 = vmax.f32 %v741_v45, 0.0  ;;  %v743_v56 = vadd.f32 %v742_v57, %v7105_v24  ;;  %3656 = vperm.xlu0 %6533, %v6264_v51   ;;  %v6269_v24 = vld [vmem:[%s6909_s30 + $0x1b8] sm:$0xff] }
 0x117   : > { %v815_v61 = vpack.c.bf16 %v793_v10, %v791_v9  ;;  %v794_v42 = vmax.f32 %v743_v56, 0.0  ;;  %v7307_v26 = vpop.permute.xlu1 %1924  ;;  %v7309_v59 = vpop.permute.xlu0 %1919 }
 0x118   : > { %3671 = vperm.xlu1 %6534, %v6267_v41   ;;  %v746_v11 = vpop.f32.mrb[20].mxu0 }
 0x119   : > { %v816_v62 = vpack.c.bf16 %v794_v42, %v792_v29  ;;  %3666 = vperm.xlu0 %6533, %v6266_v19   ;;  %v747_v46 = vadd.f32 %v746_v11, %v7113_v31  ;;  %v748_v37 = vpop.f32.mrb[21].mxu0  ;;  %v6271_v19 = vld [vmem:[%s6909_s30 + $0x1c8] sm:$0xff]  ;;  %v6270_v29 = vld [vmem:[%s6909_s30 + $0x1c0] sm:$0xff] }
 0x11a   : > { %v750_v49 = vpop.f32.mrb[22].mxu0  ;;  %v749_v51 = vadd.f32 %v748_v37, %v7113_v31 }
 0x11b   : > { %v751_v7 = vadd.f32 %v750_v49, %v7111_v30  ;;  %871 = vmatprep.subr.bf16.mxu1 %v816_v62  ;;  %v7316_v45 = vpop.permute.xlu1 %1934  ;;  %v7318_v57 = vpop.permute.xlu0 %1929  ;;  %v795_v10 = vmax.f32 %v747_v46, 0.0 }
 0x11c   : > { %8994 = vst [vmem:[#allocation17_spill] sm:$0xff] %v7316_v45  ;;  %v752_v9 = vpop.f32.mrb[23].mxu0  ;;  %872 = vmatpush1.bf16.msra.mxu1 %v815_v61  ;;  %3681 = vperm.xlu1 %6534, %v6269_v24   ;;  %v796_v31 = vmax.f32 %v749_v51, 0.0 }
 0x11d   : > { %v797_v56 = vmax.f32 %v751_v7, 0.0  ;;  %v753_v41 = vadd.f32 %v752_v9, %v7111_v30  ;;  %3676 = vperm.xlu0 %6533, %v6268_v14   ;;  %v6273_v30 = vld [vmem:[%s6909_s30 + $0x1d8] sm:$0xff]  ;;  %v6272_v14 = vld [vmem:[%s6909_s30 + $0x1d0] sm:$0xff] }
 0x11f   : > { %v817_v42 = vpack.c.bf16 %v797_v56, %v795_v10  ;;  %v798_v11 = vmax.f32 %v753_v41, 0.0  ;;  %v7323_v62 = vpop.permute.xlu1 %2309  ;;  %v7325_v45 = vpop.permute.xlu0 %2304 }
 0x120   : > { %3691 = vperm.xlu1 %6534, %v6271_v19   ;;  %v756_v37 = vpop.f32.mrb[24].mxu0  ;;  %v6275_v19 = vld [vmem:[%s6909_s30 + $0x1e8] sm:$0xff] }
 0x121   : > { %v818_v49 = vpack.c.bf16 %v798_v11, %v796_v31  ;;  %3686 = vperm.xlu0 %6533, %v6270_v29   ;;  %v757_v61 = vadd.f32 %v756_v37, %v7119_v33  ;;  %v758_v46 = vpop.f32.mrb[25].mxu0  ;;  %v6274_v31 = vld [vmem:[%s6909_s30 + $0x1e0] sm:$0xff] }
 0x122   : > { %v760_v24 = vpop.f32.mrb[26].mxu0  ;;  %v759_v51 = vadd.f32 %v758_v46, %v7119_v33 }
 0x123   : > { %v761_v7 = vadd.f32 %v760_v24, %v7117_v32  ;;  %873 = vmatprep.subr.bf16.mxu1 %v818_v49  ;;  %v762_v9 = vpop.f32.mrb[27].mxu0  ;;  %v799_v10 = vmax.f32 %v757_v61, 0.0  ;;  %v7334_v29 = vpop.permute.xlu1 %2319  ;;  %v6277_v24 = vld [vmem:[%s6909_s30 + $0x1f8] sm:$0xff] }
 0x124   : > { %874 = vmatpush1.bf16.msra.mxu1 %v817_v42  ;;  %3701 = vperm.xlu1 %6534, %v6273_v30   ;;  %v763_v41 = vadd.f32 %v762_v9, %v7117_v32  ;;  %v800_v11 = vmax.f32 %v759_v51, 0.0  ;;  %v7337_v33 = vpop.permute.xlu0 %2314 }
 0x125   : > { %v801_v56 = vmax.f32 %v761_v7, 0.0  ;;  %3696 = vperm.xlu0 %6533, %v6272_v14   ;;  %v6276_v14 = vld [vmem:[%s6909_s30 + $0x1f0] sm:$0xff] }
 0x126   : > { %v802_v46 = vmax.f32 %v763_v41, 0.0 }
 0x127   : > { %v819_v37 = vpack.c.bf16 %v801_v56, %v799_v10  ;;  %v7344_v51 = vpop.permute.xlu1 %2329 }
 0x128   : > { %3711 = vperm.xlu1 %6534, %v6275_v19   ;;  %v766_v49 = vpop.f32.mrb[28].mxu0  ;;  %v820_v42 = vpack.c.bf16 %v802_v46, %v800_v11  ;;  %8995 = vst [vmem:[#allocation18_spill] sm:$0xff] %v7344_v51  ;;  %v7346_v56 = vpop.permute.xlu0 %2324  ;;  %v4072_v11 = vld [vmem:[%s8829_s4 + $0x8] sm:$0xff] }
 0x129   : > { %3706 = vperm.xlu0 %6533, %v6274_v31   ;;  %v767_v61 = vadd.f32 %v766_v49, %v7125_v4  ;;  %v768_v30 = vpop.f32.mrb[29].mxu0 }
 0x12a   : > { %v770_v32 = vpop.f32.mrb[30].mxu0  ;;  %v769_v7 = vadd.f32 %v768_v30, %v7125_v4  ;;  %875 = vmatprep.subr.bf16.mxu1 %v820_v42  ;;  %v4071_v4 = vld [vmem:[%s8829_s4] sm:$0xff]  ;;  %v4073_v30 = vld [vmem:[%s8829_s4 + $0x10] sm:$0xff] }
 0x12b   : > { %v771_v9 = vadd.f32 %v770_v32, %v7123_v34  ;;  %v772_v10 = vpop.f32.mrb[31].mxu0  ;;  %876 = vmatpush1.bf16.msra.mxu1 %v819_v37  ;;  %v803_v41 = vmax.f32 %v767_v61, 0.0  ;;  %v4074_v61 = vld [vmem:[%s8829_s4 + $0x18] sm:$0xff]  ;;  %v6543_v32 = vld [vmem:[%s8830_s5] sm:$0xff]  }
 0x12c   : > { %3721 = vperm.xlu1 %6534, %v6277_v24   ;;  %v773_v31 = vadd.f32 %v772_v10, %v7123_v34  ;;  %v804_v46 = vmax.f32 %v769_v7, 0.0  ;;  %v7358_v34 = vpop.permute.xlu1 %2339  ;;  %v7363_v24 = vpop.permute.xlu0 %2334  ;;  %v4075_v7 = vld [vmem:[%s8829_s4 + $0x20] sm:$0xff]  ;;  %v8999_v10 = vmov 0  }
 0x12d   : > { %v805_v19 = vmax.f32 %v771_v9, 0.0  ;;  %3716 = vperm.xlu0 %6533, %v6276_v14   ;;  %8996 = vst [vmem:[#allocation19_spill] sm:$0xff] %v7358_v34  ;;  %8997 = vst [vmem:[#allocation20_spill] sm:$0xff] %v7363_v24  ;;  %v4076_v14 = vld [vmem:[%s8829_s4 + $0x28] sm:$0xff] }
 0x12e   : > { %v806_v42 = vmax.f32 %v773_v31, 0.0  ;;  %v4077_v31 = vld [vmem:[%s8829_s4 + $0x30] sm:$0xff] }
 0x12f   : > { %v821_v49 = vpack.c.bf16 %v805_v19, %v803_v41  ;;  %v4078_v19 = vld [vmem:[%s8829_s4 + $0x38] sm:$0xff] }
 0x130   : > { %4094 = vperm.xlu1 %6534, %v4072_v11   ;;  %v822_v37 = vpack.c.bf16 %v806_v42, %v804_v46  ;;  %v7374_v9 = vpop.permute.xlu1 %2349  ;;  %v7377_v41 = vpop.permute.xlu0 %2344  ;;  %v6544_v11 = vld [vmem:[%s8830_s5 + $0x8] sm:$0xff]  }
 0x131   : > { %4089 = vperm.xlu0 %6533, %v4071_v4   ;;  %8998 = vst [vmem:[#allocation21_spill] sm:$0xff] %v7374_v9  ;;  %9000 = vst [vmem:[#allocation22_spill] sm:$0xff] %v7377_v41  ;;  %v4080_v4 = vld [vmem:[%s8829_s4 + $0x48] sm:$0xff] }
 0x132   : > { %877 = vmatprep.subr.bf16.mxu1 %v822_v37  ;;  %v4082_v37 = vld [vmem:[%s8829_s4 + $0x58] sm:$0xff] }
 0x133   : > { %878 = vmatpush1.bf16.msra.mxu1 %v821_v49  ;;  %v4079_v49 = vld [vmem:[%s8829_s4 + $0x40] sm:$0xff] }
 0x134   : > { %4104 = vperm.xlu1 %6534, %v4074_v61   ;;  %v7391_v46 = vpop.permute.xlu1 %2359  ;;  %v7396_v42 = vpop.permute.xlu0 %2354  ;;  %v4081_v61 = vld [vmem:[%s8829_s4 + $0x50] sm:$0xff] }
 0x135   : > { %4099 = vperm.xlu0 %6533, %v4073_v30   ;;  %9001 = vst [vmem:[#allocation23_spill] sm:$0xff] %v7391_v46  ;;  %9002 = vst [vmem:[#allocation24_spill] sm:$0xff] %v7396_v42  ;;  %v6347_v46 = vld [vmem:[%s6909_s30 + $0x270] sm:$0xff] }
 0x136   : > { %896 = vmatmul.mubr.bf16.vlgmr.msra.gmra.mrb[0].mxu1 %v6543_v32 }
 0x137   : > { %905 = vmatprep.mubr.bf16.mxu1 %v8999_v10 }
 0x138   : > { %4114 = vperm.xlu1 %6534, %v4076_v14   ;;  %v7405_v30 = vpop.permute.xlu1 %2369  ;;  %v7407_v32 = vpop.permute.xlu0 %2364  ;;  %v4084_v14 = vld [vmem:[%s8829_s4 + $0x68] sm:$0xff] }
 0x139   : > { %4109 = vperm.xlu0 %6533, %v4075_v7   ;;  %9003 = vst [vmem:[#allocation25_spill] sm:$0xff] %v7405_v30  ;;  %9004 = vst [vmem:[#allocation26_spill] sm:$0xff] %v7407_v32  ;;  %v4083_v7 = vld [vmem:[%s8829_s4 + $0x60] sm:$0xff] }
 0x13c   : > { %4124 = vperm.xlu1 %6534, %v4078_v19   ;;  %v4086_v19 = vld [vmem:[%s8829_s4 + $0x78] sm:$0xff] }
 0x13d   : > { %4119 = vperm.xlu0 %6533, %v4077_v31   ;;  %v7418_v31 = vpop.permute.xlu1 %2379 }
 0x13e   : > { %906 = vmatmul.mubr.bf16.gmra.mrb[4].mxu1 %v6544_v11  ;;  %9005 = vst [vmem:[#allocation27_spill] sm:$0xff] %v7418_v31  ;;  %v4085_v11 = vld [vmem:[%s8829_s4 + $0x70] sm:$0xff] }
 0x13f   : > { %1137 = vmatprep.mubr.bf16.mxu1 %v8999_v10 }
 0x140   : > { %4134 = vperm.xlu1 %6534, %v4080_v4   ;;  %v7423_v4 = vpop.permute.xlu0 %2374 }
 0x141   : > { %4129 = vperm.xlu0 %6533, %v4079_v49   ;;  %9006 = vst [vmem:[#allocation28_spill] sm:$0xff] %v7423_v4  ;;  %v4403_v49 = vld [vmem:[%s8831_s6 + $0x8] sm:$0xff] }
 0x144   : > { %4144 = vperm.xlu1 %6534, %v4082_v37   ;;  %v4402_v37 = vld [vmem:[%s8831_s6] sm:$0xff] }
 0x145   : > { %4139 = vperm.xlu0 %6533, %v4081_v61   ;;  %v7431_v61 = vpop.permute.xlu1 %2628 }
 0x146   : > { %9007 = vst [vmem:[#allocation29_spill] sm:$0xff] %v7431_v61 }
 0x148   : > { %4154 = vperm.xlu1 %6534, %v4084_v14   ;;  %v7433_v14 = vpop.permute.xlu0 %2623 }
 0x149   : > { %4149 = vperm.xlu0 %6533, %v4083_v7   ;;  %9008 = vst [vmem:[#allocation30_spill] sm:$0xff] %v7433_v14  ;;  %v4405_v7 = vld [vmem:[%s8831_s6 + $0x18] sm:$0xff]  ;;  %v7442_v31 = vpop.permute.xlu1 %2638  ;;  %v6335_v14 = vld [vmem:[%s6909_s30 + $0x210] sm:$0xff] }
 0x14a   : > { %9009 = vst [vmem:[#allocation31_spill] sm:$0xff] %v7442_v31  ;;  %v6340_v31 = vld [vmem:[%s6909_s30 + $0x238] sm:$0xff] }
 0x14c   : > { %4164 = vperm.xlu1 %6534, %v4086_v19   ;;  %v4404_v19 = vld [vmem:[%s8831_s6 + $0x10] sm:$0xff]  ;;  %v7445_v61 = vpop.permute.xlu0 %2633 }
 0x14d   : > { %4159 = vperm.xlu0 %6533, %v4085_v11   ;;  %v6334_v11 = vld [vmem:[%s6909_s30 + $0x208] sm:$0xff]  ;;  %9010 = vst [vmem:[#allocation32_spill] sm:$0xff] %v7445_v61  ;;  %v7449_v4 = vpop.permute.xlu1 %2758 }
 0x14e   : > { %9011 = vst [vmem:[#allocation33_spill] sm:$0xff] %v7449_v4  ;;  %v6341_v4 = vld [vmem:[%s6909_s30 + $0x240] sm:$0xff] }
 0x150   : > { %4413 = vperm.xlu1 %6534, %v4403_v49   ;;  %v6333_v49 = vld [vmem:[%s6909_s30 + $0x200] sm:$0xff]  ;;  %v7451_v30 = vpop.permute.xlu0 %2753 }
 0x151   : > { %4408 = vperm.xlu0 %6533, %v4402_v37   ;;  %v6336_v37 = vld [vmem:[%s6909_s30 + $0x218] sm:$0xff]  ;;  %9012 = vst [vmem:[#allocation34_spill] sm:$0xff] %v7451_v30 }
 0x154   : > { %4423 = vperm.xlu1 %6534, %v4405_v7   ;;  %v6338_v7 = vld [vmem:[%s6909_s30 + $0x228] sm:$0xff]  ;;  %v7459_v61 = vpop.permute.xlu0 %2763 }
 0x155   : > { %4418 = vperm.xlu0 %6533, %v4404_v19   ;;  %v6337_v19 = vld [vmem:[%s6909_s30 + $0x220] sm:$0xff]  ;;  %9014 = vst [vmem:[#allocation36_spill] sm:$0xff] %v7459_v61 }
 0x156   : > { %v6345_v61 = vld [vmem:[%s6909_s30 + $0x260] sm:$0xff] }
 0x158   : > { %4543 = vperm.xlu1 %6534, %v6334_v11   ;;  %v7456_v11 = vpop.permute.xlu1 %2768  ;;  %v7465_v30 = vpop.permute.xlu0 %2773 }
 0x159   : > { %4538 = vperm.xlu0 %6533, %v6333_v49   ;;  %9013 = vst [vmem:[#allocation35_spill] sm:$0xff] %v7456_v11  ;;  %v6339_v49 = vld [vmem:[%s6909_s30 + $0x230] sm:$0xff]  ;;  %9016 = vst [vmem:[#allocation38_spill] sm:$0xff] %v7465_v30  ;;  %v6346_v11 = vld [vmem:[%s6909_s30 + $0x268] sm:$0xff] }
 0x15c   : > { %4553 = vperm.xlu1 %6534, %v6336_v37   ;;  %v6342_v37 = vld [vmem:[%s6909_s30 + $0x248] sm:$0xff] }
 0x15d   : > { %4548 = vperm.xlu0 %6533, %v6335_v14   ;;  %v7463_v14 = vpop.permute.xlu1 %2778 }
 0x15e   : > { %9015 = vst [vmem:[#allocation37_spill] sm:$0xff] %v7463_v14  ;;  %v6466_v14 = vld [vmem:[%s6909_s30 + $0x2f0] sm:$0xff] }
 0x160   : > { %4563 = vperm.xlu1 %6534, %v6338_v7   ;;  %v6344_v7 = vld [vmem:[%s6909_s30 + $0x258] sm:$0xff] }
 0x161   : > { %4558 = vperm.xlu0 %6533, %v6337_v19   ;;  %v6343_v19 = vld [vmem:[%s6909_s30 + $0x250] sm:$0xff]  ;;  %v7470_v32 = vpop.permute.xlu1 %2788 }
 0x162   : > { %9017 = vst [vmem:[#allocation39_spill] sm:$0xff] %v7470_v32 }
 0x164   : > { %4573 = vperm.xlu1 %6534, %v6340_v31   ;;  %v7473_v31 = vpop.permute.xlu0 %2783 }
 0x165   : > { %4568 = vperm.xlu0 %6533, %v6339_v49   ;;  %9018 = vst [vmem:[#allocation40_spill] sm:$0xff] %v7473_v31  ;;  %v6348_v49 = vld [vmem:[%s6909_s30 + $0x278] sm:$0xff]  ;;  %v7477_v42 = vpop.permute.xlu1 %2798 }
 0x166   : > { %9019 = vst [vmem:[#allocation41_spill] sm:$0xff] %v7477_v42 }
 0x168   : > { %4583 = vperm.xlu1 %6534, %v6342_v37   ;;  %v7479_v37 = vpop.permute.xlu0 %2793 }
 0x169   : > { %4578 = vperm.xlu0 %6533, %v6341_v4   ;;  %9020 = vst [vmem:[#allocation42_spill] sm:$0xff] %v7479_v37  ;;  %v6394_v4 = vld [vmem:[%s8829_s4 + $0x88] sm:$0xff] }
 0x16c   : > { %4593 = vperm.xlu1 %6534, %v6344_v7   ;;  %v6393_v7 = vld [vmem:[%s8829_s4 + $0x80] sm:$0xff] }
 0x16d   : > { %4588 = vperm.xlu0 %6533, %v6343_v19   ;;  %v7495_v19 = vpop.permute.xlu0 %2803 }
 0x16e   : > { %9022 = vst [vmem:[#allocation44_spill] sm:$0xff] %v7495_v19  ;;  %v6400_v19 = vld [vmem:[%s8829_s4 + $0xb8] sm:$0xff] }
 0x170   : > { %4603 = vperm.xlu1 %6534, %v6346_v11   ;;  %v7490_v11 = vpop.permute.xlu1 %2808 }
 0x171   : > { %4598 = vperm.xlu0 %6533, %v6345_v61   ;;  %v6396_v61 = vld [vmem:[%s8829_s4 + $0x98] sm:$0xff]  ;;  %9021 = vst [vmem:[#allocation43_spill] sm:$0xff] %v7490_v11  ;;  %v7505_v11 = vpop.permute.xlu0 %2813 }
 0x172   : > { %9024 = vst [vmem:[#allocation46_spill] sm:$0xff] %v7505_v11 }
 0x174   : > { %4613 = vperm.xlu1 %6534, %v6348_v49   ;;  %v6398_v49 = vld [vmem:[%s8829_s4 + $0xa8] sm:$0xff] }
 0x175   : > { %4608 = vperm.xlu0 %6533, %v6347_v46   ;;  %v6395_v46 = vld [vmem:[%s8829_s4 + $0x90] sm:$0xff] }
 0x178   : > { %4987 = vperm.xlu1 %6534, %v6394_v4   ;;  %v6397_v4 = vld [vmem:[%s8829_s4 + $0xa0] sm:$0xff] }
 0x179   : > { %4982 = vperm.xlu0 %6533, %v6393_v7   ;;  %v7503_v7 = vpop.permute.xlu1 %2818 }
 0x17a   : > { %9023 = vst [vmem:[#allocation45_spill] sm:$0xff] %v7503_v7  ;;  %v6404_v7 = vld [vmem:[%s8829_s4 + $0xd8] sm:$0xff] }
 0x17c   : > { %4997 = vperm.xlu1 %6534, %v6396_v61   ;;  %v6399_v61 = vld [vmem:[%s8829_s4 + $0xb0] sm:$0xff] }
 0x17d   : > { %4992 = vperm.xlu0 %6533, %v6395_v46   ;;  %v6402_v46 = vld [vmem:[%s8829_s4 + $0xc8] sm:$0xff]  ;;  %v7516_v42 = vpop.permute.xlu1 %2828 }
 0x17e   : > { %9025 = vst [vmem:[#allocation47_spill] sm:$0xff] %v7516_v42 }
 0x180   : > { %5007 = vperm.xlu1 %6534, %v6398_v49   ;;  %v6401_v49 = vld [vmem:[%s8829_s4 + $0xc0] sm:$0xff] }
 0x181   : > { %5002 = vperm.xlu0 %6533, %v6397_v4   ;;  %v7521_v4 = vpop.permute.xlu0 %2823 }
 0x182   : > { %9026 = vst [vmem:[#allocation48_spill] sm:$0xff] %v7521_v4  ;;  %v6406_v4 = vld [vmem:[%s8829_s4 + $0xe8] sm:$0xff] }
 0x184   : > { %5017 = vperm.xlu1 %6534, %v6400_v19   ;;  %v6403_v19 = vld [vmem:[%s8829_s4 + $0xd0] sm:$0xff] }
 0x185   : > { %5012 = vperm.xlu0 %6533, %v6399_v61   ;;  %v7529_v61 = vpop.permute.xlu1 %3202  ;;  %v7531_v42 = vpop.permute.xlu0 %3197 }
 0x186   : > { %9027 = vst [vmem:[#allocation49_spill] sm:$0xff] %v7529_v61  ;;  %9028 = vst [vmem:[#allocation50_spill] sm:$0xff] %v7531_v42 }
 0x188   : > { %5027 = vperm.xlu1 %6534, %v6402_v46   ;;  %v6405_v46 = vld [vmem:[%s8829_s4 + $0xe0] sm:$0xff] }
 0x189   : > { %5022 = vperm.xlu0 %6533, %v6401_v49   ;;  %v6408_v49 = vld [vmem:[%s8829_s4 + $0xf8] sm:$0xff]  ;;  %v7542_v61 = vpop.permute.xlu1 %3212 }
 0x18a   : > { %9029 = vst [vmem:[#allocation51_spill] sm:$0xff] %v7542_v61 }
 0x18c   : > { %5037 = vperm.xlu1 %6534, %v6404_v7   ;;  %v6407_v7 = vld [vmem:[%s8829_s4 + $0xf0] sm:$0xff] }
 0x18d   : > { %5032 = vperm.xlu0 %6533, %v6403_v19   ;;  %v7547_v19 = vpop.permute.xlu0 %3207  ;;  %v7555_v61 = vpop.permute.xlu1 %3222 }
 0x18e   : > { %9030 = vst [vmem:[#allocation52_spill] sm:$0xff] %v7547_v19  ;;  %9031 = vst [vmem:[#allocation53_spill] sm:$0xff] %v7555_v61  ;;  %v6453_v19 = vld [vmem:[%s6909_s30 + $0x288] sm:$0xff] }
 0x190   : > { %5047 = vperm.xlu1 %6534, %v6406_v4   ;;  %v6431_v4 = vld [vmem:[%s8831_s6 + $0x28] sm:$0xff] }
 0x191   : > { %5042 = vperm.xlu0 %6533, %v6405_v46   ;;  %v6430_v46 = vld [vmem:[%s8831_s6 + $0x20] sm:$0xff]  ;;  %v7557_v42 = vpop.permute.xlu0 %3217  ;;  %v7566_v11 = vpop.permute.xlu1 %3232 }
 0x192   : > { %9032 = vst [vmem:[#allocation54_spill] sm:$0xff] %v7557_v42  ;;  %9033 = vst [vmem:[#allocation55_spill] sm:$0xff] %v7566_v11  ;;  %v6454_v42 = vld [vmem:[%s6909_s30 + $0x290] sm:$0xff]  ;;  %v6459_v11 = vld [vmem:[%s6909_s30 + $0x2b8] sm:$0xff] }
 0x194   : > { %5057 = vperm.xlu1 %6534, %v6408_v49   ;;  %v6433_v49 = vld [vmem:[%s8831_s6 + $0x38] sm:$0xff] }
 0x195   : > { %5052 = vperm.xlu0 %6533, %v6407_v7   ;;  %v6432_v7 = vld [vmem:[%s8831_s6 + $0x30] sm:$0xff]  ;;  %v7569_v61 = vpop.permute.xlu0 %3227  ;;  %v7573_v37 = vpop.permute.xlu1 %3242 }
 0x196   : > { %9034 = vst [vmem:[#allocation56_spill] sm:$0xff] %v7569_v61  ;;  %9035 = vst [vmem:[#allocation57_spill] sm:$0xff] %v7573_v37  ;;  %v6460_v37 = vld [vmem:[%s6909_s30 + $0x2c0] sm:$0xff] }
 0x198   : > { %5306 = vperm.xlu1 %6534, %v6431_v4   ;;  %v6452_v4 = vld [vmem:[%s6909_s30 + $0x280] sm:$0xff] }
 0x199   : > { %5301 = vperm.xlu0 %6533, %v6430_v46   ;;  %v6455_v46 = vld [vmem:[%s6909_s30 + $0x298] sm:$0xff]  ;;  %v7575_v32 = vpop.permute.xlu0 %3237 }
 0x19a   : > { %9036 = vst [vmem:[#allocation58_spill] sm:$0xff] %v7575_v32 }
 0x19c   : > { %5316 = vperm.xlu1 %6534, %v6433_v49   ;;  %v6457_v49 = vld [vmem:[%s6909_s30 + $0x2a8] sm:$0xff] }
 0x19d   : > { %5311 = vperm.xlu0 %6533, %v6432_v7   ;;  %v6456_v7 = vld [vmem:[%s6909_s30 + $0x2a0] sm:$0xff]  ;;  %v7583_v61 = vpop.permute.xlu0 %3247 }
 0x19e   : > { %9038 = vst [vmem:[#allocation60_spill] sm:$0xff] %v7583_v61  ;;  %v6464_v61 = vld [vmem:[%s6909_s30 + $0x2e0] sm:$0xff] }
 0x1a0   : > { %5436 = vperm.xlu1 %6534, %v6453_v19   ;;  %v7580_v19 = vpop.permute.xlu1 %3252 }
 0x1a1   : > { %5431 = vperm.xlu0 %6533, %v6452_v4   ;;  %9037 = vst [vmem:[#allocation59_spill] sm:$0xff] %v7580_v19  ;;  %v6458_v4 = vld [vmem:[%s6909_s30 + $0x2b0] sm:$0xff]  ;;  %v7589_v32 = vpop.permute.xlu0 %3257  ;;  %v6465_v19 = vld [vmem:[%s6909_s30 + $0x2e8] sm:$0xff] }
 0x1a2   : > { %9040 = vst [vmem:[#allocation62_spill] sm:$0xff] %v7589_v32 }
 0x1a4   : > { %5446 = vperm.xlu1 %6534, %v6455_v46   ;;  %v6461_v46 = vld [vmem:[%s6909_s30 + $0x2c8] sm:$0xff] }
 0x1a5   : > { %5441 = vperm.xlu0 %6533, %v6454_v42   ;;  %v7587_v42 = vpop.permute.xlu1 %3262 }
 0x1a6   : > { %9039 = vst [vmem:[#allocation61_spill] sm:$0xff] %v7587_v42 }
 0x1a8   : > { %5456 = vperm.xlu1 %6534, %v6457_v49   ;;  %v6463_v49 = vld [vmem:[%s6909_s30 + $0x2d8] sm:$0xff] }
 0x1a9   : > { %5451 = vperm.xlu0 %6533, %v6456_v7   ;;  %v6462_v7 = vld [vmem:[%s6909_s30 + $0x2d0] sm:$0xff]  ;;  %v7594_v31 = vpop.permute.xlu1 %3272 }
 0x1aa   : > { %9041 = vst [vmem:[#allocation63_spill] sm:$0xff] %v7594_v31  ;;  %v6118_v31 = vld [vmem:[%s8834_s9 + $0x30] sm:$0xff] }
 0x1ac   : > { %5466 = vperm.xlu1 %6534, %v6459_v11   ;;  %v7597_v11 = vpop.permute.xlu0 %3267 }
 0x1ad   : > { %5461 = vperm.xlu0 %6533, %v6458_v4   ;;  %9042 = vst [vmem:[#allocation64_spill] sm:$0xff] %v7597_v11  ;;  %v6467_v4 = vld [vmem:[%s6909_s30 + $0x2f8] sm:$0xff]  ;;  %v7601_v30 = vpop.permute.xlu1 %3521  ;;  %s7743_s30 = scalar_lea.vmem %s8826_s1, %s6504_s28 }
 0x1ae   : > { %9043 = vst [vmem:[#allocation65_spill] sm:$0xff] %v7601_v30  ;;  %v6116_v30 = vld [vmem:[%s8834_s9 + $0x20] sm:$0xff] }
 0x1b0   : > { %5476 = vperm.xlu1 %6534, %v6461_v46   ;;  %v7603_v46 = vpop.permute.xlu0 %3516 }
 0x1b1   : > { %5471 = vperm.xlu0 %6533, %v6460_v37   ;;  %9044 = vst [vmem:[#allocation66_spill] sm:$0xff] %v7603_v46  ;;  %v1271_v37 = vld [vmem:[%s8834_s9 + $0x8] sm:$0xff] }
 0x1b4   : > { %5486 = vperm.xlu1 %6534, %v6463_v49   ;;  %v1270_v49 = vld [vmem:[%s8834_s9] sm:$0xff] }
 0x1b5   : > { %5481 = vperm.xlu0 %6533, %v6462_v7   ;;  %v7619_v7 = vpop.permute.xlu0 %3526 }
 0x1b6   : > { %9046 = vst [vmem:[#allocation68_spill] sm:$0xff] %v7619_v7  ;;  %v6119_v7 = vld [vmem:[%s8834_s9 + $0x38] sm:$0xff] }
 0x1b8   : > { %5496 = vperm.xlu1 %6534, %v6465_v19   ;;  %v7614_v19 = vpop.permute.xlu1 %3531 }
 0x1b9   : > { %5491 = vperm.xlu0 %6533, %v6464_v61   ;;  %v1273_v61 = vld [vmem:[%s8834_s9 + $0x18] sm:$0xff]  ;;  %9045 = vst [vmem:[#allocation67_spill] sm:$0xff] %v7614_v19  ;;  %v7629_v19 = vpop.permute.xlu0 %3646 }
 0x1ba   : > { %9048 = vst [vmem:[#allocation70_spill] sm:$0xff] %v7629_v19 }
 0x1bc   : > { %5506 = vperm.xlu1 %6534, %v6467_v4   ;;  %v6117_v4 = vld [vmem:[%s8834_s9 + $0x28] sm:$0xff]  ;;  %v7627_v46 = vpop.permute.xlu1 %3651 }
 0x1bd   : > { %5501 = vperm.xlu0 %6533, %v6466_v14   ;;  %v1272_v14 = vld [vmem:[%s8834_s9 + $0x10] sm:$0xff]  ;;  %9047 = vst [vmem:[#allocation69_spill] sm:$0xff] %v7627_v46  ;;  %v7639_v42 = vpop.permute.xlu0 %3656 }
 0x1be   : > { %9050 = vst [vmem:[#allocation72_spill] sm:$0xff] %v7639_v42 }
 0x1c0   : > { %1281 = vperm.xlu1 %6534, %v1271_v37   ;;  %v7637_v11 = vpop.permute.xlu1 %3661 }
 0x1c1   : > { %1276 = vperm.xlu0 %6533, %v1270_v49   ;;  %9049 = vst [vmem:[#allocation71_spill] sm:$0xff] %v7637_v11  ;;  %v7643_v19 = vpop.permute.xlu0 %3666 }
 0x1c2   : > { %9052 = vst [vmem:[#allocation74_spill] sm:$0xff] %v7643_v19 }
 0x1c4   : > { %1291 = vperm.xlu1 %6534, %v1273_v61   ;;  %v7641_v46 = vpop.permute.xlu1 %3671 }
 0x1c5   : > { %1286 = vperm.xlu0 %6533, %v1272_v14   ;;  %9051 = vst [vmem:[#allocation73_spill] sm:$0xff] %v7641_v46  ;;  %v7647_v9 = vpop.permute.xlu0 %3676 }
 0x1c6   : > { %9054 = vst [vmem:[#allocation76_spill] sm:$0xff] %v7647_v9 }
 0x1c8   : > { %2179 = vperm.xlu1 %6534, %v6117_v4   ;;  %v7645_v32 = vpop.permute.xlu1 %3681 }
 0x1c9   : > { %2174 = vperm.xlu0 %6533, %v6116_v30   ;;  %9053 = vst [vmem:[#allocation75_spill] sm:$0xff] %v7645_v32  ;;  %v7651_v11 = vpop.permute.xlu0 %3686 }
 0x1ca   : > { %9056 = vst [vmem:[#allocation78_spill] sm:$0xff] %v7651_v11 }
 0x1cc   : > { %2189 = vperm.xlu1 %6534, %v6119_v7   ;;  %v7649_v41 = vpop.permute.xlu1 %3691 }
 0x1cd   : > { %2184 = vperm.xlu0 %6533, %v6118_v31   ;;  %9055 = vst [vmem:[#allocation77_spill] sm:$0xff] %v7649_v41  ;;  %v7655_v19 = vpop.permute.xlu0 %3696 }
 0x1ce   : > { %9058 = vst [vmem:[#allocation80_spill] sm:$0xff] %v7655_v19 }
 0x1d0   : > { %3071 = vperm.xlu1 %6534, %v1271_v37   ;;  %v7653_v46 = vpop.permute.xlu1 %3701 }
 0x1d1   : > { %3066 = vperm.xlu0 %6533, %v1270_v49   ;;  %9057 = vst [vmem:[#allocation79_spill] sm:$0xff] %v7653_v46  ;;  %v7659_v32 = vpop.permute.xlu0 %3706 }
 0x1d2   : > { %9060 = vst [vmem:[#allocation82_spill] sm:$0xff] %v7659_v32 }
 0x1d4   : > { %3081 = vperm.xlu1 %6534, %v1273_v61   ;;  %v7657_v42 = vpop.permute.xlu1 %3711 }
 0x1d5   : > { %3076 = vperm.xlu0 %6533, %v1272_v14   ;;  %9059 = vst [vmem:[#allocation81_spill] sm:$0xff] %v7657_v42 }
 0x1d8   : > { %3964 = vperm.xlu1 %6534, %v6117_v4  }
 0x1d9   : > { %3959 = vperm.xlu0 %6533, %v6116_v30  }
 0x1dc   : > { %3974 = vperm.xlu1 %6534, %v6119_v7  }
 0x1dd   : > { %3969 = vperm.xlu0 %6533, %v6118_v31  }
 0x1e0   : > { %4856 = vperm.xlu1 %6534, %v1271_v37  }
 0x1e1   : > { %4851 = vperm.xlu0 %6533, %v1270_v49  }
 0x1e4   : > { %4866 = vperm.xlu1 %6534, %v1273_v61  }
 0x1e5   : > { %4861 = vperm.xlu0 %6533, %v1272_v14  }
 0x1e8   : > { %5749 = vperm.xlu1 %6534, %v6117_v4  }
 0x1e9   : > { %5744 = vperm.xlu0 %6533, %v6116_v30  }
 0x1ec   : > { %5759 = vperm.xlu1 %6534, %v6119_v7  }
 0x1ed   : > { %5754 = vperm.xlu0 %6533, %v6118_v31  }
 0x209   : > { %v897_v9 = vpop.f32.mrb[0].mxu1 }
 0x20a   : > { %v898_v37 = vadd.f32 %v897_v9, %v7131_v3  ;;  %v899_v41 = vpop.f32.mrb[1].mxu1 }
 0x20b   : > { %v900_v49 = vadd.f32 %v899_v41, %v7131_v3  ;;  %v901_v61 = vpop.f32.mrb[2].mxu1 }
 0x20c   : > { %v902_v14 = vadd.f32 %v901_v61, %v7129_v1  ;;  %v903_v46 = vpop.f32.mrb[3].mxu1  ;;  %v916_v4 = vmax.f32 %v898_v37, 0.0 }
 0x20d   : > { %v904_v19 = vadd.f32 %v903_v46, %v7129_v1  ;;  %v917_v11 = vmax.f32 %v900_v49, 0.0 }
 0x20e   : > { %v918_v30 = vmax.f32 %v902_v14, 0.0  ;;  %v6552_v14 = vld [vmem:[%s8832_s7 + $0x38] sm:$0xff]  }
 0x20f   : > { %v919_v42 = vmax.f32 %v904_v19, 0.0 }
 0x210   : > { %v924_v7 = vpack.c.bf16 %v918_v30, %v916_v4 }
 0x211   : > { %v925_v34 = vpack.c.bf16 %v919_v42, %v917_v11  ;;  %v907_v32 = vpop.f32.mrb[4].mxu1  ;;  %v6551_v11 = vld [vmem:[%s8832_s7 + $0x30] sm:$0xff]  }
 0x212   : > { %v908_v31 = vadd.f32 %v907_v32, %v7137_v5  ;;  %v909_v24 = vpop.f32.mrb[5].mxu1  ;;  %v6545_v32 = vld [vmem:[%s8832_s7] sm:$0xff]  }
 0x213   : > { %v910_v9 = vadd.f32 %v909_v24, %v7137_v5  ;;  %v911_v51 = vpop.f32.mrb[6].mxu1  ;;  %1105 = vmatprep.subr.bf16.mxu1 %v925_v34  ;;  %v6547_v5 = vld [vmem:[%s8832_s7 + $0x10] sm:$0xff]   ;;  %v6549_v34 = vld [vmem:[%s8832_s7 + $0x20] sm:$0xff]   ;;  %v6550_v24 = vld [vmem:[%s8832_s7 + $0x28] sm:$0xff]  }
 0x214   : > { %v912_v3 = vadd.f32 %v911_v51, %v7135_v0  ;;  %v913_v41 = vpop.f32.mrb[7].mxu1  ;;  %1106 = vmatpush1.bf16.msra.mxu1 %v924_v7  ;;  %v920_v46 = vmax.f32 %v908_v31, 0.0  ;;  %v6548_v51 = vld [vmem:[%s8832_s7 + $0x18] sm:$0xff]  }
 0x215   : > { %v914_v1 = vadd.f32 %v913_v41, %v7135_v0  ;;  %v921_v49 = vmax.f32 %v910_v9, 0.0  ;;  %v6546_v0 = vld [vmem:[%s8832_s7 + $0x8] sm:$0xff]  }
 0x216   : > { %v922_v37 = vmax.f32 %v912_v3, 0.0 }
 0x217   : > { %v923_v19 = vmax.f32 %v914_v1, 0.0 }
 0x218   : > { %v926_v61 = vpack.c.bf16 %v922_v37, %v920_v46 }
 0x219   : > { %v927_v42 = vpack.c.bf16 %v923_v19, %v921_v49 }
 0x21b   : > { %1107 = vmatprep.subr.bf16.mxu1 %v927_v42 }
 0x21c   : > { %1108 = vmatpush1.bf16.msra.mxu1 %v926_v61 }
 0x21f   : > { %5995 = vmatmul.mubr.msk.bf16.vlgmr.msra.gmra.mrb[8].mxu1 %vm1080_vm2, %v6545_v32 }
 0x220   : > { %1147 = vmatprep.mubr.bf16.mxu1 %v8999_v10 }
 0x227   : > { %5996 = vmatmul.mubr.msk.bf16.gmra.mrb[12].mxu1 %vm1080_vm2, %v6546_v0 }
 0x228   : > { %1157 = vmatprep.mubr.bf16.mxu1 %v8999_v10 }
 0x22f   : > { %5997 = vmatmul.mubr.msk.bf16.gmra.mrb[16].mxu1 %vm1080_vm2, %v6547_v5 }
 0x230   : > { %1167 = vmatprep.mubr.bf16.mxu1 %v8999_v10 }
 0x237   : > { %5998 = vmatmul.mubr.msk.bf16.gmra.mrb[20].mxu1 %vm1080_vm2, %v6548_v51 }
 0x238   : > { %1177 = vmatprep.mubr.bf16.mxu1 %v8999_v10 }
 0x23f   : > { %5999 = vmatmul.mubr.msk.bf16.gmra.mrb[24].mxu1 %vm1080_vm2, %v6549_v34 }
 0x240   : > { %1187 = vmatprep.mubr.bf16.mxu1 %v8999_v10 }
 0x247   : > { %6000 = vmatmul.mubr.msk.bf16.gmra.mrb[28].mxu1 %vm1080_vm2, %v6550_v24 }
 0x248   : > { %1197 = vmatprep.mubr.bf16.mxu1 %v8999_v10 }
 0x24f   : > { %6001 = vmatmul.mubr.msk.bf16.gmra.mrb[32].mxu1 %vm1080_vm2, %v6551_v11 }
 0x250   : > { %1207 = vmatprep.mubr.bf16.mxu1 %v8999_v10 }
 0x257   : > { %6002 = vmatmul.mubr.msk.bf16.gmra.mrb[36].mxu1 %vm1080_vm2, %v6552_v14 }
 0x258   : > { %1790 = vmatprep.mubr.bf16.mxu1 %v8999_v10 }
 0x2f2   : > { %v1139_v4 = vpop.f32.mrb[8].mxu1 }
 0x2f3   : > { %v1140_v30 = vadd.f32 %v1139_v4, %v7143_v12  ;;  %v1141_v7 = vpop.f32.mrb[9].mxu1 }
 0x2f4   : > { %v1142_v31 = vadd.f32 %v1141_v7, %v7143_v12  ;;  %v1143_v9 = vpop.f32.mrb[10].mxu1 }
 0x2f5   : > { %v1144_v3 = vadd.f32 %v1143_v9, %v7141_v6  ;;  %v1145_v41 = vpop.f32.mrb[11].mxu1  ;;  %v1218_v46 = vmax.f32 %v1140_v30, 0.0 }
 0x2f6   : > { %v1146_v1 = vadd.f32 %v1145_v41, %v7141_v6  ;;  %v1219_v49 = vmax.f32 %v1142_v31, 0.0 }
 0x2f7   : > { %v1220_v37 = vmax.f32 %v1144_v3, 0.0 }
 0x2f8   : > { %v1221_v19 = vmax.f32 %v1146_v1, 0.0 }
 0x2f9   : > { %v1250_v61 = vpack.c.bf16 %v1220_v37, %v1218_v46 }
 0x2fa   : > { %v1251_v42 = vpack.c.bf16 %v1221_v19, %v1219_v49  ;;  %v1149_v32 = vpop.f32.mrb[12].mxu1 }
 0x2fb   : > { %v1150_v0 = vadd.f32 %v1149_v32, %v7149_v15  ;;  %v1151_v5 = vpop.f32.mrb[13].mxu1 }
 0x2fc   : > { %v1152_v51 = vadd.f32 %v1151_v5, %v7149_v15  ;;  %v1153_v34 = vpop.f32.mrb[14].mxu1  ;;  %1306 = vmatprep.subr.bf16.mxu0 %v1251_v42 }
 0x2fd   : > { %v1154_v12 = vadd.f32 %v1153_v34, %v7147_v13  ;;  %v1155_v24 = vpop.f32.mrb[15].mxu1  ;;  %1307 = vmatpush1.bf16.msra.mxu0 %v1250_v61  ;;  %v1222_v11 = vmax.f32 %v1150_v0, 0.0 }
 0x2fe   : > { %v1156_v6 = vadd.f32 %v1155_v24, %v7147_v13  ;;  %v1223_v4 = vmax.f32 %v1152_v51, 0.0 }
 0x2ff   : > { %v1224_v14 = vmax.f32 %v1154_v12, 0.0 }
 0x300   : > { %v1225_v30 = vmax.f32 %v1156_v6, 0.0 }
 0x301   : > { %v1252_v7 = vpack.c.bf16 %v1224_v14, %v1222_v11 }
 0x302   : > { %v1253_v31 = vpack.c.bf16 %v1225_v30, %v1223_v4  ;;  %v1159_v9 = vpop.f32.mrb[16].mxu1 }
 0x303   : > { %v1160_v3 = vadd.f32 %v1159_v9, %v7155_v17  ;;  %v1161_v41 = vpop.f32.mrb[17].mxu1 }
 0x304   : > { %v1162_v15 = vadd.f32 %v1161_v41, %v7155_v17  ;;  %v1163_v1 = vpop.f32.mrb[18].mxu1  ;;  %1308 = vmatprep.subr.bf16.mxu0 %v1253_v31 }
 0x305   : > { %v1164_v46 = vadd.f32 %v1163_v1, %v7153_v16  ;;  %v1165_v37 = vpop.f32.mrb[19].mxu1  ;;  %1309 = vmatpush1.bf16.msra.mxu0 %v1252_v7  ;;  %v1226_v49 = vmax.f32 %v1160_v3, 0.0 }
 0x306   : > { %v1166_v13 = vadd.f32 %v1165_v37, %v7153_v16  ;;  %v1227_v61 = vmax.f32 %v1162_v15, 0.0 }
 0x307   : > { %v1228_v19 = vmax.f32 %v1164_v46, 0.0 }
 0x308   : > { %v1229_v42 = vmax.f32 %v1166_v13, 0.0 }
 0x309   : > { %v1254_v32 = vpack.c.bf16 %v1228_v19, %v1226_v49 }
 0x30a   : > { %v1255_v0 = vpack.c.bf16 %v1229_v42, %v1227_v61  ;;  %v1169_v5 = vpop.f32.mrb[20].mxu1 }
 0x30b   : > { %v1170_v51 = vadd.f32 %v1169_v5, %v7161_v20  ;;  %v1171_v34 = vpop.f32.mrb[21].mxu1 }
 0x30c   : > { %v1172_v17 = vadd.f32 %v1171_v34, %v7161_v20  ;;  %v1173_v12 = vpop.f32.mrb[22].mxu1  ;;  %1310 = vmatprep.subr.bf16.mxu0 %v1255_v0 }
 0x30d   : > { %v1174_v24 = vadd.f32 %v1173_v12, %v7159_v18  ;;  %v1175_v6 = vpop.f32.mrb[23].mxu1  ;;  %1311 = vmatpush1.bf16.msra.mxu0 %v1254_v32  ;;  %v1230_v11 = vmax.f32 %v1170_v51, 0.0 }
 0x30e   : > { %v1176_v16 = vadd.f32 %v1175_v6, %v7159_v18  ;;  %v1231_v4 = vmax.f32 %v1172_v17, 0.0 }
 0x30f   : > { %v1232_v14 = vmax.f32 %v1174_v24, 0.0 }
 0x310   : > { %v1233_v30 = vmax.f32 %v1176_v16, 0.0 }
 0x311   : > { %v1256_v7 = vpack.c.bf16 %v1232_v14, %v1230_v11 }
 0x312   : > { %v1257_v31 = vpack.c.bf16 %v1233_v30, %v1231_v4  ;;  %v1179_v9 = vpop.f32.mrb[24].mxu1  ;;  %v9061_v30 = vld [vmem:[#allocation3_spill] sm:$0xff] }
 0x313   : > { %v1180_v3 = vadd.f32 %v1179_v9, %v7169_v35  ;;  %v1181_v41 = vpop.f32.mrb[25].mxu1 }
 0x314   : > { %v1182_v20 = vadd.f32 %v1181_v41, %v7169_v35  ;;  %v1183_v15 = vpop.f32.mrb[26].mxu1  ;;  %1312 = vmatprep.subr.bf16.mxu0 %v1257_v31 }
 0x315   : > { %v1184_v1 = vadd.f32 %v1183_v15, %v7167_v23  ;;  %v1185_v46 = vpop.f32.mrb[27].mxu1  ;;  %1313 = vmatpush1.bf16.msra.mxu0 %v1256_v7  ;;  %v1234_v37 = vmax.f32 %v1180_v3, 0.0  ;;  %v9062_v3 = vld [vmem:[#allocation2_spill] sm:$0xff] }
 0x316   : > { %v1186_v18 = vadd.f32 %v1185_v46, %v7167_v23  ;;  %v1235_v49 = vmax.f32 %v1182_v20, 0.0 }
 0x317   : > { %v1236_v13 = vmax.f32 %v1184_v1, 0.0 }
 0x318   : > { %v1237_v19 = vmax.f32 %v1186_v18, 0.0 }
 0x319   : > { %v1258_v61 = vpack.c.bf16 %v1236_v13, %v1234_v37 }
 0x31a   : > { %v1259_v42 = vpack.c.bf16 %v1237_v19, %v1235_v49  ;;  %v1189_v32 = vpop.f32.mrb[28].mxu1  ;;  %v9063_v19 = vld [vmem:[#allocation5_spill] sm:$0xff] }
 0x31b   : > { %v1190_v0 = vadd.f32 %v1189_v32, %v7175_v39  ;;  %v1191_v5 = vpop.f32.mrb[29].mxu1 }
 0x31c   : > { %v1192_v35 = vadd.f32 %v1191_v5, %v7175_v39  ;;  %v1193_v51 = vpop.f32.mrb[30].mxu1  ;;  %1314 = vmatprep.subr.bf16.mxu0 %v1259_v42  ;;  %v7746_v5 = vpop.permute.xlu0 %3716 }
 0x31d   : > { %v1194_v34 = vadd.f32 %v1193_v51, %v7173_v36  ;;  %v1195_v17 = vpop.f32.mrb[31].mxu1  ;;  %1315 = vmatpush1.bf16.msra.mxu0 %v1258_v61  ;;  %v1238_v12 = vmax.f32 %v1190_v0, 0.0 }
 0x31e   : > { %v1196_v23 = vadd.f32 %v1195_v17, %v7173_v36  ;;  %v1239_v6 = vmax.f32 %v1192_v35, 0.0  ;;  %v9064_v35 = vld [vmem:[#allocation4_spill] sm:$0xff] }
 0x31f   : > { %v1240_v24 = vmax.f32 %v1194_v34, 0.0 }
 0x320   : > { %v1241_v16 = vmax.f32 %v1196_v23, 0.0  ;;  %v7750_v23 = vpop.permute.xlu1 %3721 }
 0x321   : > { %v1260_v11 = vpack.c.bf16 %v1240_v24, %v1238_v12 }
 0x322   : > { %v1261_v14 = vpack.c.bf16 %v1241_v16, %v1239_v6  ;;  %v1199_v4 = vpop.f32.mrb[32].mxu1  ;;  %v1368_v6 = vld [vmem:[%s7743_s30 + $0x8] sm:$0xff]  ;;  %v1367_v16 = vld [vmem:[%s7743_s30] sm:$0xff] }
 0x323   : > { %v1200_v7 = vadd.f32 %v1199_v4, %v9061_v30  ;;  %v1201_v31 = vpop.f32.mrb[33].mxu1 }
 0x324   : > { %v1202_v39 = vadd.f32 %v1201_v31, %v9061_v30  ;;  %v1203_v9 = vpop.f32.mrb[34].mxu1  ;;  %1316 = vmatprep.subr.bf16.mxu0 %v1261_v14  ;;  %v1369_v31 = vpack.c.bf16 %v1367_v16, %v1367_v16 }
 0x325   : > { %v1204_v41 = vadd.f32 %v1203_v9, %v9062_v3  ;;  %v1205_v20 = vpop.f32.mrb[35].mxu1  ;;  %1317 = vmatpush1.bf16.msra.mxu0 %v1260_v11  ;;  %v1242_v15 = vmax.f32 %v1200_v7, 0.0  ;;  %v1370_v7 = vpack.c.bf16 %v1368_v6, %v1368_v6  ;;  %v6553_v9 = vld [vmem:[%s8833_s8] sm:$0xff]  }
 0x326   : > { %v1206_v36 = vadd.f32 %v1205_v20, %v9062_v3  ;;  %v1243_v46 = vmax.f32 %v1202_v39, 0.0  ;;  %v7754_v39 = vpop.permute.xlu0 %4089  ;;  %v7759_v3 = vpop.permute.xlu1 %4094  ;;  %v6559_v6 = vld [vmem:[%s8828_s3 + $0x60] sm:$0xff]  }
 0x327   : > { %v1244_v1 = vmax.f32 %v1204_v41, 0.0  ;;  %v1550_v41 = vsel %vm655_vm0, %v1369_v31, 0  ;;  %v6561_v31 = vld [vmem:[%s8828_s3 + $0x70] sm:$0xff]  }
 0x328   : > { %v1245_v18 = vmax.f32 %v1206_v36, 0.0 }
 0x329   : > { %v1262_v37 = vpack.c.bf16 %v1244_v1, %v1242_v15  ;;  %v6554_v15 = vld [vmem:[%s8833_s8 + $0x8] sm:$0xff]  }
 0x32a   : > { %v1263_v13 = vpack.c.bf16 %v1245_v18, %v1243_v46  ;;  %v1209_v49 = vpop.f32.mrb[36].mxu1  ;;  %v7763_v20 = vpop.permute.xlu0 %4099  ;;  %v6555_v18 = vld [vmem:[%s8828_s3 + $0x40] sm:$0xff]  }
 0x32b   : > { %v1210_v61 = vadd.f32 %v1209_v49, %v9063_v19  ;;  %v1211_v42 = vpop.f32.mrb[37].mxu1  ;;  %v7766_v36 = vpop.permute.xlu1 %4104 }
 0x32c   : > { %v1212_v32 = vadd.f32 %v1211_v42, %v9063_v19  ;;  %v1213_v0 = vpop.f32.mrb[38].mxu1  ;;  %1318 = vmatprep.subr.bf16.mxu0 %v1263_v13  ;;  %v6556_v19 = vld [vmem:[%s8828_s3 + $0x48] sm:$0xff]  }
 0x32d   : > { %v1214_v51 = vadd.f32 %v1213_v0, %v9064_v35  ;;  %v1215_v34 = vpop.f32.mrb[39].mxu1  ;;  %1319 = vmatpush1.bf16.msra.mxu0 %v1262_v37  ;;  %v1246_v12 = vmax.f32 %v1210_v61, 0.0  ;;  %v6557_v0 = vld [vmem:[%s8828_s3 + $0x50] sm:$0xff]  }
 0x32e   : > { %v1216_v17 = vadd.f32 %v1215_v34, %v9064_v35  ;;  %v1247_v11 = vmax.f32 %v1212_v32, 0.0  ;;  %v7771_v1 = vpop.permute.xlu0 %4109  ;;  %v6558_v34 = vld [vmem:[%s8828_s3 + $0x58] sm:$0xff]  }
 0x32f   : > { %v1248_v24 = vmax.f32 %v1214_v51, 0.0  ;;  %v7773_v46 = vpop.permute.xlu1 %4114 }
 0x330   : > { %v1249_v14 = vmax.f32 %v1216_v17, 0.0 }
 0x331   : > { %v1264_v4 = vpack.c.bf16 %v1248_v24, %v1246_v12 }
 0x332   : > { %v1265_v30 = vpack.c.bf16 %v1249_v14, %v1247_v11  ;;  %v7779_v37 = vpop.permute.xlu0 %4119 }
 0x333   : > { %v7781_v13 = vpop.permute.xlu1 %4124 }
 0x334   : > { %1320 = vmatprep.subr.bf16.mxu0 %v1265_v30 }
 0x335   : > { %1321 = vmatpush1.bf16.msra.mxu0 %v1264_v4  ;;  %v6560_v4 = vld [vmem:[%s8828_s3 + $0x68] sm:$0xff]  }
 0x336   : > { %6045 = vmatprep.subr.msk.bf16.mxu0 %vm655_vm0, %v1370_v7  ;;  %v7785_v49 = vpop.permute.xlu0 %4129 }
 0x337   : > { %v7790_v61 = vpop.permute.xlu1 %4134 }
 0x338   : > { %1339 = vmatmul.mubr.bf16.vlgmr.msra.gmra.mrb[32].mxu0 %v6553_v9 }
 0x339   : > { %1556 = vmatpush1.bf16.msra.mxu0 %v1550_v41  ;;  %1348 = vmatprep.mubr.bf16.mxu0 %v8999_v10 }
 0x33a   : > { %v7793_v42 = vpop.permute.xlu0 %4139 }
 0x33b   : > { %v7796_v32 = vpop.permute.xlu1 %4144 }
 0x33e   : > { %v7801_v35 = vpop.permute.xlu0 %4149 }
 0x33f   : > { %9065 = vst [vmem:[#allocation3_spill] sm:$0xff] %v7801_v35  ;;  %v7804_v51 = vpop.permute.xlu1 %4154 }
 0x340   : > { %1349 = vmatmul.mubr.bf16.gmra.mrb[36].mxu0 %v6554_v15  ;;  %9066 = vst [vmem:[#allocation2_spill] sm:$0xff] %v7804_v51 }
 0x341   : > { %1587 = vmatprep.mubr.bf16.mxu0 %v8999_v10 }
 0x342   : > { %v7810_v17 = vpop.permute.xlu0 %4159 }
 0x343   : > { %9067 = vst [vmem:[#allocation5_spill] sm:$0xff] %v7810_v17  ;;  %v7812_v12 = vpop.permute.xlu1 %4164 }
 0x344   : > { %9068 = vst [vmem:[#allocation4_spill] sm:$0xff] %v7812_v12  ;;  %v9126_v12 = vld [vmem:[#allocation6_spill] sm:$0xff] }
 0x346   : > { %v7816_v24 = vpop.permute.xlu0 %4408 }
 0x347   : > { %9069 = vst [vmem:[#allocation83_spill] sm:$0xff] %v7816_v24  ;;  %v7821_v16 = vpop.permute.xlu1 %4413 }
 0x348   : > { %6046 = vmatmul.mubr.msk.bf16.vlgmr.msra.gmra.mrb[40].mxu0 %vm630_vm1, %v6555_v18  ;;  %9070 = vst [vmem:[#allocation84_spill] sm:$0xff] %v7821_v16  ;;  %v6562_v18 = vld [vmem:[%s8828_s3 + $0x78] sm:$0xff]  }
 0x349   : > { %1597 = vmatprep.mubr.bf16.mxu0 %v8999_v10 }
 0x34a   : > { %v7824_v11 = vpop.permute.xlu0 %4418 }
 0x34b   : > { %9071 = vst [vmem:[#allocation85_spill] sm:$0xff] %v7824_v11  ;;  %v7827_v14 = vpop.permute.xlu1 %4423 }
 0x34c   : > { %9072 = vst [vmem:[#allocation86_spill] sm:$0xff] %v7827_v14 }
 0x34e   : > { %v7832_v30 = vpop.permute.xlu0 %4538 }
 0x34f   : > { %9073 = vst [vmem:[#allocation87_spill] sm:$0xff] %v7832_v30  ;;  %v7835_v7 = vpop.permute.xlu1 %4543 }
 0x350   : > { %6047 = vmatmul.mubr.msk.bf16.gmra.mrb[44].mxu0 %vm630_vm1, %v6556_v19  ;;  %9074 = vst [vmem:[#allocation88_spill] sm:$0xff] %v7835_v7 }
 0x351   : > { %1607 = vmatprep.mubr.bf16.mxu0 %v8999_v10 }
 0x352   : > { %v7841_v9 = vpop.permute.xlu0 %4548 }
 0x353   : > { %9075 = vst [vmem:[#allocation89_spill] sm:$0xff] %v7841_v9  ;;  %v7843_v41 = vpop.permute.xlu1 %4553 }
 0x354   : > { %9076 = vst [vmem:[#allocation90_spill] sm:$0xff] %v7843_v41 }
 0x356   : > { %v7847_v15 = vpop.permute.xlu0 %4558 }
 0x357   : > { %9077 = vst [vmem:[#allocation91_spill] sm:$0xff] %v7847_v15  ;;  %v7852_v19 = vpop.permute.xlu1 %4563 }
 0x358   : > { %6048 = vmatmul.mubr.msk.bf16.gmra.mrb[48].mxu0 %vm630_vm1, %v6557_v0  ;;  %9078 = vst [vmem:[#allocation92_spill] sm:$0xff] %v7852_v19 }
 0x359   : > { %1617 = vmatprep.mubr.bf16.mxu0 %v8999_v10 }
 0x35a   : > { %v7855_v0 = vpop.permute.xlu0 %4568 }
 0x35b   : > { %9079 = vst [vmem:[#allocation93_spill] sm:$0xff] %v7855_v0 }
 0x360   : > { %6049 = vmatmul.mubr.msk.bf16.gmra.mrb[52].mxu0 %vm630_vm1, %v6558_v34  ;;  %v7858_v34 = vpop.permute.xlu1 %4573 }
 0x361   : > { %1627 = vmatprep.mubr.bf16.mxu0 %v8999_v10  ;;  %9080 = vst [vmem:[#allocation94_spill] sm:$0xff] %v7858_v34 }
 0x368   : > { %6050 = vmatmul.mubr.msk.bf16.gmra.mrb[56].mxu0 %vm630_vm1, %v6559_v6  ;;  %v7860_v6 = vpop.permute.xlu0 %4578 }
 0x369   : > { %1637 = vmatprep.mubr.bf16.mxu0 %v8999_v10  ;;  %9081 = vst [vmem:[#allocation95_spill] sm:$0xff] %v7860_v6 }
 0x370   : > { %6051 = vmatmul.mubr.msk.bf16.gmra.mrb[60].mxu0 %vm630_vm1, %v6560_v4  ;;  %v7862_v4 = vpop.permute.xlu1 %4583 }
 0x371   : > { %1647 = vmatprep.mubr.bf16.mxu0 %v8999_v10  ;;  %9082 = vst [vmem:[#allocation96_spill] sm:$0xff] %v7862_v4 }
 0x374   : > { %v7866_v15 = vpop.permute.xlu1 %4593 }
 0x375   : > { %9084 = vst [vmem:[#allocation98_spill] sm:$0xff] %v7866_v15 }
 0x378   : > { %6052 = vmatmul.mubr.msk.bf16.gmra.mrb[64].mxu0 %vm630_vm1, %v6561_v31  ;;  %v7864_v31 = vpop.permute.xlu0 %4588  ;;  %v7870_v9 = vpop.permute.xlu1 %4603 }
 0x379   : > { %1657 = vmatprep.mubr.bf16.mxu0 %v8999_v10  ;;  %9083 = vst [vmem:[#allocation97_spill] sm:$0xff] %v7864_v31  ;;  %9086 = vst [vmem:[#allocation100_spill] sm:$0xff] %v7870_v9 }
 0x37c   : > { %v7868_v41 = vpop.permute.xlu0 %4598 }
 0x37d   : > { %9085 = vst [vmem:[#allocation99_spill] sm:$0xff] %v7868_v41 }
 0x380   : > { %6053 = vmatmul.mubr.msk.bf16.gmra.mrb[68].mxu0 %vm630_vm1, %v6562_v18  ;;  %v7872_v19 = vpop.permute.xlu0 %4608  ;;  %v7874_v18 = vpop.permute.xlu1 %4613 }
 0x381   : > { %2236 = vmatprep.mubr.bf16.mxu0 %v8999_v10  ;;  %9087 = vst [vmem:[#allocation101_spill] sm:$0xff] %v7872_v19  ;;  %9088 = vst [vmem:[#allocation102_spill] sm:$0xff] %v7874_v18 }
 0x384   : > { %v7876_v0 = vpop.permute.xlu0 %4982  ;;  %v7878_v7 = vpop.permute.xlu1 %4987 }
 0x385   : > { %9089 = vst [vmem:[#allocation103_spill] sm:$0xff] %v7876_v0  ;;  %9090 = vst [vmem:[#allocation104_spill] sm:$0xff] %v7878_v7 }
 0x388   : > { %v7880_v34 = vpop.permute.xlu0 %4992  ;;  %v7882_v6 = vpop.permute.xlu1 %4997 }
 0x389   : > { %9091 = vst [vmem:[#allocation105_spill] sm:$0xff] %v7880_v34  ;;  %9092 = vst [vmem:[#allocation106_spill] sm:$0xff] %v7882_v6 }
 0x38c   : > { %v7884_v4 = vpop.permute.xlu0 %5002  ;;  %v7886_v31 = vpop.permute.xlu1 %5007 }
 0x38d   : > { %9093 = vst [vmem:[#allocation107_spill] sm:$0xff] %v7884_v4  ;;  %9094 = vst [vmem:[#allocation108_spill] sm:$0xff] %v7886_v31 }
 0x390   : > { %v7888_v15 = vpop.permute.xlu0 %5012  ;;  %v7890_v41 = vpop.permute.xlu1 %5017 }
 0x391   : > { %9095 = vst [vmem:[#allocation109_spill] sm:$0xff] %v7888_v15  ;;  %9096 = vst [vmem:[#allocation110_spill] sm:$0xff] %v7890_v41 }
 0x394   : > { %v7892_v9 = vpop.permute.xlu0 %5022  ;;  %v7894_v19 = vpop.permute.xlu1 %5027 }
 0x395   : > { %9097 = vst [vmem:[#allocation111_spill] sm:$0xff] %v7892_v9  ;;  %9098 = vst [vmem:[#allocation112_spill] sm:$0xff] %v7894_v19 }
 0x398   : > { %v7896_v18 = vpop.permute.xlu0 %5032  ;;  %v7898_v0 = vpop.permute.xlu1 %5037 }
 0x399   : > { %9099 = vst [vmem:[#allocation113_spill] sm:$0xff] %v7896_v18  ;;  %9100 = vst [vmem:[#allocation114_spill] sm:$0xff] %v7898_v0 }
 0x39c   : > { %v7900_v7 = vpop.permute.xlu0 %5042  ;;  %v7902_v34 = vpop.permute.xlu1 %5047 }
 0x39d   : > { %9101 = vst [vmem:[#allocation115_spill] sm:$0xff] %v7900_v7  ;;  %9102 = vst [vmem:[#allocation116_spill] sm:$0xff] %v7902_v34 }
 0x3a0   : > { %v7904_v6 = vpop.permute.xlu0 %5052  ;;  %v7906_v4 = vpop.permute.xlu1 %5057 }
 0x3a1   : > { %9103 = vst [vmem:[#allocation117_spill] sm:$0xff] %v7904_v6  ;;  %9104 = vst [vmem:[#allocation118_spill] sm:$0xff] %v7906_v4 }
 0x3a4   : > { %v7908_v31 = vpop.permute.xlu0 %5301  ;;  %v7910_v15 = vpop.permute.xlu1 %5306 }
 0x3a5   : > { %9105 = vst [vmem:[#allocation119_spill] sm:$0xff] %v7908_v31  ;;  %9106 = vst [vmem:[#allocation120_spill] sm:$0xff] %v7910_v15 }
 0x3a8   : > { %v7912_v41 = vpop.permute.xlu0 %5311  ;;  %v7914_v9 = vpop.permute.xlu1 %5316 }
 0x3a9   : > { %9107 = vst [vmem:[#allocation121_spill] sm:$0xff] %v7912_v41  ;;  %9108 = vst [vmem:[#allocation122_spill] sm:$0xff] %v7914_v9 }
 0x3ac   : > { %v7916_v19 = vpop.permute.xlu0 %5431  ;;  %v7918_v0 = vpop.permute.xlu1 %5436 }
 0x3ad   : > { %9109 = vst [vmem:[#allocation123_spill] sm:$0xff] %v7916_v19  ;;  %9110 = vst [vmem:[#allocation124_spill] sm:$0xff] %v7918_v0 }
 0x3b0   : > { %v7920_v7 = vpop.permute.xlu0 %5441  ;;  %v7922_v34 = vpop.permute.xlu1 %5446 }
 0x3b1   : > { %9111 = vst [vmem:[#allocation125_spill] sm:$0xff] %v7920_v7  ;;  %9112 = vst [vmem:[#allocation126_spill] sm:$0xff] %v7922_v34 }
 0x3b4   : > { %v7924_v6 = vpop.permute.xlu0 %5451  ;;  %v7926_v4 = vpop.permute.xlu1 %5456 }
 0x3b5   : > { %9113 = vst [vmem:[#allocation127_spill] sm:$0xff] %v7924_v6  ;;  %9114 = vst [vmem:[#allocation128_spill] sm:$0xff] %v7926_v4 }
 0x3b8   : > { %v7928_v31 = vpop.permute.xlu0 %5461  ;;  %v7930_v15 = vpop.permute.xlu1 %5466 }
 0x3b9   : > { %9115 = vst [vmem:[#allocation129_spill] sm:$0xff] %v7928_v31  ;;  %9116 = vst [vmem:[#allocation130_spill] sm:$0xff] %v7930_v15 }
 0x3bc   : > { %v7932_v41 = vpop.permute.xlu0 %5471  ;;  %v7934_v9 = vpop.permute.xlu1 %5476 }
 0x3bd   : > { %9117 = vst [vmem:[#allocation131_spill] sm:$0xff] %v7932_v41  ;;  %9118 = vst [vmem:[#allocation132_spill] sm:$0xff] %v7934_v9 }
 0x3c0   : > { %v7936_v19 = vpop.permute.xlu0 %5481  ;;  %v7938_v18 = vpop.permute.xlu1 %5486 }
 0x3c1   : > { %9119 = vst [vmem:[#allocation133_spill] sm:$0xff] %v7936_v19  ;;  %9120 = vst [vmem:[#allocation134_spill] sm:$0xff] %v7938_v18 }
 0x3c4   : > { %v7940_v0 = vpop.permute.xlu0 %5491  ;;  %v7942_v7 = vpop.permute.xlu1 %5496 }
 0x3c5   : > { %9121 = vst [vmem:[#allocation135_spill] sm:$0xff] %v7940_v0  ;;  %9122 = vst [vmem:[#allocation136_spill] sm:$0xff] %v7942_v7 }
 0x3c8   : > { %v7944_v34 = vpop.permute.xlu0 %5501  ;;  %v7946_v6 = vpop.permute.xlu1 %5506 }
 0x3c9   : > { %9123 = vst [vmem:[#allocation137_spill] sm:$0xff] %v7944_v34  ;;  %9124 = vst [vmem:[#allocation138_spill] sm:$0xff] %v7946_v6 }
 0x3cc   : > { %v1277_v19 = vpop.permute.xlu0 %1276  ;;  %v1282_v41 = vpop.permute.xlu1 %1281 }
 0x3d0   : > { %v1287_v4 = vpop.permute.xlu0 %1286 }
 0x40b   : > { %v1340_v18 = vpop.f32.mrb[32].mxu0 }
 0x40c   : > { %v1341_v9 = vadd.f32 %v1340_v18, %v1277_v19  ;;  %v1342_v0 = vpop.f32.mrb[33].mxu0  ;;  %v1292_v18 = vpop.permute.xlu1 %1291 }
 0x40d   : > { %v1343_v7 = vadd.f32 %v1342_v0, %v1277_v19  ;;  %v1344_v34 = vpop.f32.mrb[34].mxu0 }
 0x40e   : > { %1359 = vst [vmem:[%s7952_s18] sm:$0xff] %v1341_v9  ;;  %v1345_v6 = vadd.f32 %v1344_v34, %v1282_v41  ;;  %v1346_v15 = vpop.f32.mrb[35].mxu0  ;;  %v9125_v34 = vld [vmem:[#allocation7_spill] sm:$0xff] }
 0x40f   : > { %1360 = vst [vmem:[%s7952_s18 + $0x8] sm:$0xff] %v1343_v7  ;;  %v1347_v31 = vadd.f32 %v1346_v15, %v1282_v41 }
 0x410   : > { %1361 = vst [vmem:[%s7952_s18 + $0x10] sm:$0xff] %v1345_v6 }
 0x411   : > { %1362 = vst [vmem:[%s7952_s18 + $0x18] sm:$0xff] %v1347_v31 }
 0x413   : > { %v1350_v30 = vpop.f32.mrb[36].mxu0 }
 0x414   : > { %v1351_v14 = vadd.f32 %v1350_v30, %v1287_v4  ;;  %v1352_v11 = vpop.f32.mrb[37].mxu0 }
 0x415   : > { %v1353_v16 = vadd.f32 %v1352_v11, %v1287_v4  ;;  %v1354_v24 = vpop.f32.mrb[38].mxu0 }
 0x416   : > { %1363 = vst [vmem:[%s7952_s18 + $0x20] sm:$0xff] %v1351_v14  ;;  %v1355_v19 = vadd.f32 %v1354_v24, %v1292_v18  ;;  %v1356_v0 = vpop.f32.mrb[39].mxu0 }
 0x417   : > { %1364 = vst [vmem:[%s7952_s18 + $0x28] sm:$0xff] %v1353_v16  ;;  %v1357_v9 = vadd.f32 %v1356_v0, %v1292_v18 }
 0x418   : > { %1365 = vst [vmem:[%s7952_s18 + $0x30] sm:$0xff] %v1355_v19 }
 0x419   : > { %1366 = vst [vmem:[%s7952_s18 + $0x38] sm:$0xff] %v1357_v9 }
 0x41b   : > { %v1589_v7 = vpop.f32.mrb[40].mxu0 }
 0x41c   : > { %v1590_v41 = vadd.f32 %v1589_v7, %v9125_v34  ;;  %v1591_v15 = vpop.f32.mrb[41].mxu0 }
 0x41d   : > { %v1592_v6 = vadd.f32 %v1591_v15, %v9125_v34  ;;  %v1593_v31 = vpop.f32.mrb[42].mxu0  ;;  %v9127_v34 = vld [vmem:[#allocation8_spill] sm:$0xff] }
 0x41e   : > { %v1594_v30 = vadd.f32 %v1593_v31, %v9126_v12  ;;  %v1595_v17 = vpop.f32.mrb[43].mxu0  ;;  %v1668_v4 = vmax.f32 %v1590_v41, 0.0 }
 0x41f   : > { %v1596_v11 = vadd.f32 %v1595_v17, %v9126_v12  ;;  %v1669_v24 = vmax.f32 %v1592_v6, 0.0 }
 0x420   : > { %v1670_v14 = vmax.f32 %v1594_v30, 0.0 }
 0x421   : > { %v1671_v51 = vmax.f32 %v1596_v11, 0.0 }
 0x422   : > { %v1700_v16 = vpack.c.bf16 %v1670_v14, %v1668_v4 }
 0x423   : > { %v1701_v18 = vpack.c.bf16 %v1671_v51, %v1669_v24  ;;  %v1599_v19 = vpop.f32.mrb[44].mxu0 }
 0x424   : > { %v1600_v0 = vadd.f32 %v1599_v19, %v7199_v48  ;;  %v1601_v9 = vpop.f32.mrb[45].mxu0 }
 0x425   : > { %v1602_v7 = vadd.f32 %v1601_v9, %v7199_v48  ;;  %v1603_v35 = vpop.f32.mrb[46].mxu0  ;;  %1758 = vmatprep.subr.bf16.mxu1 %v1701_v18 }
 0x426   : > { %v1604_v15 = vadd.f32 %v1603_v35, %v9127_v34  ;;  %v1605_v31 = vpop.f32.mrb[47].mxu0  ;;  %1759 = vmatpush1.bf16.msra.mxu1 %v1700_v16  ;;  %v1672_v12 = vmax.f32 %v1600_v0, 0.0 }
 0x427   : > { %v1606_v17 = vadd.f32 %v1605_v31, %v9127_v34  ;;  %v1673_v6 = vmax.f32 %v1602_v7, 0.0 }
 0x428   : > { %v1674_v41 = vmax.f32 %v1604_v15, 0.0 }
 0x429   : > { %v1675_v30 = vmax.f32 %v1606_v17, 0.0 }
 0x42a   : > { %v1702_v11 = vpack.c.bf16 %v1674_v41, %v1672_v12 }
 0x42b   : > { %v1703_v51 = vpack.c.bf16 %v1675_v30, %v1673_v6  ;;  %v1609_v4 = vpop.f32.mrb[48].mxu0  ;;  %v9128_v30 = vld [vmem:[#allocation9_spill] sm:$0xff] }
 0x42c   : > { %v1610_v14 = vadd.f32 %v1609_v4, %v7205_v43  ;;  %v1611_v24 = vpop.f32.mrb[49].mxu0 }
 0x42d   : > { %v1612_v48 = vadd.f32 %v1611_v24, %v7205_v43  ;;  %v1613_v19 = vpop.f32.mrb[50].mxu0  ;;  %1760 = vmatprep.subr.bf16.mxu1 %v1703_v51 }
 0x42e   : > { %v1614_v35 = vadd.f32 %v1613_v19, %v7203_v21  ;;  %v1615_v18 = vpop.f32.mrb[51].mxu0  ;;  %1761 = vmatpush1.bf16.msra.mxu1 %v1702_v11  ;;  %v1676_v0 = vmax.f32 %v1610_v14, 0.0 }
 0x42f   : > { %v1616_v16 = vadd.f32 %v1615_v18, %v7203_v21  ;;  %v1677_v7 = vmax.f32 %v1612_v48, 0.0 }
 0x430   : > { %v1678_v9 = vmax.f32 %v1614_v35, 0.0 }
 0x431   : > { %v1679_v34 = vmax.f32 %v1616_v16, 0.0  ;;  %v9129_v16 = vld [vmem:[#allocation11_spill] sm:$0xff] }
 0x432   : > { %v1704_v15 = vpack.c.bf16 %v1678_v9, %v1676_v0 }
 0x433   : > { %v1705_v31 = vpack.c.bf16 %v1679_v34, %v1677_v7  ;;  %v1619_v17 = vpop.f32.mrb[52].mxu0  ;;  %v9130_v34 = vld [vmem:[#allocation10_spill] sm:$0xff] }
 0x434   : > { %v1620_v12 = vadd.f32 %v1619_v17, %v7211_v25  ;;  %v1621_v41 = vpop.f32.mrb[53].mxu0 }
 0x435   : > { %v1622_v43 = vadd.f32 %v1621_v41, %v7211_v25  ;;  %v1623_v6 = vpop.f32.mrb[54].mxu0  ;;  %1762 = vmatprep.subr.bf16.mxu1 %v1705_v31 }
 0x436   : > { %v1624_v51 = vadd.f32 %v1623_v6, %v9128_v30  ;;  %v1625_v4 = vpop.f32.mrb[55].mxu0  ;;  %1763 = vmatpush1.bf16.msra.mxu1 %v1704_v15  ;;  %v1680_v11 = vmax.f32 %v1620_v12, 0.0 }
 0x437   : > { %v1626_v21 = vadd.f32 %v1625_v4, %v9128_v30  ;;  %v1681_v24 = vmax.f32 %v1622_v43, 0.0 }
 0x438   : > { %v1682_v14 = vmax.f32 %v1624_v51, 0.0 }
 0x439   : > { %v1683_v48 = vmax.f32 %v1626_v21, 0.0  ;;  %v9131_v21 = vld [vmem:[#allocation13_spill] sm:$0xff] }
 0x43a   : > { %v1706_v19 = vpack.c.bf16 %v1682_v14, %v1680_v11 }
 0x43b   : > { %v1707_v35 = vpack.c.bf16 %v1683_v48, %v1681_v24  ;;  %v1629_v18 = vpop.f32.mrb[56].mxu0 }
 0x43c   : > { %v1630_v0 = vadd.f32 %v1629_v18, %v9129_v16  ;;  %v1631_v9 = vpop.f32.mrb[57].mxu0 }
 0x43d   : > { %v1632_v25 = vadd.f32 %v1631_v9, %v9129_v16  ;;  %v1633_v7 = vpop.f32.mrb[58].mxu0  ;;  %1764 = vmatprep.subr.bf16.mxu1 %v1707_v35  ;;  %v9132_v35 = vld [vmem:[#allocation12_spill] sm:$0xff] }
 0x43e   : > { %v1634_v31 = vadd.f32 %v1633_v7, %v9130_v34  ;;  %v1635_v17 = vpop.f32.mrb[59].mxu0  ;;  %1765 = vmatpush1.bf16.msra.mxu1 %v1706_v19  ;;  %v1684_v12 = vmax.f32 %v1630_v0, 0.0 }
 0x43f   : > { %v1636_v15 = vadd.f32 %v1635_v17, %v9130_v34  ;;  %v1685_v43 = vmax.f32 %v1632_v25, 0.0 }
 0x440   : > { %v1686_v41 = vmax.f32 %v1634_v31, 0.0 }
 0x441   : > { %v1687_v6 = vmax.f32 %v1636_v15, 0.0  ;;  %v9133_v15 = vld [vmem:[#allocation15_spill] sm:$0xff] }
 0x442   : > { %v1708_v30 = vpack.c.bf16 %v1686_v41, %v1684_v12 }
 0x443   : > { %v1709_v51 = vpack.c.bf16 %v1687_v6, %v1685_v43  ;;  %v1639_v4 = vpop.f32.mrb[60].mxu0 }
 0x444   : > { %v1640_v11 = vadd.f32 %v1639_v4, %v9131_v21  ;;  %v1641_v14 = vpop.f32.mrb[61].mxu0 }
 0x445   : > { %v1642_v24 = vadd.f32 %v1641_v14, %v9131_v21  ;;  %v1643_v48 = vpop.f32.mrb[62].mxu0  ;;  %1766 = vmatprep.subr.bf16.mxu1 %v1709_v51  ;;  %v9134_v51 = vld [vmem:[#allocation14_spill] sm:$0xff] }
 0x446   : > { %v1644_v18 = vadd.f32 %v1643_v48, %v9132_v35  ;;  %v1645_v16 = vpop.f32.mrb[63].mxu0  ;;  %1767 = vmatpush1.bf16.msra.mxu1 %v1708_v30  ;;  %v1688_v0 = vmax.f32 %v1640_v11, 0.0 }
 0x447   : > { %v1646_v19 = vadd.f32 %v1645_v16, %v9132_v35  ;;  %v1689_v25 = vmax.f32 %v1642_v24, 0.0 }
 0x448   : > { %v1690_v9 = vmax.f32 %v1644_v18, 0.0 }
 0x449   : > { %v1691_v7 = vmax.f32 %v1646_v19, 0.0 }
 0x44a   : > { %v1710_v34 = vpack.c.bf16 %v1690_v9, %v1688_v0 }
 0x44b   : > { %v1711_v31 = vpack.c.bf16 %v1691_v7, %v1689_v25  ;;  %v1649_v17 = vpop.f32.mrb[64].mxu0  ;;  %v9135_v7 = vld [vmem:[#allocation16_spill] sm:$0xff] }
 0x44c   : > { %v1650_v12 = vadd.f32 %v1649_v17, %v9133_v15  ;;  %v1651_v41 = vpop.f32.mrb[65].mxu0 }
 0x44d   : > { %v1652_v43 = vadd.f32 %v1651_v41, %v9133_v15  ;;  %v1653_v6 = vpop.f32.mrb[66].mxu0  ;;  %1768 = vmatprep.subr.bf16.mxu1 %v1711_v31 }
 0x44e   : > { %v1654_v4 = vadd.f32 %v1653_v6, %v9134_v51  ;;  %v1655_v21 = vpop.f32.mrb[67].mxu0  ;;  %1769 = vmatpush1.bf16.msra.mxu1 %v1710_v34  ;;  %v1692_v11 = vmax.f32 %v1650_v12, 0.0 }
 0x44f   : > { %v1656_v30 = vadd.f32 %v1655_v21, %v9134_v51  ;;  %v1693_v24 = vmax.f32 %v1652_v43, 0.0 }
 0x450   : > { %v1694_v14 = vmax.f32 %v1654_v4, 0.0  ;;  %v6563_v4 = vld [vmem:[%s8830_s5 + $0x10] sm:$0xff]  }
 0x451   : > { %v1695_v48 = vmax.f32 %v1656_v30, 0.0 }
 0x452   : > { %v1712_v35 = vpack.c.bf16 %v1694_v14, %v1692_v11 }
 0x453   : > { %v1713_v18 = vpack.c.bf16 %v1695_v48, %v1693_v24  ;;  %v1659_v16 = vpop.f32.mrb[68].mxu0 }
 0x454   : > { %v1660_v19 = vadd.f32 %v1659_v16, %v7236_v53  ;;  %v1661_v0 = vpop.f32.mrb[69].mxu0 }
 0x455   : > { %v1662_v9 = vadd.f32 %v1661_v0, %v7236_v53  ;;  %v1663_v25 = vpop.f32.mrb[70].mxu0  ;;  %1770 = vmatprep.subr.bf16.mxu1 %v1713_v18  ;;  %v6564_v53 = vld [vmem:[%s8830_s5 + $0x18] sm:$0xff]  }
 0x456   : > { %v1664_v31 = vadd.f32 %v1663_v25, %v9135_v7  ;;  %v1665_v17 = vpop.f32.mrb[71].mxu0  ;;  %1771 = vmatpush1.bf16.msra.mxu1 %v1712_v35  ;;  %v1696_v15 = vmax.f32 %v1660_v19, 0.0 }
 0x457   : > { %v1666_v34 = vadd.f32 %v1665_v17, %v9135_v7  ;;  %v1697_v41 = vmax.f32 %v1662_v9, 0.0 }
 0x458   : > { %v1698_v12 = vmax.f32 %v1664_v31, 0.0 }
 0x459   : > { %v1699_v43 = vmax.f32 %v1666_v34, 0.0 }
 0x45a   : > { %v1714_v6 = vpack.c.bf16 %v1698_v12, %v1696_v15 }
 0x45b   : > { %v1715_v51 = vpack.c.bf16 %v1699_v43, %v1697_v41 }
 0x45d   : > { %1772 = vmatprep.subr.bf16.mxu1 %v1715_v51 }
 0x45e   : > { %1773 = vmatpush1.bf16.msra.mxu1 %v1714_v6 }
 0x461   : > { %1791 = vmatmul.mubr.bf16.vlgmr.msra.gmra.mrb[40].mxu1 %v6563_v4 }
 0x462   : > { %1800 = vmatprep.mubr.bf16.mxu1 %v8999_v10 }
 0x469   : > { %1801 = vmatmul.mubr.bf16.gmra.mrb[44].mxu1 %v6564_v53 }
 0x46a   : > { %2033 = vmatprep.mubr.bf16.mxu1 %v8999_v10 }
 0x534   : > { %v1792_v21 = vpop.f32.mrb[40].mxu1 }
 0x535   : > { %v1793_v30 = vadd.f32 %v1792_v21, %v7243_v38  ;;  %v1794_v11 = vpop.f32.mrb[41].mxu1 }
 0x536   : > { %v1795_v14 = vadd.f32 %v1794_v11, %v7243_v38  ;;  %v1796_v24 = vpop.f32.mrb[42].mxu1  ;;  %v6568_v11 = vld [vmem:[%s8832_s7 + $0x58] sm:$0xff]  }
 0x537   : > { %v1797_v48 = vadd.f32 %v1796_v24, %v7241_v22  ;;  %v1798_v35 = vpop.f32.mrb[43].mxu1  ;;  %v1811_v16 = vmax.f32 %v1793_v30, 0.0  ;;  %v6565_v30 = vld [vmem:[%s8832_s7 + $0x40] sm:$0xff]   ;;  %v6570_v24 = vld [vmem:[%s8832_s7 + $0x68] sm:$0xff]  }
 0x538   : > { %v1799_v18 = vadd.f32 %v1798_v35, %v7241_v22  ;;  %v1812_v0 = vmax.f32 %v1795_v14, 0.0  ;;  %v6569_v14 = vld [vmem:[%s8832_s7 + $0x60] sm:$0xff]   ;;  %v6572_v35 = vld [vmem:[%s8832_s7 + $0x78] sm:$0xff]  }
 0x539   : > { %v1813_v19 = vmax.f32 %v1797_v48, 0.0  ;;  %v6571_v48 = vld [vmem:[%s8832_s7 + $0x70] sm:$0xff]  }
 0x53a   : > { %v1814_v9 = vmax.f32 %v1799_v18, 0.0 }
 0x53b   : > { %v1819_v25 = vpack.c.bf16 %v1813_v19, %v1811_v16 }
 0x53c   : > { %v1820_v7 = vpack.c.bf16 %v1814_v9, %v1812_v0  ;;  %v1802_v31 = vpop.f32.mrb[44].mxu1 }
 0x53d   : > { %v1803_v17 = vadd.f32 %v1802_v31, %v7252_v47  ;;  %v1804_v34 = vpop.f32.mrb[45].mxu1 }
 0x53e   : > { %v1805_v15 = vadd.f32 %v1804_v34, %v7252_v47  ;;  %v1806_v12 = vpop.f32.mrb[46].mxu1  ;;  %2001 = vmatprep.subr.bf16.mxu1 %v1820_v7  ;;  %v6567_v47 = vld [vmem:[%s8832_s7 + $0x50] sm:$0xff]  }
 0x53f   : > { %v1807_v38 = vadd.f32 %v1806_v12, %v7250_v28  ;;  %v1808_v41 = vpop.f32.mrb[47].mxu1  ;;  %2002 = vmatpush1.bf16.msra.mxu1 %v1819_v25  ;;  %v1815_v43 = vmax.f32 %v1803_v17, 0.0 }
 0x540   : > { %v1809_v22 = vadd.f32 %v1808_v41, %v7250_v28  ;;  %v1816_v51 = vmax.f32 %v1805_v15, 0.0  ;;  %v6566_v28 = vld [vmem:[%s8832_s7 + $0x48] sm:$0xff]  }
 0x541   : > { %v1817_v6 = vmax.f32 %v1807_v38, 0.0 }
 0x542   : > { %v1818_v4 = vmax.f32 %v1809_v22, 0.0 }
 0x543   : > { %v1821_v53 = vpack.c.bf16 %v1817_v6, %v1815_v43 }
 0x544   : > { %v1822_v21 = vpack.c.bf16 %v1818_v4, %v1816_v51 }
 0x546   : > { %2003 = vmatprep.subr.bf16.mxu1 %v1822_v21 }
 0x547   : > { %2004 = vmatpush1.bf16.msra.mxu1 %v1821_v53 }
 0x54a   : > { %6104 = vmatmul.mubr.msk.bf16.vlgmr.msra.gmra.mrb[48].mxu1 %vm1080_vm2, %v6565_v30 }
 0x54b   : > { %2043 = vmatprep.mubr.bf16.mxu1 %v8999_v10 }
 0x552   : > { %6105 = vmatmul.mubr.msk.bf16.gmra.mrb[52].mxu1 %vm1080_vm2, %v6566_v28 }
 0x553   : > { %2053 = vmatprep.mubr.bf16.mxu1 %v8999_v10 }
 0x55a   : > { %6106 = vmatmul.mubr.msk.bf16.gmra.mrb[56].mxu1 %vm1080_vm2, %v6567_v47 }
 0x55b   : > { %2063 = vmatprep.mubr.bf16.mxu1 %v8999_v10 }
 0x562   : > { %6107 = vmatmul.mubr.msk.bf16.gmra.mrb[60].mxu1 %vm1080_vm2, %v6568_v11 }
 0x563   : > { %2073 = vmatprep.mubr.bf16.mxu1 %v8999_v10 }
 0x56a   : > { %6108 = vmatmul.mubr.msk.bf16.gmra.mrb[64].mxu1 %vm1080_vm2, %v6569_v14 }
 0x56b   : > { %2083 = vmatprep.mubr.bf16.mxu1 %v8999_v10 }
 0x572   : > { %6109 = vmatmul.mubr.msk.bf16.gmra.mrb[68].mxu1 %vm1080_vm2, %v6570_v24 }
 0x573   : > { %2093 = vmatprep.mubr.bf16.mxu1 %v8999_v10 }
 0x57a   : > { %6110 = vmatmul.mubr.msk.bf16.gmra.mrb[72].mxu1 %vm1080_vm2, %v6571_v48 }
 0x57b   : > { %2103 = vmatprep.mubr.bf16.mxu1 %v8999_v10 }
 0x582   : > { %6111 = vmatmul.mubr.msk.bf16.gmra.mrb[76].mxu1 %vm1080_vm2, %v6572_v35 }
 0x583   : > { %2685 = vmatprep.mubr.bf16.mxu1 %v8999_v10 }
 0x61d   : > { %v2035_v18 = vpop.f32.mrb[48].mxu1 }
 0x61e   : > { %v2036_v16 = vadd.f32 %v2035_v18, %v7259_v2  ;;  %v2037_v19 = vpop.f32.mrb[49].mxu1 }
 0x61f   : > { %v2038_v0 = vadd.f32 %v2037_v19, %v7259_v2  ;;  %v2039_v9 = vpop.f32.mrb[50].mxu1 }
 0x620   : > { %v2040_v25 = vadd.f32 %v2039_v9, %v7257_v52  ;;  %v2041_v7 = vpop.f32.mrb[51].mxu1  ;;  %v2114_v17 = vmax.f32 %v2036_v16, 0.0 }
 0x621   : > { %v2042_v31 = vadd.f32 %v2041_v7, %v7257_v52  ;;  %v2115_v15 = vmax.f32 %v2038_v0, 0.0 }
 0x622   : > { %v2116_v34 = vmax.f32 %v2040_v25, 0.0 }
 0x623   : > { %v2117_v12 = vmax.f32 %v2042_v31, 0.0 }
 0x624   : > { %v2146_v38 = vpack.c.bf16 %v2116_v34, %v2114_v17 }
 0x625   : > { %v2147_v41 = vpack.c.bf16 %v2117_v12, %v2115_v15  ;;  %v2045_v22 = vpop.f32.mrb[52].mxu1 }
 0x626   : > { %v2046_v43 = vadd.f32 %v2045_v22, %v7268_v44  ;;  %v2047_v6 = vpop.f32.mrb[53].mxu1 }
 0x627   : > { %v2048_v51 = vadd.f32 %v2047_v6, %v7268_v44  ;;  %v2049_v4 = vpop.f32.mrb[54].mxu1  ;;  %2204 = vmatprep.subr.bf16.mxu0 %v2147_v41 }
 0x628   : > { %v2050_v2 = vadd.f32 %v2049_v4, %v7266_v50  ;;  %v2051_v53 = vpop.f32.mrb[55].mxu1  ;;  %2205 = vmatpush1.bf16.msra.mxu0 %v2146_v38  ;;  %v2118_v21 = vmax.f32 %v2046_v43, 0.0 }
 0x629   : > { %v2052_v52 = vadd.f32 %v2051_v53, %v7266_v50  ;;  %v2119_v28 = vmax.f32 %v2048_v51, 0.0 }
 0x62a   : > { %v2120_v30 = vmax.f32 %v2050_v2, 0.0 }
 0x62b   : > { %v2121_v47 = vmax.f32 %v2052_v52, 0.0 }
 0x62c   : > { %v2148_v11 = vpack.c.bf16 %v2120_v30, %v2118_v21 }
 0x62d   : > { %v2149_v14 = vpack.c.bf16 %v2121_v47, %v2119_v28  ;;  %v2055_v24 = vpop.f32.mrb[56].mxu1 }
 0x62e   : > { %v2056_v48 = vadd.f32 %v2055_v24, %v7275_v27  ;;  %v2057_v35 = vpop.f32.mrb[57].mxu1 }
 0x62f   : > { %v2058_v44 = vadd.f32 %v2057_v35, %v7275_v27  ;;  %v2059_v18 = vpop.f32.mrb[58].mxu1  ;;  %2206 = vmatprep.subr.bf16.mxu0 %v2149_v14 }
 0x630   : > { %v2060_v16 = vadd.f32 %v2059_v18, %v7273_v54  ;;  %v2061_v19 = vpop.f32.mrb[59].mxu1  ;;  %2207 = vmatpush1.bf16.msra.mxu0 %v2148_v11  ;;  %v2122_v0 = vmax.f32 %v2056_v48, 0.0 }
 0x631   : > { %v2062_v50 = vadd.f32 %v2061_v19, %v7273_v54  ;;  %v2123_v25 = vmax.f32 %v2058_v44, 0.0 }
 0x632   : > { %v2124_v9 = vmax.f32 %v2060_v16, 0.0 }
 0x633   : > { %v2125_v7 = vmax.f32 %v2062_v50, 0.0 }
 0x634   : > { %v2150_v31 = vpack.c.bf16 %v2124_v9, %v2122_v0 }
 0x635   : > { %v2151_v17 = vpack.c.bf16 %v2125_v7, %v2123_v25  ;;  %v2065_v34 = vpop.f32.mrb[60].mxu1 }
 0x636   : > { %v2066_v15 = vadd.f32 %v2065_v34, %v7284_v40  ;;  %v2067_v12 = vpop.f32.mrb[61].mxu1 }
 0x637   : > { %v2068_v27 = vadd.f32 %v2067_v12, %v7284_v40  ;;  %v2069_v38 = vpop.f32.mrb[62].mxu1  ;;  %2208 = vmatprep.subr.bf16.mxu0 %v2151_v17 }
 0x638   : > { %v2070_v41 = vadd.f32 %v2069_v38, %v7282_v60  ;;  %v2071_v22 = vpop.f32.mrb[63].mxu1  ;;  %2209 = vmatpush1.bf16.msra.mxu0 %v2150_v31  ;;  %v2126_v43 = vmax.f32 %v2066_v15, 0.0 }
 0x639   : > { %v2072_v54 = vadd.f32 %v2071_v22, %v7282_v60  ;;  %v2127_v51 = vmax.f32 %v2068_v27, 0.0 }
 0x63a   : > { %v2128_v6 = vmax.f32 %v2070_v41, 0.0 }
 0x63b   : > { %v2129_v4 = vmax.f32 %v2072_v54, 0.0 }
 0x63c   : > { %v2152_v2 = vpack.c.bf16 %v2128_v6, %v2126_v43 }
 0x63d   : > { %v2153_v53 = vpack.c.bf16 %v2129_v4, %v2127_v51  ;;  %v2075_v52 = vpop.f32.mrb[64].mxu1 }
 0x63e   : > { %v2076_v21 = vadd.f32 %v2075_v52, %v7293_v58  ;;  %v2077_v30 = vpop.f32.mrb[65].mxu1 }
 0x63f   : > { %v2078_v40 = vadd.f32 %v2077_v30, %v7293_v58  ;;  %v2079_v28 = vpop.f32.mrb[66].mxu1  ;;  %2210 = vmatprep.subr.bf16.mxu0 %v2153_v53 }
 0x640   : > { %v2080_v47 = vadd.f32 %v2079_v28, %v7291_v63  ;;  %v2081_v11 = vpop.f32.mrb[67].mxu1  ;;  %2211 = vmatpush1.bf16.msra.mxu0 %v2152_v2  ;;  %v2130_v14 = vmax.f32 %v2076_v21, 0.0 }
 0x641   : > { %v2082_v60 = vadd.f32 %v2081_v11, %v7291_v63  ;;  %v2131_v48 = vmax.f32 %v2078_v40, 0.0 }
 0x642   : > { %v2132_v24 = vmax.f32 %v2080_v47, 0.0  ;;  %v9136_v47 = vld [vmem:[#allocation17_spill] sm:$0xff] }
 0x643   : > { %v2133_v35 = vmax.f32 %v2082_v60, 0.0 }
 0x644   : > { %v2154_v44 = vpack.c.bf16 %v2132_v24, %v2130_v14 }
 0x645   : > { %v2155_v18 = vpack.c.bf16 %v2133_v35, %v2131_v48  ;;  %v2085_v16 = vpop.f32.mrb[68].mxu1  ;;  %v6123_v48 = vld [vmem:[%s6799_s13 + $0x18] sm:$0xff]  ;;  %v6122_v35 = vld [vmem:[%s6799_s13 + $0x10] sm:$0xff] }
 0x646   : > { %v2086_v19 = vadd.f32 %v2085_v16, %v7302_v8  ;;  %v2087_v50 = vpop.f32.mrb[69].mxu1 }
 0x647   : > { %v2088_v58 = vadd.f32 %v2087_v50, %v7302_v8  ;;  %v2089_v0 = vpop.f32.mrb[70].mxu1  ;;  %2212 = vmatprep.subr.bf16.mxu0 %v2155_v18  ;;  %v2269_v50 = vpack.c.bf16 %v6123_v48, %v6123_v48 }
 0x648   : > { %v2090_v9 = vadd.f32 %v2089_v0, %v7300_v55  ;;  %v2091_v25 = vpop.f32.mrb[71].mxu1  ;;  %2213 = vmatpush1.bf16.msra.mxu0 %v2154_v44  ;;  %v2134_v7 = vmax.f32 %v2086_v19, 0.0 }
 0x649   : > { %v2092_v63 = vadd.f32 %v2091_v25, %v7300_v55  ;;  %v2135_v17 = vmax.f32 %v2088_v58, 0.0  ;;  %v2268_v58 = vpack.c.bf16 %v6122_v35, %v6122_v35  ;;  %v6575_v25 = vld [vmem:[%s8828_s3] sm:$0xff]  }
 0x64a   : > { %v2136_v31 = vmax.f32 %v2090_v9, 0.0  ;;  %v6574_v9 = vld [vmem:[%s8833_s8 + $0x18] sm:$0xff]  }
 0x64b   : > { %v2137_v34 = vmax.f32 %v2092_v63, 0.0  ;;  %v2447_v0 = vsel %vm655_vm0, %v2268_v58, 0  ;;  %v6576_v63 = vld [vmem:[%s8828_s3 + $0x8] sm:$0xff]  }
 0x64c   : > { %v2156_v15 = vpack.c.bf16 %v2136_v31, %v2134_v7  ;;  %v6577_v7 = vld [vmem:[%s8828_s3 + $0x10] sm:$0xff]   ;;  %v6578_v31 = vld [vmem:[%s8828_s3 + $0x18] sm:$0xff]  }
 0x64d   : > { %v2157_v12 = vpack.c.bf16 %v2137_v34, %v2135_v17  ;;  %v2095_v27 = vpop.f32.mrb[72].mxu1  ;;  %v6579_v17 = vld [vmem:[%s8828_s3 + $0x20] sm:$0xff]   ;;  %v6580_v34 = vld [vmem:[%s8828_s3 + $0x28] sm:$0xff]  }
 0x64e   : > { %v2096_v38 = vadd.f32 %v2095_v27, %v7309_v59  ;;  %v2097_v41 = vpop.f32.mrb[73].mxu1  ;;  %v2175_v27 = vpop.permute.xlu0 %2174 }
 0x64f   : > { %v2098_v8 = vadd.f32 %v2097_v41, %v7309_v59  ;;  %v2099_v22 = vpop.f32.mrb[74].mxu1  ;;  %2214 = vmatprep.subr.bf16.mxu0 %v2157_v12  ;;  %v6582_v12 = vld [vmem:[%s8828_s3 + $0x38] sm:$0xff]  }
 0x650   : > { %v2100_v54 = vadd.f32 %v2099_v22, %v7307_v26  ;;  %v2101_v43 = vpop.f32.mrb[75].mxu1  ;;  %2215 = vmatpush1.bf16.msra.mxu0 %v2156_v15  ;;  %v2138_v6 = vmax.f32 %v2096_v38, 0.0  ;;  %v6581_v15 = vld [vmem:[%s8828_s3 + $0x30] sm:$0xff]   ;;  %v2180_v22 = vpop.permute.xlu1 %2179 }
 0x651   : > { %v2102_v55 = vadd.f32 %v2101_v43, %v7307_v26  ;;  %v2139_v4 = vmax.f32 %v2098_v8, 0.0 }
 0x652   : > { %v2140_v51 = vmax.f32 %v2100_v54, 0.0 }
 0x653   : > { %v2141_v2 = vmax.f32 %v2102_v55, 0.0 }
 0x654   : > { %v2158_v53 = vpack.c.bf16 %v2140_v51, %v2138_v6 }
 0x655   : > { %v2159_v52 = vpack.c.bf16 %v2141_v2, %v2139_v4  ;;  %v2105_v21 = vpop.f32.mrb[76].mxu1  ;;  %v2185_v4 = vpop.permute.xlu0 %2184 }
 0x656   : > { %v2106_v30 = vadd.f32 %v2105_v21, %v7318_v57  ;;  %v2107_v59 = vpop.f32.mrb[77].mxu1  ;;  %v2190_v21 = vpop.permute.xlu1 %2189 }
 0x657   : > { %v2108_v40 = vadd.f32 %v2107_v59, %v7318_v57  ;;  %v2109_v28 = vpop.f32.mrb[78].mxu1  ;;  %2216 = vmatprep.subr.bf16.mxu0 %v2159_v52  ;;  %v6573_v57 = vld [vmem:[%s8833_s8 + $0x10] sm:$0xff]  }
 0x658   : > { %v2110_v11 = vadd.f32 %v2109_v28, %v9136_v47  ;;  %v2111_v60 = vpop.f32.mrb[79].mxu1  ;;  %2217 = vmatpush1.bf16.msra.mxu0 %v2158_v53  ;;  %v2142_v14 = vmax.f32 %v2106_v30, 0.0 }
 0x659   : > { %v2112_v26 = vadd.f32 %v2111_v60, %v9136_v47  ;;  %v2143_v44 = vmax.f32 %v2108_v40, 0.0 }
 0x65a   : > { %v2144_v24 = vmax.f32 %v2110_v11, 0.0 }
 0x65b   : > { %v2145_v18 = vmax.f32 %v2112_v26, 0.0 }
 0x65c   : > { %v2160_v16 = vpack.c.bf16 %v2144_v24, %v2142_v14 }
 0x65d   : > { %v2161_v19 = vpack.c.bf16 %v2145_v18, %v2143_v44 }
 0x65f   : > { %2218 = vmatprep.subr.bf16.mxu0 %v2161_v19 }
 0x660   : > { %2219 = vmatpush1.bf16.msra.mxu0 %v2160_v16 }
 0x661   : > { %6132 = vmatprep.subr.msk.bf16.mxu0 %vm655_vm0, %v2269_v50 }
 0x663   : > { %2237 = vmatmul.mubr.bf16.vlgmr.msra.gmra.mrb[72].mxu0 %v6573_v57 }
 0x664   : > { %2453 = vmatpush1.bf16.msra.mxu0 %v2447_v0  ;;  %2246 = vmatprep.mubr.bf16.mxu0 %v8999_v10 }
 0x66b   : > { %2247 = vmatmul.mubr.bf16.gmra.mrb[76].mxu0 %v6574_v9 }
 0x66c   : > { %2484 = vmatprep.mubr.bf16.mxu0 %v8999_v10 }
 0x673   : > { %6133 = vmatmul.mubr.msk.bf16.vlgmr.msra.gmra.mrb[80].mxu0 %vm630_vm1, %v6575_v25 }
 0x674   : > { %2494 = vmatprep.mubr.bf16.mxu0 %v8999_v10 }
 0x67b   : > { %6134 = vmatmul.mubr.msk.bf16.gmra.mrb[84].mxu0 %vm630_vm1, %v6576_v63 }
 0x67c   : > { %2504 = vmatprep.mubr.bf16.mxu0 %v8999_v10 }
 0x683   : > { %6135 = vmatmul.mubr.msk.bf16.gmra.mrb[88].mxu0 %vm630_vm1, %v6577_v7 }
 0x684   : > { %2514 = vmatprep.mubr.bf16.mxu0 %v8999_v10 }
 0x68b   : > { %6136 = vmatmul.mubr.msk.bf16.gmra.mrb[92].mxu0 %vm630_vm1, %v6578_v31 }
 0x68c   : > { %2524 = vmatprep.mubr.bf16.mxu0 %v8999_v10 }
 0x693   : > { %6137 = vmatmul.mubr.msk.bf16.gmra.mrb[96].mxu0 %vm630_vm1, %v6579_v17 }
 0x694   : > { %2534 = vmatprep.mubr.bf16.mxu0 %v8999_v10 }
 0x69b   : > { %6138 = vmatmul.mubr.msk.bf16.gmra.mrb[100].mxu0 %vm630_vm1, %v6580_v34 }
 0x69c   : > { %2544 = vmatprep.mubr.bf16.mxu0 %v8999_v10 }
 0x6a3   : > { %6139 = vmatmul.mubr.msk.bf16.gmra.mrb[104].mxu0 %vm630_vm1, %v6581_v15 }
 0x6a4   : > { %2554 = vmatprep.mubr.bf16.mxu0 %v8999_v10 }
 0x6ab   : > { %6140 = vmatmul.mubr.msk.bf16.gmra.mrb[108].mxu0 %vm630_vm1, %v6582_v12 }
 0x6ac   : > { %3128 = vmatprep.mubr.bf16.mxu0 %v8999_v10 }
 0x736   : > { %v2238_v38 = vpop.f32.mrb[72].mxu0 }
 0x737   : > { %v2239_v41 = vadd.f32 %v2238_v38, %v2175_v27  ;;  %v2240_v8 = vpop.f32.mrb[73].mxu0 }
 0x738   : > { %v2241_v54 = vadd.f32 %v2240_v8, %v2175_v27  ;;  %v2242_v43 = vpop.f32.mrb[74].mxu0 }
 0x739   : > { %2257 = vst [vmem:[%s7952_s18 + $0x40] sm:$0xff] %v2239_v41  ;;  %v2243_v55 = vadd.f32 %v2242_v43, %v2180_v22  ;;  %v2244_v6 = vpop.f32.mrb[75].mxu0  ;;  %v9137_v43 = vld [vmem:[#allocation18_spill] sm:$0xff] }
 0x73a   : > { %2258 = vst [vmem:[%s7952_s18 + $0x48] sm:$0xff] %v2241_v54  ;;  %v2245_v51 = vadd.f32 %v2244_v6, %v2180_v22 }
 0x73b   : > { %2259 = vst [vmem:[%s7952_s18 + $0x50] sm:$0xff] %v2243_v55 }
 0x73c   : > { %2260 = vst [vmem:[%s7952_s18 + $0x58] sm:$0xff] %v2245_v51 }
 0x73e   : > { %v2248_v2 = vpop.f32.mrb[76].mxu0 }
 0x73f   : > { %v2249_v53 = vadd.f32 %v2248_v2, %v2185_v4  ;;  %v2250_v52 = vpop.f32.mrb[77].mxu0 }
 0x740   : > { %v2251_v30 = vadd.f32 %v2250_v52, %v2185_v4  ;;  %v2252_v59 = vpop.f32.mrb[78].mxu0 }
 0x741   : > { %2261 = vst [vmem:[%s7952_s18 + $0x60] sm:$0xff] %v2249_v53  ;;  %v2253_v40 = vadd.f32 %v2252_v59, %v2190_v21  ;;  %v2254_v28 = vpop.f32.mrb[79].mxu0  ;;  %v9138_v59 = vld [vmem:[#allocation20_spill] sm:$0xff] }
 0x742   : > { %2262 = vst [vmem:[%s7952_s18 + $0x68] sm:$0xff] %v2251_v30  ;;  %v2255_v47 = vadd.f32 %v2254_v28, %v2190_v21 }
 0x743   : > { %2263 = vst [vmem:[%s7952_s18 + $0x70] sm:$0xff] %v2253_v40 }
 0x744   : > { %2264 = vst [vmem:[%s7952_s18 + $0x78] sm:$0xff] %v2255_v47 }
 0x746   : > { %v2486_v11 = vpop.f32.mrb[80].mxu0 }
 0x747   : > { %v2487_v60 = vadd.f32 %v2486_v11, %v7325_v45  ;;  %v2488_v26 = vpop.f32.mrb[81].mxu0  ;;  %v9139_v11 = vld [vmem:[#allocation19_spill] sm:$0xff] }
 0x748   : > { %v2489_v14 = vadd.f32 %v2488_v26, %v7325_v45  ;;  %v2490_v24 = vpop.f32.mrb[82].mxu0 }
 0x749   : > { %v2491_v48 = vadd.f32 %v2490_v24, %v7323_v62  ;;  %v2492_v35 = vpop.f32.mrb[83].mxu0  ;;  %v2565_v18 = vmax.f32 %v2487_v60, 0.0 }
 0x74a   : > { %v2493_v44 = vadd.f32 %v2492_v35, %v7323_v62  ;;  %v2566_v19 = vmax.f32 %v2489_v14, 0.0 }
 0x74b   : > { %v2567_v16 = vmax.f32 %v2491_v48, 0.0 }
 0x74c   : > { %v2568_v50 = vmax.f32 %v2493_v44, 0.0 }
 0x74d   : > { %v2597_v58 = vpack.c.bf16 %v2567_v16, %v2565_v18 }
 0x74e   : > { %v2598_v57 = vpack.c.bf16 %v2568_v50, %v2566_v19  ;;  %v2496_v0 = vpop.f32.mrb[84].mxu0  ;;  %v9140_v50 = vld [vmem:[#allocation22_spill] sm:$0xff] }
 0x74f   : > { %v2497_v9 = vadd.f32 %v2496_v0, %v7337_v33  ;;  %v2498_v25 = vpop.f32.mrb[85].mxu0 }
 0x750   : > { %v2499_v63 = vadd.f32 %v2498_v25, %v7337_v33  ;;  %v2500_v7 = vpop.f32.mrb[86].mxu0  ;;  %2653 = vmatprep.subr.bf16.mxu1 %v2598_v57  ;;  %v9141_v25 = vld [vmem:[#allocation21_spill] sm:$0xff] }
 0x751   : > { %v2501_v45 = vadd.f32 %v2500_v7, %v7334_v29  ;;  %v2502_v31 = vpop.f32.mrb[87].mxu0  ;;  %2654 = vmatpush1.bf16.msra.mxu1 %v2597_v58  ;;  %v2569_v17 = vmax.f32 %v2497_v9, 0.0 }
 0x752   : > { %v2503_v62 = vadd.f32 %v2502_v31, %v7334_v29  ;;  %v2570_v15 = vmax.f32 %v2499_v63, 0.0 }
 0x753   : > { %v2571_v34 = vmax.f32 %v2501_v45, 0.0 }
 0x754   : > { %v2572_v12 = vmax.f32 %v2503_v62, 0.0 }
 0x755   : > { %v2599_v27 = vpack.c.bf16 %v2571_v34, %v2569_v17 }
 0x756   : > { %v2600_v38 = vpack.c.bf16 %v2572_v12, %v2570_v15  ;;  %v2506_v41 = vpop.f32.mrb[88].mxu0 }
 0x757   : > { %v2507_v8 = vadd.f32 %v2506_v41, %v7346_v56  ;;  %v2508_v22 = vpop.f32.mrb[89].mxu0 }
 0x758   : > { %v2509_v33 = vadd.f32 %v2508_v22, %v7346_v56  ;;  %v2510_v54 = vpop.f32.mrb[90].mxu0  ;;  %2655 = vmatprep.subr.bf16.mxu1 %v2600_v38  ;;  %v9142_v38 = vld [vmem:[#allocation24_spill] sm:$0xff] }
 0x759   : > { %v2511_v55 = vadd.f32 %v2510_v54, %v9137_v43  ;;  %v2512_v6 = vpop.f32.mrb[91].mxu0  ;;  %2656 = vmatpush1.bf16.msra.mxu1 %v2599_v27  ;;  %v2573_v51 = vmax.f32 %v2507_v8, 0.0  ;;  %v9143_v54 = vld [vmem:[#allocation23_spill] sm:$0xff] }
 0x75a   : > { %v2513_v29 = vadd.f32 %v2512_v6, %v9137_v43  ;;  %v2574_v2 = vmax.f32 %v2509_v33, 0.0 }
 0x75b   : > { %v2575_v4 = vmax.f32 %v2511_v55, 0.0 }
 0x75c   : > { %v2576_v53 = vmax.f32 %v2513_v29, 0.0 }
 0x75d   : > { %v2601_v52 = vpack.c.bf16 %v2575_v4, %v2573_v51 }
 0x75e   : > { %v2602_v21 = vpack.c.bf16 %v2576_v53, %v2574_v2  ;;  %v2516_v30 = vpop.f32.mrb[92].mxu0 }
 0x75f   : > { %v2517_v40 = vadd.f32 %v2516_v30, %v9138_v59  ;;  %v2518_v28 = vpop.f32.mrb[93].mxu0  ;;  %v9144_v30 = vld [vmem:[#allocation26_spill] sm:$0xff] }
 0x760   : > { %v2519_v56 = vadd.f32 %v2518_v28, %v9138_v59  ;;  %v2520_v47 = vpop.f32.mrb[94].mxu0  ;;  %2657 = vmatprep.subr.bf16.mxu1 %v2602_v21 }
 0x761   : > { %v2521_v60 = vadd.f32 %v2520_v47, %v9139_v11  ;;  %v2522_v26 = vpop.f32.mrb[95].mxu0  ;;  %2658 = vmatpush1.bf16.msra.mxu1 %v2601_v52  ;;  %v2577_v24 = vmax.f32 %v2517_v40, 0.0  ;;  %v9145_v47 = vld [vmem:[#allocation25_spill] sm:$0xff] }
 0x762   : > { %v2523_v14 = vadd.f32 %v2522_v26, %v9139_v11  ;;  %v2578_v35 = vmax.f32 %v2519_v56, 0.0 }
 0x763   : > { %v2579_v48 = vmax.f32 %v2521_v60, 0.0 }
 0x764   : > { %v2580_v44 = vmax.f32 %v2523_v14, 0.0 }
 0x765   : > { %v2603_v18 = vpack.c.bf16 %v2579_v48, %v2577_v24 }
 0x766   : > { %v2604_v16 = vpack.c.bf16 %v2580_v44, %v2578_v35  ;;  %v2526_v19 = vpop.f32.mrb[96].mxu0 }
 0x767   : > { %v2527_v58 = vadd.f32 %v2526_v19, %v9140_v50  ;;  %v2528_v57 = vpop.f32.mrb[97].mxu0  ;;  %v9146_v19 = vld [vmem:[#allocation28_spill] sm:$0xff] }
 0x768   : > { %v2529_v0 = vadd.f32 %v2528_v57, %v9140_v50  ;;  %v2530_v9 = vpop.f32.mrb[98].mxu0  ;;  %2659 = vmatprep.subr.bf16.mxu1 %v2604_v16 }
 0x769   : > { %v2531_v63 = vadd.f32 %v2530_v9, %v9141_v25  ;;  %v2532_v7 = vpop.f32.mrb[99].mxu0  ;;  %2660 = vmatpush1.bf16.msra.mxu1 %v2603_v18  ;;  %v2581_v31 = vmax.f32 %v2527_v58, 0.0  ;;  %v9147_v9 = vld [vmem:[#allocation27_spill] sm:$0xff] }
 0x76a   : > { %v2533_v45 = vadd.f32 %v2532_v7, %v9141_v25  ;;  %v2582_v17 = vmax.f32 %v2529_v0, 0.0 }
 0x76b   : > { %v2583_v62 = vmax.f32 %v2531_v63, 0.0 }
 0x76c   : > { %v2584_v34 = vmax.f32 %v2533_v45, 0.0 }
 0x76d   : > { %v2605_v15 = vpack.c.bf16 %v2583_v62, %v2581_v31 }
 0x76e   : > { %v2606_v12 = vpack.c.bf16 %v2584_v34, %v2582_v17  ;;  %v2536_v27 = vpop.f32.mrb[100].mxu0 }
 0x76f   : > { %v2537_v41 = vadd.f32 %v2536_v27, %v9142_v38  ;;  %v2538_v8 = vpop.f32.mrb[101].mxu0  ;;  %v6584_v27 = vld [vmem:[%s8830_s5 + $0x8] sm:$0xff]  }
 0x770   : > { %v2539_v22 = vadd.f32 %v2538_v8, %v9142_v38  ;;  %v2540_v33 = vpop.f32.mrb[102].mxu0  ;;  %2661 = vmatprep.subr.bf16.mxu1 %v2606_v12  ;;  %v6583_v12 = vld [vmem:[%s8830_s5] sm:$0xff]  }
 0x771   : > { %v2541_v43 = vadd.f32 %v2540_v33, %v9143_v54  ;;  %v2542_v55 = vpop.f32.mrb[103].mxu0  ;;  %2662 = vmatpush1.bf16.msra.mxu1 %v2605_v15  ;;  %v2585_v29 = vmax.f32 %v2537_v41, 0.0  ;;  %v9148_v41 = vld [vmem:[#allocation30_spill] sm:$0xff] }
 0x772   : > { %v2543_v6 = vadd.f32 %v2542_v55, %v9143_v54  ;;  %v2586_v4 = vmax.f32 %v2539_v22, 0.0 }
 0x773   : > { %v2587_v51 = vmax.f32 %v2541_v43, 0.0  ;;  %v9149_v43 = vld [vmem:[#allocation29_spill] sm:$0xff] }
 0x774   : > { %v2588_v2 = vmax.f32 %v2543_v6, 0.0 }
 0x775   : > { %v2607_v53 = vpack.c.bf16 %v2587_v51, %v2585_v29 }
 0x776   : > { %v2608_v52 = vpack.c.bf16 %v2588_v2, %v2586_v4  ;;  %v2546_v21 = vpop.f32.mrb[104].mxu0 }
 0x777   : > { %v2547_v59 = vadd.f32 %v2546_v21, %v9144_v30  ;;  %v2548_v40 = vpop.f32.mrb[105].mxu0 }
 0x778   : > { %v2549_v28 = vadd.f32 %v2548_v40, %v9144_v30  ;;  %v2550_v56 = vpop.f32.mrb[106].mxu0  ;;  %2663 = vmatprep.subr.bf16.mxu1 %v2608_v52 }
 0x779   : > { %v2551_v11 = vadd.f32 %v2550_v56, %v9145_v47  ;;  %v2552_v60 = vpop.f32.mrb[107].mxu0  ;;  %2664 = vmatpush1.bf16.msra.mxu1 %v2607_v53  ;;  %v2589_v14 = vmax.f32 %v2547_v59, 0.0  ;;  %v9150_v59 = vld [vmem:[#allocation32_spill] sm:$0xff] }
 0x77a   : > { %v2553_v26 = vadd.f32 %v2552_v60, %v9145_v47  ;;  %v2590_v48 = vmax.f32 %v2549_v28, 0.0 }
 0x77b   : > { %v2591_v24 = vmax.f32 %v2551_v11, 0.0  ;;  %v9151_v11 = vld [vmem:[#allocation31_spill] sm:$0xff] }
 0x77c   : > { %v2592_v35 = vmax.f32 %v2553_v26, 0.0 }
 0x77d   : > { %v2609_v44 = vpack.c.bf16 %v2591_v24, %v2589_v14 }
 0x77e   : > { %v2610_v18 = vpack.c.bf16 %v2592_v35, %v2590_v48  ;;  %v2556_v16 = vpop.f32.mrb[108].mxu0 }
 0x77f   : > { %v2557_v50 = vadd.f32 %v2556_v16, %v9146_v19  ;;  %v2558_v58 = vpop.f32.mrb[109].mxu0 }
 0x780   : > { %v2559_v57 = vadd.f32 %v2558_v58, %v9146_v19  ;;  %v2560_v0 = vpop.f32.mrb[110].mxu0  ;;  %2665 = vmatprep.subr.bf16.mxu1 %v2610_v18  ;;  %v6585_v19 = vld [vmem:[%s8832_s7] sm:$0xff]   ;;  %v6587_v58 = vld [vmem:[%s8832_s7 + $0x10] sm:$0xff]  }
 0x781   : > { %v2561_v25 = vadd.f32 %v2560_v0, %v9147_v9  ;;  %v2562_v63 = vpop.f32.mrb[111].mxu0  ;;  %2666 = vmatpush1.bf16.msra.mxu1 %v2609_v44  ;;  %v2593_v45 = vmax.f32 %v2557_v50, 0.0  ;;  %v6586_v50 = vld [vmem:[%s8832_s7 + $0x8] sm:$0xff]   ;;  %v6589_v0 = vld [vmem:[%s8832_s7 + $0x20] sm:$0xff]  }
 0x782   : > { %v2563_v7 = vadd.f32 %v2562_v63, %v9147_v9  ;;  %v2594_v62 = vmax.f32 %v2559_v57, 0.0  ;;  %v6588_v57 = vld [vmem:[%s8832_s7 + $0x18] sm:$0xff]   ;;  %v6590_v9 = vld [vmem:[%s8832_s7 + $0x28] sm:$0xff]  }
 0x783   : > { %v2595_v31 = vmax.f32 %v2561_v25, 0.0  ;;  %v6591_v25 = vld [vmem:[%s8832_s7 + $0x30] sm:$0xff]   ;;  %v6592_v63 = vld [vmem:[%s8832_s7 + $0x38] sm:$0xff]  }
 0x784   : > { %v2596_v17 = vmax.f32 %v2563_v7, 0.0 }
 0x785   : > { %v2611_v34 = vpack.c.bf16 %v2595_v31, %v2593_v45  ;;  %v9152_v45 = vld [vmem:[#allocation34_spill] sm:$0xff] }
 0x786   : > { %v2612_v15 = vpack.c.bf16 %v2596_v17, %v2594_v62 }
 0x788   : > { %2667 = vmatprep.subr.bf16.mxu1 %v2612_v15  ;;  %v9153_v15 = vld [vmem:[#allocation33_spill] sm:$0xff] }
 0x789   : > { %2668 = vmatpush1.bf16.msra.mxu1 %v2611_v34 }
 0x78c   : > { %2686 = vmatmul.mubr.bf16.vlgmr.msra.gmra.mrb[80].mxu1 %v6583_v12 }
 0x78d   : > { %2695 = vmatprep.mubr.bf16.mxu1 %v8999_v10 }
 0x794   : > { %2696 = vmatmul.mubr.bf16.gmra.mrb[84].mxu1 %v6584_v27 }
 0x795   : > { %2927 = vmatprep.mubr.bf16.mxu1 %v8999_v10 }
 0x85f   : > { %v2687_v38 = vpop.f32.mrb[80].mxu1 }
 0x860   : > { %v2688_v8 = vadd.f32 %v2687_v38, %v9148_v41  ;;  %v2689_v22 = vpop.f32.mrb[81].mxu1 }
 0x861   : > { %v2690_v33 = vadd.f32 %v2689_v22, %v9148_v41  ;;  %v2691_v54 = vpop.f32.mrb[82].mxu1 }
 0x862   : > { %v2692_v55 = vadd.f32 %v2691_v54, %v9149_v43  ;;  %v2693_v6 = vpop.f32.mrb[83].mxu1  ;;  %v2706_v51 = vmax.f32 %v2688_v8, 0.0 }
 0x863   : > { %v2694_v29 = vadd.f32 %v2693_v6, %v9149_v43  ;;  %v2707_v2 = vmax.f32 %v2690_v33, 0.0  ;;  %v9154_v6 = vld [vmem:[#allocation36_spill] sm:$0xff] }
 0x864   : > { %v2708_v4 = vmax.f32 %v2692_v55, 0.0 }
 0x865   : > { %v2709_v53 = vmax.f32 %v2694_v29, 0.0 }
 0x866   : > { %v2714_v52 = vpack.c.bf16 %v2708_v4, %v2706_v51 }
 0x867   : > { %v2715_v21 = vpack.c.bf16 %v2709_v53, %v2707_v2  ;;  %v2697_v30 = vpop.f32.mrb[84].mxu1  ;;  %v9155_v53 = vld [vmem:[#allocation35_spill] sm:$0xff] }
 0x868   : > { %v2698_v40 = vadd.f32 %v2697_v30, %v9150_v59  ;;  %v2699_v28 = vpop.f32.mrb[85].mxu1 }
 0x869   : > { %v2700_v56 = vadd.f32 %v2699_v28, %v9150_v59  ;;  %v2701_v47 = vpop.f32.mrb[86].mxu1  ;;  %2895 = vmatprep.subr.bf16.mxu1 %v2715_v21 }
 0x86a   : > { %v2702_v60 = vadd.f32 %v2701_v47, %v9151_v11  ;;  %v2703_v26 = vpop.f32.mrb[87].mxu1  ;;  %2896 = vmatpush1.bf16.msra.mxu1 %v2714_v52  ;;  %v2710_v24 = vmax.f32 %v2698_v40, 0.0 }
 0x86b   : > { %v2704_v14 = vadd.f32 %v2703_v26, %v9151_v11  ;;  %v2711_v35 = vmax.f32 %v2700_v56, 0.0  ;;  %v9156_v26 = vld [vmem:[#allocation38_spill] sm:$0xff] }
 0x86c   : > { %v2712_v48 = vmax.f32 %v2702_v60, 0.0 }
 0x86d   : > { %v2713_v44 = vmax.f32 %v2704_v14, 0.0 }
 0x86e   : > { %v2716_v18 = vpack.c.bf16 %v2712_v48, %v2710_v24 }
 0x86f   : > { %v2717_v16 = vpack.c.bf16 %v2713_v44, %v2711_v35  ;;  %v9157_v44 = vld [vmem:[#allocation37_spill] sm:$0xff] }
 0x871   : > { %2897 = vmatprep.subr.bf16.mxu1 %v2717_v16 }
 0x872   : > { %2898 = vmatpush1.bf16.msra.mxu1 %v2716_v18 }
 0x875   : > { %6167 = vmatmul.mubr.msk.bf16.vlgmr.msra.gmra.mrb[88].mxu1 %vm1080_vm2, %v6585_v19 }
 0x876   : > { %2937 = vmatprep.mubr.bf16.mxu1 %v8999_v10 }
 0x87d   : > { %6168 = vmatmul.mubr.msk.bf16.gmra.mrb[92].mxu1 %vm1080_vm2, %v6586_v50 }
 0x87e   : > { %2947 = vmatprep.mubr.bf16.mxu1 %v8999_v10 }
 0x885   : > { %6169 = vmatmul.mubr.msk.bf16.gmra.mrb[96].mxu1 %vm1080_vm2, %v6587_v58 }
 0x886   : > { %2957 = vmatprep.mubr.bf16.mxu1 %v8999_v10 }
 0x88d   : > { %6170 = vmatmul.mubr.msk.bf16.gmra.mrb[100].mxu1 %vm1080_vm2, %v6588_v57 }
 0x88e   : > { %2967 = vmatprep.mubr.bf16.mxu1 %v8999_v10 }
 0x895   : > { %6171 = vmatmul.mubr.msk.bf16.gmra.mrb[104].mxu1 %vm1080_vm2, %v6589_v0 }
 0x896   : > { %2977 = vmatprep.mubr.bf16.mxu1 %v8999_v10 }
 0x89d   : > { %6172 = vmatmul.mubr.msk.bf16.gmra.mrb[108].mxu1 %vm1080_vm2, %v6590_v9 }
 0x89e   : > { %2987 = vmatprep.mubr.bf16.mxu1 %v8999_v10 }
 0x8a5   : > { %6173 = vmatmul.mubr.msk.bf16.gmra.mrb[112].mxu1 %vm1080_vm2, %v6591_v25 }
 0x8a6   : > { %2997 = vmatprep.mubr.bf16.mxu1 %v8999_v10 }
 0x8ad   : > { %6174 = vmatmul.mubr.msk.bf16.gmra.mrb[116].mxu1 %vm1080_vm2, %v6592_v63 }
 0x8ae   : > { %3578 = vmatprep.mubr.bf16.mxu1 %v8999_v10 }
 0x948   : > { %v2929_v7 = vpop.f32.mrb[88].mxu1 }
 0x949   : > { %v2930_v31 = vadd.f32 %v2929_v7, %v9152_v45  ;;  %v2931_v62 = vpop.f32.mrb[89].mxu1  ;;  %v9158_v7 = vld [vmem:[#allocation40_spill] sm:$0xff] }
 0x94a   : > { %v2932_v17 = vadd.f32 %v2931_v62, %v9152_v45  ;;  %v2933_v34 = vpop.f32.mrb[90].mxu1 }
 0x94b   : > { %v2934_v12 = vadd.f32 %v2933_v34, %v9153_v15  ;;  %v2935_v27 = vpop.f32.mrb[91].mxu1  ;;  %v3008_v41 = vmax.f32 %v2930_v31, 0.0  ;;  %v9159_v34 = vld [vmem:[#allocation39_spill] sm:$0xff] }
 0x94c   : > { %v2936_v38 = vadd.f32 %v2935_v27, %v9153_v15  ;;  %v3009_v22 = vmax.f32 %v2932_v17, 0.0 }
 0x94d   : > { %v3010_v8 = vmax.f32 %v2934_v12, 0.0 }
 0x94e   : > { %v3011_v33 = vmax.f32 %v2936_v38, 0.0 }
 0x94f   : > { %v3040_v54 = vpack.c.bf16 %v3010_v8, %v3008_v41 }
 0x950   : > { %v3041_v43 = vpack.c.bf16 %v3011_v33, %v3009_v22  ;;  %v2939_v55 = vpop.f32.mrb[92].mxu1 }
 0x951   : > { %v2940_v29 = vadd.f32 %v2939_v55, %v9154_v6  ;;  %v2941_v51 = vpop.f32.mrb[93].mxu1  ;;  %v9160_v55 = vld [vmem:[#allocation42_spill] sm:$0xff] }
 0x952   : > { %v2942_v4 = vadd.f32 %v2941_v51, %v9154_v6  ;;  %v2943_v2 = vpop.f32.mrb[94].mxu1  ;;  %3096 = vmatprep.subr.bf16.mxu0 %v3041_v43 }
 0x953   : > { %v2944_v52 = vadd.f32 %v2943_v2, %v9155_v53  ;;  %v2945_v21 = vpop.f32.mrb[95].mxu1  ;;  %3097 = vmatpush1.bf16.msra.mxu0 %v3040_v54  ;;  %v3012_v59 = vmax.f32 %v2940_v29, 0.0  ;;  %v9161_v2 = vld [vmem:[#allocation41_spill] sm:$0xff] }
 0x954   : > { %v2946_v30 = vadd.f32 %v2945_v21, %v9155_v53  ;;  %v3013_v28 = vmax.f32 %v2942_v4, 0.0 }
 0x955   : > { %v3014_v40 = vmax.f32 %v2944_v52, 0.0 }
 0x956   : > { %v3015_v56 = vmax.f32 %v2946_v30, 0.0 }
 0x957   : > { %v3042_v47 = vpack.c.bf16 %v3014_v40, %v3012_v59 }
 0x958   : > { %v3043_v11 = vpack.c.bf16 %v3015_v56, %v3013_v28  ;;  %v2949_v60 = vpop.f32.mrb[96].mxu1 }
 0x959   : > { %v2950_v14 = vadd.f32 %v2949_v60, %v9156_v26  ;;  %v2951_v24 = vpop.f32.mrb[97].mxu1  ;;  %v9162_v60 = vld [vmem:[#allocation44_spill] sm:$0xff] }
 0x95a   : > { %v2952_v48 = vadd.f32 %v2951_v24, %v9156_v26  ;;  %v2953_v35 = vpop.f32.mrb[98].mxu1  ;;  %3098 = vmatprep.subr.bf16.mxu0 %v3043_v11 }
 0x95b   : > { %v2954_v18 = vadd.f32 %v2953_v35, %v9157_v44  ;;  %v2955_v16 = vpop.f32.mrb[99].mxu1  ;;  %3099 = vmatpush1.bf16.msra.mxu0 %v3042_v47  ;;  %v3016_v50 = vmax.f32 %v2950_v14, 0.0  ;;  %v9163_v35 = vld [vmem:[#allocation43_spill] sm:$0xff] }
 0x95c   : > { %v2956_v19 = vadd.f32 %v2955_v16, %v9157_v44  ;;  %v3017_v57 = vmax.f32 %v2952_v48, 0.0 }
 0x95d   : > { %v3018_v58 = vmax.f32 %v2954_v18, 0.0 }
 0x95e   : > { %v3019_v0 = vmax.f32 %v2956_v19, 0.0 }
 0x95f   : > { %v3044_v9 = vpack.c.bf16 %v3018_v58, %v3016_v50 }
 0x960   : > { %v3045_v25 = vpack.c.bf16 %v3019_v0, %v3017_v57  ;;  %v2959_v63 = vpop.f32.mrb[100].mxu1 }
 0x961   : > { %v2960_v45 = vadd.f32 %v2959_v63, %v9158_v7  ;;  %v2961_v31 = vpop.f32.mrb[101].mxu1  ;;  %v9164_v63 = vld [vmem:[#allocation46_spill] sm:$0xff] }
 0x962   : > { %v2962_v62 = vadd.f32 %v2961_v31, %v9158_v7  ;;  %v2963_v17 = vpop.f32.mrb[102].mxu1  ;;  %3100 = vmatprep.subr.bf16.mxu0 %v3045_v25 }
 0x963   : > { %v2964_v15 = vadd.f32 %v2963_v17, %v9159_v34  ;;  %v2965_v12 = vpop.f32.mrb[103].mxu1  ;;  %3101 = vmatpush1.bf16.msra.mxu0 %v3044_v9  ;;  %v3020_v38 = vmax.f32 %v2960_v45, 0.0  ;;  %v9165_v17 = vld [vmem:[#allocation45_spill] sm:$0xff] }
 0x964   : > { %v2966_v27 = vadd.f32 %v2965_v12, %v9159_v34  ;;  %v3021_v8 = vmax.f32 %v2962_v62, 0.0 }
 0x965   : > { %v3022_v41 = vmax.f32 %v2964_v15, 0.0 }
 0x966   : > { %v3023_v22 = vmax.f32 %v2966_v27, 0.0 }
 0x967   : > { %v3046_v33 = vpack.c.bf16 %v3022_v41, %v3020_v38 }
 0x968   : > { %v3047_v54 = vpack.c.bf16 %v3023_v22, %v3021_v8  ;;  %v2969_v43 = vpop.f32.mrb[104].mxu1 }
 0x969   : > { %v2970_v6 = vadd.f32 %v2969_v43, %v9160_v55  ;;  %v2971_v29 = vpop.f32.mrb[105].mxu1  ;;  %v9166_v43 = vld [vmem:[#allocation48_spill] sm:$0xff] }
 0x96a   : > { %v2972_v51 = vadd.f32 %v2971_v29, %v9160_v55  ;;  %v2973_v4 = vpop.f32.mrb[106].mxu1  ;;  %3102 = vmatprep.subr.bf16.mxu0 %v3047_v54 }
 0x96b   : > { %v2974_v53 = vadd.f32 %v2973_v4, %v9161_v2  ;;  %v2975_v52 = vpop.f32.mrb[107].mxu1  ;;  %3103 = vmatpush1.bf16.msra.mxu0 %v3046_v33  ;;  %v3024_v30 = vmax.f32 %v2970_v6, 0.0  ;;  %v9167_v4 = vld [vmem:[#allocation47_spill] sm:$0xff] }
 0x96c   : > { %v2976_v21 = vadd.f32 %v2975_v52, %v9161_v2  ;;  %v3025_v40 = vmax.f32 %v2972_v51, 0.0 }
 0x96d   : > { %v3026_v59 = vmax.f32 %v2974_v53, 0.0 }
 0x96e   : > { %v3027_v28 = vmax.f32 %v2976_v21, 0.0 }
 0x96f   : > { %v3048_v56 = vpack.c.bf16 %v3026_v59, %v3024_v30  ;;  %v6186_v59 = vld [vmem:[%s7743_s30 + $0x18] sm:$0xff] }
 0x970   : > { %v3049_v47 = vpack.c.bf16 %v3027_v28, %v3025_v40  ;;  %v2979_v11 = vpop.f32.mrb[108].mxu1  ;;  %v6185_v40 = vld [vmem:[%s7743_s30 + $0x10] sm:$0xff] }
 0x971   : > { %v2980_v26 = vadd.f32 %v2979_v11, %v9162_v60  ;;  %v2981_v14 = vpop.f32.mrb[109].mxu1 }
 0x972   : > { %v2982_v24 = vadd.f32 %v2981_v14, %v9162_v60  ;;  %v2983_v48 = vpop.f32.mrb[110].mxu1  ;;  %3104 = vmatprep.subr.bf16.mxu0 %v3049_v47  ;;  %v3162_v60 = vpack.c.bf16 %v6186_v59, %v6186_v59  ;;  %v6593_v14 = vld [vmem:[%s8833_s8] sm:$0xff]  }
 0x973   : > { %v2984_v44 = vadd.f32 %v2983_v48, %v9163_v35  ;;  %v2985_v18 = vpop.f32.mrb[111].mxu1  ;;  %3105 = vmatpush1.bf16.msra.mxu0 %v3048_v56  ;;  %v3028_v19 = vmax.f32 %v2980_v26, 0.0  ;;  %v3161_v26 = vpack.c.bf16 %v6185_v40, %v6185_v40  ;;  %v6594_v48 = vld [vmem:[%s8833_s8 + $0x8] sm:$0xff]  }
 0x974   : > { %v2986_v16 = vadd.f32 %v2985_v18, %v9163_v35  ;;  %v3029_v58 = vmax.f32 %v2982_v24, 0.0  ;;  %v6595_v35 = vld [vmem:[%s8828_s3 + $0x40] sm:$0xff]   ;;  %v6597_v18 = vld [vmem:[%s8828_s3 + $0x50] sm:$0xff]  }
 0x975   : > { %v3030_v50 = vmax.f32 %v2984_v44, 0.0  ;;  %v3340_v24 = vsel %vm655_vm0, %v3161_v26, 0  ;;  %v6596_v44 = vld [vmem:[%s8828_s3 + $0x48] sm:$0xff]   ;;  %v9170_v26 = vld [vmem:[#allocation52_spill] sm:$0xff] }
 0x976   : > { %v3031_v57 = vmax.f32 %v2986_v16, 0.0  ;;  %v6598_v16 = vld [vmem:[%s8828_s3 + $0x58] sm:$0xff]  }
 0x977   : > { %v3050_v0 = vpack.c.bf16 %v3030_v50, %v3028_v19  ;;  %v6599_v19 = vld [vmem:[%s8828_s3 + $0x60] sm:$0xff]   ;;  %v6600_v50 = vld [vmem:[%s8828_s3 + $0x68] sm:$0xff]  }
 0x978   : > { %v3051_v9 = vpack.c.bf16 %v3031_v57, %v3029_v58  ;;  %v2989_v25 = vpop.f32.mrb[112].mxu1  ;;  %v6601_v58 = vld [vmem:[%s8828_s3 + $0x70] sm:$0xff]   ;;  %v6602_v57 = vld [vmem:[%s8828_s3 + $0x78] sm:$0xff]  }
 0x979   : > { %v2990_v7 = vadd.f32 %v2989_v25, %v9164_v63  ;;  %v2991_v45 = vpop.f32.mrb[113].mxu1 }
 0x97a   : > { %v2992_v31 = vadd.f32 %v2991_v45, %v9164_v63  ;;  %v2993_v62 = vpop.f32.mrb[114].mxu1  ;;  %3106 = vmatprep.subr.bf16.mxu0 %v3051_v9 }
 0x97b   : > { %v2994_v34 = vadd.f32 %v2993_v62, %v9165_v17  ;;  %v2995_v15 = vpop.f32.mrb[115].mxu1  ;;  %3107 = vmatpush1.bf16.msra.mxu0 %v3050_v0  ;;  %v3032_v27 = vmax.f32 %v2990_v7, 0.0  ;;  %v3067_v0 = vpop.permute.xlu0 %3066 }
 0x97c   : > { %v2996_v12 = vadd.f32 %v2995_v15, %v9165_v17  ;;  %v3033_v41 = vmax.f32 %v2992_v31, 0.0  ;;  %v3072_v7 = vpop.permute.xlu1 %3071 }
 0x97d   : > { %v3034_v38 = vmax.f32 %v2994_v34, 0.0 }
 0x97e   : > { %v3035_v8 = vmax.f32 %v2996_v12, 0.0 }
 0x97f   : > { %v3052_v22 = vpack.c.bf16 %v3034_v38, %v3032_v27  ;;  %v3077_v15 = vpop.permute.xlu0 %3076 }
 0x980   : > { %v3053_v33 = vpack.c.bf16 %v3035_v8, %v3033_v41  ;;  %v2999_v54 = vpop.f32.mrb[116].mxu1  ;;  %v3082_v41 = vpop.permute.xlu1 %3081 }
 0x981   : > { %v3000_v55 = vadd.f32 %v2999_v54, %v9166_v43  ;;  %v3001_v6 = vpop.f32.mrb[117].mxu1 }
 0x982   : > { %v3002_v29 = vadd.f32 %v3001_v6, %v9166_v43  ;;  %v3003_v51 = vpop.f32.mrb[118].mxu1  ;;  %3108 = vmatprep.subr.bf16.mxu0 %v3053_v33  ;;  %v9168_v6 = vld [vmem:[#allocation50_spill] sm:$0xff] }
 0x983   : > { %v3004_v2 = vadd.f32 %v3003_v51, %v9167_v4  ;;  %v3005_v53 = vpop.f32.mrb[119].mxu1  ;;  %3109 = vmatpush1.bf16.msra.mxu0 %v3052_v22  ;;  %v3036_v21 = vmax.f32 %v3000_v55, 0.0 }
 0x984   : > { %v3006_v52 = vadd.f32 %v3005_v53, %v9167_v4  ;;  %v3037_v28 = vmax.f32 %v3002_v29, 0.0  ;;  %v9169_v53 = vld [vmem:[#allocation49_spill] sm:$0xff] }
 0x985   : > { %v3038_v30 = vmax.f32 %v3004_v2, 0.0 }
 0x986   : > { %v3039_v56 = vmax.f32 %v3006_v52, 0.0 }
 0x987   : > { %v3054_v47 = vpack.c.bf16 %v3038_v30, %v3036_v21 }
 0x988   : > { %v3055_v11 = vpack.c.bf16 %v3039_v56, %v3037_v28 }
 0x98a   : > { %3110 = vmatprep.subr.bf16.mxu0 %v3055_v11 }
 0x98b   : > { %3111 = vmatpush1.bf16.msra.mxu0 %v3054_v47 }
 0x98c   : > { %6227 = vmatprep.subr.msk.bf16.mxu0 %vm655_vm0, %v3162_v60 }
 0x98e   : > { %3129 = vmatmul.mubr.bf16.vlgmr.msra.gmra.mrb[112].mxu0 %v6593_v14 }
 0x98f   : > { %3346 = vmatpush1.bf16.msra.mxu0 %v3340_v24  ;;  %3138 = vmatprep.mubr.bf16.mxu0 %v8999_v10 }
 0x996   : > { %3139 = vmatmul.mubr.bf16.gmra.mrb[116].mxu0 %v6594_v48 }
 0x997   : > { %3377 = vmatprep.mubr.bf16.mxu0 %v8999_v10 }
 0x99e   : > { %6228 = vmatmul.mubr.msk.bf16.vlgmr.msra.gmra.mrb[120].mxu0 %vm630_vm1, %v6595_v35 }
 0x99f   : > { %3387 = vmatprep.mubr.bf16.mxu0 %v8999_v10 }
 0x9a6   : > { %6229 = vmatmul.mubr.msk.bf16.gmra.mrb[124].mxu0 %vm630_vm1, %v6596_v44  ;;  %v9171_v44 = vld [vmem:[#allocation51_spill] sm:$0xff] }
 0x9a7   : > { %3397 = vmatprep.mubr.bf16.mxu0 %v8999_v10 }
 0x9ae   : > { %6230 = vmatmul.mubr.msk.bf16.gmra.mrb[128].mxu0 %vm630_vm1, %v6597_v18 }
 0x9af   : > { %3407 = vmatprep.mubr.bf16.mxu0 %v8999_v10 }
 0x9b6   : > { %6231 = vmatmul.mubr.msk.bf16.gmra.mrb[132].mxu0 %vm630_vm1, %v6598_v16 }
 0x9b7   : > { %3417 = vmatprep.mubr.bf16.mxu0 %v8999_v10 }
 0x9be   : > { %6232 = vmatmul.mubr.msk.bf16.gmra.mrb[136].mxu0 %vm630_vm1, %v6599_v19 }
 0x9bf   : > { %3427 = vmatprep.mubr.bf16.mxu0 %v8999_v10 }
 0x9c6   : > { %6233 = vmatmul.mubr.msk.bf16.gmra.mrb[140].mxu0 %vm630_vm1, %v6600_v50 }
 0x9c7   : > { %3437 = vmatprep.mubr.bf16.mxu0 %v8999_v10 }
 0x9ce   : > { %6234 = vmatmul.mubr.msk.bf16.gmra.mrb[144].mxu0 %vm630_vm1, %v6601_v58 }
 0x9cf   : > { %3447 = vmatprep.mubr.bf16.mxu0 %v8999_v10 }
 0x9d6   : > { %6235 = vmatmul.mubr.msk.bf16.gmra.mrb[148].mxu0 %vm630_vm1, %v6602_v57 }
 0x9d7   : > { %4021 = vmatprep.mubr.bf16.mxu0 %v8999_v10 }
 0xa61   : > { %v3130_v9 = vpop.f32.mrb[112].mxu0 }
 0xa62   : > { %v3131_v25 = vadd.f32 %v3130_v9, %v3067_v0  ;;  %v3132_v63 = vpop.f32.mrb[113].mxu0 }
 0xa63   : > { %v3133_v45 = vadd.f32 %v3132_v63, %v3067_v0  ;;  %v3134_v31 = vpop.f32.mrb[114].mxu0 }
 0xa64   : > { %6177 = vst [vmem:[%s7952_s18 + $0x80] sm:$0xff] %v3131_v25  ;;  %v3135_v62 = vadd.f32 %v3134_v31, %v3072_v7  ;;  %v3136_v17 = vpop.f32.mrb[115].mxu0 }
 0xa65   : > { %6178 = vst [vmem:[%s7952_s18 + $0x88] sm:$0xff] %v3133_v45  ;;  %v3137_v34 = vadd.f32 %v3136_v17, %v3072_v7  ;;  %v9172_v7 = vld [vmem:[#allocation54_spill] sm:$0xff] }
 0xa66   : > { %6179 = vst [vmem:[%s7952_s18 + $0x90] sm:$0xff] %v3135_v62 }
 0xa67   : > { %6180 = vst [vmem:[%s7952_s18 + $0x98] sm:$0xff] %v3137_v34  ;;  %v9173_v34 = vld [vmem:[#allocation53_spill] sm:$0xff] }
 0xa69   : > { %v3140_v12 = vpop.f32.mrb[116].mxu0 }
 0xa6a   : > { %v3141_v27 = vadd.f32 %v3140_v12, %v3077_v15  ;;  %v3142_v38 = vpop.f32.mrb[117].mxu0 }
 0xa6b   : > { %v3143_v8 = vadd.f32 %v3142_v38, %v3077_v15  ;;  %v3144_v22 = vpop.f32.mrb[118].mxu0 }
 0xa6c   : > { %6181 = vst [vmem:[%s7952_s18 + $0xa0] sm:$0xff] %v3141_v27  ;;  %v3145_v33 = vadd.f32 %v3144_v22, %v3082_v41  ;;  %v3146_v54 = vpop.f32.mrb[119].mxu0 }
 0xa6d   : > { %6182 = vst [vmem:[%s7952_s18 + $0xa8] sm:$0xff] %v3143_v8  ;;  %v3147_v43 = vadd.f32 %v3146_v54, %v3082_v41 }
 0xa6e   : > { %6183 = vst [vmem:[%s7952_s18 + $0xb0] sm:$0xff] %v3145_v33 }
 0xa6f   : > { %6184 = vst [vmem:[%s7952_s18 + $0xb8] sm:$0xff] %v3147_v43 }
 0xa71   : > { %v3379_v55 = vpop.f32.mrb[120].mxu0 }
 0xa72   : > { %v3380_v29 = vadd.f32 %v3379_v55, %v9168_v6  ;;  %v3381_v51 = vpop.f32.mrb[121].mxu0  ;;  %v9174_v55 = vld [vmem:[#allocation56_spill] sm:$0xff] }
 0xa73   : > { %v3382_v4 = vadd.f32 %v3381_v51, %v9168_v6  ;;  %v3383_v2 = vpop.f32.mrb[122].mxu0 }
 0xa74   : > { %v3384_v52 = vadd.f32 %v3383_v2, %v9169_v53  ;;  %v3385_v21 = vpop.f32.mrb[123].mxu0  ;;  %v3458_v59 = vmax.f32 %v3380_v29, 0.0  ;;  %v9175_v2 = vld [vmem:[#allocation55_spill] sm:$0xff] }
 0xa75   : > { %v3386_v30 = vadd.f32 %v3385_v21, %v9169_v53  ;;  %v3459_v28 = vmax.f32 %v3382_v4, 0.0 }
 0xa76   : > { %v3460_v40 = vmax.f32 %v3384_v52, 0.0 }
 0xa77   : > { %v3461_v56 = vmax.f32 %v3386_v30, 0.0 }
 0xa78   : > { %v3490_v47 = vpack.c.bf16 %v3460_v40, %v3458_v59 }
 0xa79   : > { %v3491_v11 = vpack.c.bf16 %v3461_v56, %v3459_v28  ;;  %v3389_v60 = vpop.f32.mrb[124].mxu0 }
 0xa7a   : > { %v3390_v14 = vadd.f32 %v3389_v60, %v9170_v26  ;;  %v3391_v24 = vpop.f32.mrb[125].mxu0  ;;  %v9176_v60 = vld [vmem:[#allocation58_spill] sm:$0xff] }
 0xa7b   : > { %v3392_v48 = vadd.f32 %v3391_v24, %v9170_v26  ;;  %v3393_v35 = vpop.f32.mrb[126].mxu0  ;;  %3546 = vmatprep.subr.bf16.mxu1 %v3491_v11 }
 0xa7c   : > { %v3394_v18 = vadd.f32 %v3393_v35, %v9171_v44  ;;  %v3395_v16 = vpop.f32.mrb[127].mxu0  ;;  %3547 = vmatpush1.bf16.msra.mxu1 %v3490_v47  ;;  %v3462_v50 = vmax.f32 %v3390_v14, 0.0  ;;  %v9177_v35 = vld [vmem:[#allocation57_spill] sm:$0xff] }
 0xa7d   : > { %v3396_v19 = vadd.f32 %v3395_v16, %v9171_v44  ;;  %v3463_v57 = vmax.f32 %v3392_v48, 0.0 }
 0xa7e   : > { %v3464_v58 = vmax.f32 %v3394_v18, 0.0 }
 0xa7f   : > { %v3465_v0 = vmax.f32 %v3396_v19, 0.0 }
 0xa80   : > { %v3492_v9 = vpack.c.bf16 %v3464_v58, %v3462_v50 }
 0xa81   : > { %v3493_v25 = vpack.c.bf16 %v3465_v0, %v3463_v57  ;;  %v3399_v63 = vpop.f32.mrb[128].mxu0 }
 0xa82   : > { %v3400_v45 = vadd.f32 %v3399_v63, %v9172_v7  ;;  %v3401_v31 = vpop.f32.mrb[129].mxu0  ;;  %v9178_v63 = vld [vmem:[#allocation60_spill] sm:$0xff] }
 0xa83   : > { %v3402_v62 = vadd.f32 %v3401_v31, %v9172_v7  ;;  %v3403_v17 = vpop.f32.mrb[130].mxu0  ;;  %3548 = vmatprep.subr.bf16.mxu1 %v3493_v25 }
 0xa84   : > { %v3404_v15 = vadd.f32 %v3403_v17, %v9173_v34  ;;  %v3405_v12 = vpop.f32.mrb[131].mxu0  ;;  %3549 = vmatpush1.bf16.msra.mxu1 %v3492_v9  ;;  %v3466_v38 = vmax.f32 %v3400_v45, 0.0  ;;  %v9179_v17 = vld [vmem:[#allocation59_spill] sm:$0xff] }
 0xa85   : > { %v3406_v27 = vadd.f32 %v3405_v12, %v9173_v34  ;;  %v3467_v8 = vmax.f32 %v3402_v62, 0.0 }
 0xa86   : > { %v3468_v41 = vmax.f32 %v3404_v15, 0.0 }
 0xa87   : > { %v3469_v22 = vmax.f32 %v3406_v27, 0.0 }
 0xa88   : > { %v3494_v33 = vpack.c.bf16 %v3468_v41, %v3466_v38 }
 0xa89   : > { %v3495_v54 = vpack.c.bf16 %v3469_v22, %v3467_v8  ;;  %v3409_v43 = vpop.f32.mrb[132].mxu0 }
 0xa8a   : > { %v3410_v6 = vadd.f32 %v3409_v43, %v9174_v55  ;;  %v3411_v29 = vpop.f32.mrb[133].mxu0  ;;  %v9180_v43 = vld [vmem:[#allocation62_spill] sm:$0xff] }
 0xa8b   : > { %v3412_v51 = vadd.f32 %v3411_v29, %v9174_v55  ;;  %v3413_v4 = vpop.f32.mrb[134].mxu0  ;;  %3550 = vmatprep.subr.bf16.mxu1 %v3495_v54 }
 0xa8c   : > { %v3414_v53 = vadd.f32 %v3413_v4, %v9175_v2  ;;  %v3415_v52 = vpop.f32.mrb[135].mxu0  ;;  %3551 = vmatpush1.bf16.msra.mxu1 %v3494_v33  ;;  %v3470_v30 = vmax.f32 %v3410_v6, 0.0  ;;  %v9181_v4 = vld [vmem:[#allocation61_spill] sm:$0xff] }
 0xa8d   : > { %v3416_v21 = vadd.f32 %v3415_v52, %v9175_v2  ;;  %v3471_v40 = vmax.f32 %v3412_v51, 0.0 }
 0xa8e   : > { %v3472_v59 = vmax.f32 %v3414_v53, 0.0 }
 0xa8f   : > { %v3473_v28 = vmax.f32 %v3416_v21, 0.0 }
 0xa90   : > { %v3496_v56 = vpack.c.bf16 %v3472_v59, %v3470_v30 }
 0xa91   : > { %v3497_v47 = vpack.c.bf16 %v3473_v28, %v3471_v40  ;;  %v3419_v11 = vpop.f32.mrb[136].mxu0 }
 0xa92   : > { %v3420_v26 = vadd.f32 %v3419_v11, %v9176_v60  ;;  %v3421_v14 = vpop.f32.mrb[137].mxu0  ;;  %v9182_v11 = vld [vmem:[#allocation64_spill] sm:$0xff] }
 0xa93   : > { %v3422_v24 = vadd.f32 %v3421_v14, %v9176_v60  ;;  %v3423_v48 = vpop.f32.mrb[138].mxu0  ;;  %3552 = vmatprep.subr.bf16.mxu1 %v3497_v47 }
 0xa94   : > { %v3424_v44 = vadd.f32 %v3423_v48, %v9177_v35  ;;  %v3425_v18 = vpop.f32.mrb[139].mxu0  ;;  %3553 = vmatpush1.bf16.msra.mxu1 %v3496_v56  ;;  %v3474_v19 = vmax.f32 %v3420_v26, 0.0  ;;  %v9183_v48 = vld [vmem:[#allocation63_spill] sm:$0xff] }
 0xa95   : > { %v3426_v16 = vadd.f32 %v3425_v18, %v9177_v35  ;;  %v3475_v58 = vmax.f32 %v3422_v24, 0.0 }
 0xa96   : > { %v3476_v50 = vmax.f32 %v3424_v44, 0.0 }
 0xa97   : > { %v3477_v57 = vmax.f32 %v3426_v16, 0.0 }
 0xa98   : > { %v3498_v0 = vpack.c.bf16 %v3476_v50, %v3474_v19 }
 0xa99   : > { %v3499_v9 = vpack.c.bf16 %v3477_v57, %v3475_v58  ;;  %v3429_v25 = vpop.f32.mrb[140].mxu0 }
 0xa9a   : > { %v3430_v7 = vadd.f32 %v3429_v25, %v9178_v63  ;;  %v3431_v45 = vpop.f32.mrb[141].mxu0  ;;  %v6604_v25 = vld [vmem:[%s8830_s5 + $0x18] sm:$0xff]  }
 0xa9b   : > { %v3432_v31 = vadd.f32 %v3431_v45, %v9178_v63  ;;  %v3433_v62 = vpop.f32.mrb[142].mxu0  ;;  %3554 = vmatprep.subr.bf16.mxu1 %v3499_v9  ;;  %v6603_v9 = vld [vmem:[%s8830_s5 + $0x10] sm:$0xff]  }
 0xa9c   : > { %v3434_v34 = vadd.f32 %v3433_v62, %v9179_v17  ;;  %v3435_v15 = vpop.f32.mrb[143].mxu0  ;;  %3555 = vmatpush1.bf16.msra.mxu1 %v3498_v0  ;;  %v3478_v27 = vmax.f32 %v3430_v7, 0.0  ;;  %v9184_v7 = vld [vmem:[#allocation66_spill] sm:$0xff] }
 0xa9d   : > { %v3436_v12 = vadd.f32 %v3435_v15, %v9179_v17  ;;  %v3479_v41 = vmax.f32 %v3432_v31, 0.0 }
 0xa9e   : > { %v3480_v38 = vmax.f32 %v3434_v34, 0.0  ;;  %v9185_v34 = vld [vmem:[#allocation65_spill] sm:$0xff] }
 0xa9f   : > { %v3481_v8 = vmax.f32 %v3436_v12, 0.0 }
 0xaa0   : > { %v3500_v22 = vpack.c.bf16 %v3480_v38, %v3478_v27 }
 0xaa1   : > { %v3501_v33 = vpack.c.bf16 %v3481_v8, %v3479_v41  ;;  %v3439_v54 = vpop.f32.mrb[144].mxu0 }
 0xaa2   : > { %v3440_v55 = vadd.f32 %v3439_v54, %v9180_v43  ;;  %v3441_v6 = vpop.f32.mrb[145].mxu0 }
 0xaa3   : > { %v3442_v29 = vadd.f32 %v3441_v6, %v9180_v43  ;;  %v3443_v51 = vpop.f32.mrb[146].mxu0  ;;  %3556 = vmatprep.subr.bf16.mxu1 %v3501_v33 }
 0xaa4   : > { %v3444_v2 = vadd.f32 %v3443_v51, %v9181_v4  ;;  %v3445_v53 = vpop.f32.mrb[147].mxu0  ;;  %3557 = vmatpush1.bf16.msra.mxu1 %v3500_v22  ;;  %v3482_v21 = vmax.f32 %v3440_v55, 0.0  ;;  %v9186_v55 = vld [vmem:[#allocation68_spill] sm:$0xff] }
 0xaa5   : > { %v3446_v52 = vadd.f32 %v3445_v53, %v9181_v4  ;;  %v3483_v59 = vmax.f32 %v3442_v29, 0.0 }
 0xaa6   : > { %v3484_v30 = vmax.f32 %v3444_v2, 0.0  ;;  %v9187_v2 = vld [vmem:[#allocation67_spill] sm:$0xff] }
 0xaa7   : > { %v3485_v40 = vmax.f32 %v3446_v52, 0.0 }
 0xaa8   : > { %v3502_v28 = vpack.c.bf16 %v3484_v30, %v3482_v21 }
 0xaa9   : > { %v3503_v56 = vpack.c.bf16 %v3485_v40, %v3483_v59  ;;  %v3449_v47 = vpop.f32.mrb[148].mxu0 }
 0xaaa   : > { %v3450_v60 = vadd.f32 %v3449_v47, %v9182_v11  ;;  %v3451_v26 = vpop.f32.mrb[149].mxu0 }
 0xaab   : > { %v3452_v14 = vadd.f32 %v3451_v26, %v9182_v11  ;;  %v3453_v24 = vpop.f32.mrb[150].mxu0  ;;  %3558 = vmatprep.subr.bf16.mxu1 %v3503_v56  ;;  %v6605_v11 = vld [vmem:[%s8832_s7 + $0x40] sm:$0xff]   ;;  %v6607_v26 = vld [vmem:[%s8832_s7 + $0x50] sm:$0xff]  }
 0xaac   : > { %v3454_v35 = vadd.f32 %v3453_v24, %v9183_v48  ;;  %v3455_v44 = vpop.f32.mrb[151].mxu0  ;;  %3559 = vmatpush1.bf16.msra.mxu1 %v3502_v28  ;;  %v3486_v16 = vmax.f32 %v3450_v60, 0.0  ;;  %v6606_v60 = vld [vmem:[%s8832_s7 + $0x48] sm:$0xff]   ;;  %v6609_v24 = vld [vmem:[%s8832_s7 + $0x60] sm:$0xff]  }
 0xaad   : > { %v3456_v18 = vadd.f32 %v3455_v44, %v9183_v48  ;;  %v3487_v50 = vmax.f32 %v3452_v14, 0.0  ;;  %v6608_v14 = vld [vmem:[%s8832_s7 + $0x58] sm:$0xff]   ;;  %v6610_v48 = vld [vmem:[%s8832_s7 + $0x68] sm:$0xff]  }
 0xaae   : > { %v3488_v19 = vmax.f32 %v3454_v35, 0.0  ;;  %v6611_v35 = vld [vmem:[%s8832_s7 + $0x70] sm:$0xff]   ;;  %v6612_v44 = vld [vmem:[%s8832_s7 + $0x78] sm:$0xff]  }
 0xaaf   : > { %v3489_v58 = vmax.f32 %v3456_v18, 0.0 }
 0xab0   : > { %v3504_v57 = vpack.c.bf16 %v3488_v19, %v3486_v16  ;;  %v9188_v16 = vld [vmem:[#allocation70_spill] sm:$0xff] }
 0xab1   : > { %v3505_v0 = vpack.c.bf16 %v3489_v58, %v3487_v50 }
 0xab3   : > { %3560 = vmatprep.subr.bf16.mxu1 %v3505_v0  ;;  %v9189_v0 = vld [vmem:[#allocation69_spill] sm:$0xff] }
 0xab4   : > { %3561 = vmatpush1.bf16.msra.mxu1 %v3504_v57 }
 0xab7   : > { %3579 = vmatmul.mubr.bf16.vlgmr.msra.gmra.mrb[120].mxu1 %v6603_v9 }
 0xab8   : > { %3588 = vmatprep.mubr.bf16.mxu1 %v8999_v10 }
 0xabf   : > { %3589 = vmatmul.mubr.bf16.gmra.mrb[124].mxu1 %v6604_v25 }
 0xac0   : > { %3820 = vmatprep.mubr.bf16.mxu1 %v8999_v10 }
 0xb8a   : > { %v3580_v63 = vpop.f32.mrb[120].mxu1 }
 0xb8b   : > { %v3581_v45 = vadd.f32 %v3580_v63, %v9184_v7  ;;  %v3582_v31 = vpop.f32.mrb[121].mxu1 }
 0xb8c   : > { %v3583_v62 = vadd.f32 %v3582_v31, %v9184_v7  ;;  %v3584_v17 = vpop.f32.mrb[122].mxu1 }
 0xb8d   : > { %v3585_v15 = vadd.f32 %v3584_v17, %v9185_v34  ;;  %v3586_v12 = vpop.f32.mrb[123].mxu1  ;;  %v3599_v38 = vmax.f32 %v3581_v45, 0.0 }
 0xb8e   : > { %v3587_v27 = vadd.f32 %v3586_v12, %v9185_v34  ;;  %v3600_v8 = vmax.f32 %v3583_v62, 0.0  ;;  %v9190_v12 = vld [vmem:[#allocation72_spill] sm:$0xff] }
 0xb8f   : > { %v3601_v41 = vmax.f32 %v3585_v15, 0.0 }
 0xb90   : > { %v3602_v22 = vmax.f32 %v3587_v27, 0.0 }
 0xb91   : > { %v3607_v33 = vpack.c.bf16 %v3601_v41, %v3599_v38 }
 0xb92   : > { %v3608_v54 = vpack.c.bf16 %v3602_v22, %v3600_v8  ;;  %v3590_v43 = vpop.f32.mrb[124].mxu1  ;;  %v9191_v22 = vld [vmem:[#allocation71_spill] sm:$0xff] }
 0xb93   : > { %v3591_v6 = vadd.f32 %v3590_v43, %v9186_v55  ;;  %v3592_v29 = vpop.f32.mrb[125].mxu1 }
 0xb94   : > { %v3593_v51 = vadd.f32 %v3592_v29, %v9186_v55  ;;  %v3594_v4 = vpop.f32.mrb[126].mxu1  ;;  %3788 = vmatprep.subr.bf16.mxu1 %v3608_v54 }
 0xb95   : > { %v3595_v53 = vadd.f32 %v3594_v4, %v9187_v2  ;;  %v3596_v52 = vpop.f32.mrb[127].mxu1  ;;  %3789 = vmatpush1.bf16.msra.mxu1 %v3607_v33  ;;  %v3603_v30 = vmax.f32 %v3591_v6, 0.0 }
 0xb96   : > { %v3597_v21 = vadd.f32 %v3596_v52, %v9187_v2  ;;  %v3604_v40 = vmax.f32 %v3593_v51, 0.0  ;;  %v9192_v52 = vld [vmem:[#allocation74_spill] sm:$0xff] }
 0xb97   : > { %v3605_v59 = vmax.f32 %v3595_v53, 0.0 }
 0xb98   : > { %v3606_v28 = vmax.f32 %v3597_v21, 0.0 }
 0xb99   : > { %v3609_v56 = vpack.c.bf16 %v3605_v59, %v3603_v30 }
 0xb9a   : > { %v3610_v47 = vpack.c.bf16 %v3606_v28, %v3604_v40  ;;  %v9193_v28 = vld [vmem:[#allocation73_spill] sm:$0xff] }
 0xb9c   : > { %3790 = vmatprep.subr.bf16.mxu1 %v3610_v47 }
 0xb9d   : > { %3791 = vmatpush1.bf16.msra.mxu1 %v3609_v56 }
 0xba0   : > { %6286 = vmatmul.mubr.msk.bf16.vlgmr.msra.gmra.mrb[128].mxu1 %vm1080_vm2, %v6605_v11 }
 0xba1   : > { %3830 = vmatprep.mubr.bf16.mxu1 %v8999_v10 }
 0xba8   : > { %6287 = vmatmul.mubr.msk.bf16.gmra.mrb[132].mxu1 %vm1080_vm2, %v6606_v60 }
 0xba9   : > { %3840 = vmatprep.mubr.bf16.mxu1 %v8999_v10 }
 0xbb0   : > { %6288 = vmatmul.mubr.msk.bf16.gmra.mrb[136].mxu1 %vm1080_vm2, %v6607_v26 }
 0xbb1   : > { %3850 = vmatprep.mubr.bf16.mxu1 %v8999_v10 }
 0xbb8   : > { %6289 = vmatmul.mubr.msk.bf16.gmra.mrb[140].mxu1 %vm1080_vm2, %v6608_v14 }
 0xbb9   : > { %3860 = vmatprep.mubr.bf16.mxu1 %v8999_v10 }
 0xbc0   : > { %6290 = vmatmul.mubr.msk.bf16.gmra.mrb[144].mxu1 %vm1080_vm2, %v6609_v24 }
 0xbc1   : > { %3870 = vmatprep.mubr.bf16.mxu1 %v8999_v10 }
 0xbc8   : > { %6291 = vmatmul.mubr.msk.bf16.gmra.mrb[148].mxu1 %vm1080_vm2, %v6610_v48 }
 0xbc9   : > { %3880 = vmatprep.mubr.bf16.mxu1 %v8999_v10 }
 0xbd0   : > { %6292 = vmatmul.mubr.msk.bf16.gmra.mrb[152].mxu1 %vm1080_vm2, %v6611_v35 }
 0xbd1   : > { %3890 = vmatprep.mubr.bf16.mxu1 %v8999_v10 }
 0xbd8   : > { %6293 = vmatmul.mubr.msk.bf16.gmra.mrb[156].mxu1 %vm1080_vm2, %v6612_v44 }
 0xbd9   : > { %4470 = vmatprep.mubr.bf16.mxu1 %v8999_v10 }
 0xc73   : > { %v3822_v18 = vpop.f32.mrb[128].mxu1 }
 0xc74   : > { %v3823_v19 = vadd.f32 %v3822_v18, %v9188_v16  ;;  %v3824_v50 = vpop.f32.mrb[129].mxu1  ;;  %v9194_v18 = vld [vmem:[#allocation76_spill] sm:$0xff] }
 0xc75   : > { %v3825_v58 = vadd.f32 %v3824_v50, %v9188_v16  ;;  %v3826_v57 = vpop.f32.mrb[130].mxu1 }
 0xc76   : > { %v3827_v9 = vadd.f32 %v3826_v57, %v9189_v0  ;;  %v3828_v25 = vpop.f32.mrb[131].mxu1  ;;  %v3901_v7 = vmax.f32 %v3823_v19, 0.0  ;;  %v9195_v57 = vld [vmem:[#allocation75_spill] sm:$0xff] }
 0xc77   : > { %v3829_v63 = vadd.f32 %v3828_v25, %v9189_v0  ;;  %v3902_v31 = vmax.f32 %v3825_v58, 0.0 }
 0xc78   : > { %v3903_v45 = vmax.f32 %v3827_v9, 0.0 }
 0xc79   : > { %v3904_v62 = vmax.f32 %v3829_v63, 0.0 }
 0xc7a   : > { %v3933_v17 = vpack.c.bf16 %v3903_v45, %v3901_v7 }
 0xc7b   : > { %v3934_v34 = vpack.c.bf16 %v3904_v62, %v3902_v31  ;;  %v3832_v15 = vpop.f32.mrb[132].mxu1 }
 0xc7c   : > { %v3833_v27 = vadd.f32 %v3832_v15, %v9190_v12  ;;  %v3834_v38 = vpop.f32.mrb[133].mxu1  ;;  %v9196_v15 = vld [vmem:[#allocation78_spill] sm:$0xff] }
 0xc7d   : > { %v3835_v41 = vadd.f32 %v3834_v38, %v9190_v12  ;;  %v3836_v8 = vpop.f32.mrb[134].mxu1  ;;  %3989 = vmatprep.subr.bf16.mxu0 %v3934_v34 }
 0xc7e   : > { %v3837_v33 = vadd.f32 %v3836_v8, %v9191_v22  ;;  %v3838_v54 = vpop.f32.mrb[135].mxu1  ;;  %3990 = vmatpush1.bf16.msra.mxu0 %v3933_v17  ;;  %v3905_v55 = vmax.f32 %v3833_v27, 0.0  ;;  %v9197_v8 = vld [vmem:[#allocation77_spill] sm:$0xff] }
 0xc7f   : > { %v3839_v43 = vadd.f32 %v3838_v54, %v9191_v22  ;;  %v3906_v29 = vmax.f32 %v3835_v41, 0.0 }
 0xc80   : > { %v3907_v6 = vmax.f32 %v3837_v33, 0.0 }
 0xc81   : > { %v3908_v51 = vmax.f32 %v3839_v43, 0.0 }
 0xc82   : > { %v3935_v4 = vpack.c.bf16 %v3907_v6, %v3905_v55 }
 0xc83   : > { %v3936_v2 = vpack.c.bf16 %v3908_v51, %v3906_v29  ;;  %v3842_v53 = vpop.f32.mrb[136].mxu1 }
 0xc84   : > { %v3843_v21 = vadd.f32 %v3842_v53, %v9192_v52  ;;  %v3844_v30 = vpop.f32.mrb[137].mxu1  ;;  %v9198_v53 = vld [vmem:[#allocation80_spill] sm:$0xff] }
 0xc85   : > { %v3845_v59 = vadd.f32 %v3844_v30, %v9192_v52  ;;  %v3846_v40 = vpop.f32.mrb[138].mxu1  ;;  %3991 = vmatprep.subr.bf16.mxu0 %v3936_v2 }
 0xc86   : > { %v3847_v56 = vadd.f32 %v3846_v40, %v9193_v28  ;;  %v3848_v47 = vpop.f32.mrb[139].mxu1  ;;  %3992 = vmatpush1.bf16.msra.mxu0 %v3935_v4  ;;  %v3909_v60 = vmax.f32 %v3843_v21, 0.0  ;;  %v9199_v40 = vld [vmem:[#allocation79_spill] sm:$0xff] }
 0xc87   : > { %v3849_v11 = vadd.f32 %v3848_v47, %v9193_v28  ;;  %v3910_v14 = vmax.f32 %v3845_v59, 0.0 }
 0xc88   : > { %v3911_v26 = vmax.f32 %v3847_v56, 0.0 }
 0xc89   : > { %v3912_v24 = vmax.f32 %v3849_v11, 0.0 }
 0xc8a   : > { %v3937_v48 = vpack.c.bf16 %v3911_v26, %v3909_v60 }
 0xc8b   : > { %v3938_v35 = vpack.c.bf16 %v3912_v24, %v3910_v14  ;;  %v3852_v44 = vpop.f32.mrb[140].mxu1 }
 0xc8c   : > { %v3853_v16 = vadd.f32 %v3852_v44, %v9194_v18  ;;  %v3854_v19 = vpop.f32.mrb[141].mxu1  ;;  %v9200_v44 = vld [vmem:[#allocation82_spill] sm:$0xff] }
 0xc8d   : > { %v3855_v50 = vadd.f32 %v3854_v19, %v9194_v18  ;;  %v3856_v58 = vpop.f32.mrb[142].mxu1  ;;  %3993 = vmatprep.subr.bf16.mxu0 %v3938_v35 }
 0xc8e   : > { %v3857_v0 = vadd.f32 %v3856_v58, %v9195_v57  ;;  %v3858_v9 = vpop.f32.mrb[143].mxu1  ;;  %3994 = vmatpush1.bf16.msra.mxu0 %v3937_v48  ;;  %v3913_v63 = vmax.f32 %v3853_v16, 0.0  ;;  %v9201_v58 = vld [vmem:[#allocation81_spill] sm:$0xff] }
 0xc8f   : > { %v3859_v25 = vadd.f32 %v3858_v9, %v9195_v57  ;;  %v3914_v45 = vmax.f32 %v3855_v50, 0.0 }
 0xc90   : > { %v3915_v7 = vmax.f32 %v3857_v0, 0.0 }
 0xc91   : > { %v3916_v31 = vmax.f32 %v3859_v25, 0.0 }
 0xc92   : > { %v3939_v62 = vpack.c.bf16 %v3915_v7, %v3913_v63 }
 0xc93   : > { %v3940_v17 = vpack.c.bf16 %v3916_v31, %v3914_v45  ;;  %v3862_v34 = vpop.f32.mrb[144].mxu1 }
 0xc94   : > { %v3863_v12 = vadd.f32 %v3862_v34, %v9196_v15  ;;  %v3864_v27 = vpop.f32.mrb[145].mxu1 }
 0xc95   : > { %v3865_v38 = vadd.f32 %v3864_v27, %v9196_v15  ;;  %v3866_v41 = vpop.f32.mrb[146].mxu1  ;;  %3995 = vmatprep.subr.bf16.mxu0 %v3940_v17 }
 0xc96   : > { %v3867_v22 = vadd.f32 %v3866_v41, %v9197_v8  ;;  %v3868_v33 = vpop.f32.mrb[147].mxu1  ;;  %3996 = vmatpush1.bf16.msra.mxu0 %v3939_v62  ;;  %v3917_v43 = vmax.f32 %v3863_v12, 0.0 }
 0xc97   : > { %v3869_v54 = vadd.f32 %v3868_v33, %v9197_v8  ;;  %v3918_v6 = vmax.f32 %v3865_v38, 0.0 }
 0xc98   : > { %v3919_v55 = vmax.f32 %v3867_v22, 0.0 }
 0xc99   : > { %v3920_v29 = vmax.f32 %v3869_v54, 0.0  ;;  %v6313_v54 = vld [vmem:[%s6799_s13 + $0x28] sm:$0xff] }
 0xc9a   : > { %v3941_v51 = vpack.c.bf16 %v3919_v55, %v3917_v43  ;;  %v6312_v43 = vld [vmem:[%s6799_s13 + $0x20] sm:$0xff] }
 0xc9b   : > { %v3942_v4 = vpack.c.bf16 %v3920_v29, %v3918_v6  ;;  %v3872_v2 = vpop.f32.mrb[148].mxu1 }
 0xc9c   : > { %v3873_v52 = vadd.f32 %v3872_v2, %v9198_v53  ;;  %v3874_v21 = vpop.f32.mrb[149].mxu1  ;;  %v4053_v2 = vpack.c.bf16 %v6312_v43, %v6312_v43 }
 0xc9d   : > { %v3875_v30 = vadd.f32 %v3874_v21, %v9198_v53  ;;  %v3876_v59 = vpop.f32.mrb[150].mxu1  ;;  %3997 = vmatprep.subr.bf16.mxu0 %v3942_v4  ;;  %v4054_v4 = vpack.c.bf16 %v6313_v54, %v6313_v54  ;;  %v6614_v53 = vld [vmem:[%s8833_s8 + $0x18] sm:$0xff]   ;;  %v6616_v21 = vld [vmem:[%s8828_s3 + $0x8] sm:$0xff]  }
 0xc9e   : > { %v3877_v28 = vadd.f32 %v3876_v59, %v9199_v40  ;;  %v3878_v56 = vpop.f32.mrb[151].mxu1  ;;  %3998 = vmatpush1.bf16.msra.mxu0 %v3941_v51  ;;  %v3921_v11 = vmax.f32 %v3873_v52, 0.0  ;;  %v6615_v52 = vld [vmem:[%s8828_s3] sm:$0xff]   ;;  %v6618_v59 = vld [vmem:[%s8828_s3 + $0x18] sm:$0xff]  }
 0xc9f   : > { %v3879_v47 = vadd.f32 %v3878_v56, %v9199_v40  ;;  %v3922_v26 = vmax.f32 %v3875_v30, 0.0  ;;  %v6617_v30 = vld [vmem:[%s8828_s3 + $0x10] sm:$0xff]   ;;  %v6619_v40 = vld [vmem:[%s8828_s3 + $0x20] sm:$0xff]  }
 0xca0   : > { %v3923_v60 = vmax.f32 %v3877_v28, 0.0  ;;  %v6620_v28 = vld [vmem:[%s8828_s3 + $0x28] sm:$0xff]   ;;  %v6621_v56 = vld [vmem:[%s8828_s3 + $0x30] sm:$0xff]  }
 0xca1   : > { %v3924_v14 = vmax.f32 %v3879_v47, 0.0  ;;  %v6622_v47 = vld [vmem:[%s8828_s3 + $0x38] sm:$0xff]  }
 0xca2   : > { %v3943_v24 = vpack.c.bf16 %v3923_v60, %v3921_v11  ;;  %v3960_v11 = vpop.permute.xlu0 %3959 }
 0xca3   : > { %v3944_v48 = vpack.c.bf16 %v3924_v14, %v3922_v26  ;;  %v3882_v35 = vpop.f32.mrb[152].mxu1 }
 0xca4   : > { %v3883_v18 = vadd.f32 %v3882_v35, %v9200_v44  ;;  %v3884_v16 = vpop.f32.mrb[153].mxu1 }
 0xca5   : > { %v3885_v19 = vadd.f32 %v3884_v16, %v9200_v44  ;;  %v3886_v50 = vpop.f32.mrb[154].mxu1  ;;  %3999 = vmatprep.subr.bf16.mxu0 %v3944_v48 }
 0xca6   : > { %v3887_v57 = vadd.f32 %v3886_v50, %v9201_v58  ;;  %v3888_v0 = vpop.f32.mrb[155].mxu1  ;;  %4000 = vmatpush1.bf16.msra.mxu0 %v3943_v24  ;;  %v3925_v25 = vmax.f32 %v3883_v18, 0.0  ;;  %v3965_v24 = vpop.permute.xlu1 %3964 }
 0xca7   : > { %v3889_v9 = vadd.f32 %v3888_v0, %v9201_v58  ;;  %v3926_v7 = vmax.f32 %v3885_v19, 0.0  ;;  %v3970_v19 = vpop.permute.xlu0 %3969 }
 0xca8   : > { %v3927_v63 = vmax.f32 %v3887_v57, 0.0 }
 0xca9   : > { %v3928_v45 = vmax.f32 %v3889_v9, 0.0 }
 0xcaa   : > { %v3945_v31 = vpack.c.bf16 %v3927_v63, %v3925_v25  ;;  %v3975_v0 = vpop.permute.xlu1 %3974 }
 0xcab   : > { %v3946_v62 = vpack.c.bf16 %v3928_v45, %v3926_v7  ;;  %v3892_v17 = vpop.f32.mrb[156].mxu1 }
 0xcac   : > { %v3893_v34 = vadd.f32 %v3892_v17, %v7746_v5  ;;  %v3894_v15 = vpop.f32.mrb[157].mxu1 }
 0xcad   : > { %v3895_v12 = vadd.f32 %v3894_v15, %v7746_v5  ;;  %v3896_v27 = vpop.f32.mrb[158].mxu1  ;;  %4001 = vmatprep.subr.bf16.mxu0 %v3946_v62  ;;  %v6613_v5 = vld [vmem:[%s8833_s8 + $0x10] sm:$0xff]  }
 0xcae   : > { %v3897_v38 = vadd.f32 %v3896_v27, %v7750_v23  ;;  %v3898_v41 = vpop.f32.mrb[159].mxu1  ;;  %4002 = vmatpush1.bf16.msra.mxu0 %v3945_v31  ;;  %v3929_v22 = vmax.f32 %v3893_v34, 0.0 }
 0xcaf   : > { %v3899_v8 = vadd.f32 %v3898_v41, %v7750_v23  ;;  %v3930_v55 = vmax.f32 %v3895_v12, 0.0  ;;  %v4232_v23 = vsel %vm655_vm0, %v4053_v2, 0 }
 0xcb0   : > { %v3931_v33 = vmax.f32 %v3897_v38, 0.0 }
 0xcb1   : > { %v3932_v6 = vmax.f32 %v3899_v8, 0.0 }
 0xcb2   : > { %v3947_v29 = vpack.c.bf16 %v3931_v33, %v3929_v22 }
 0xcb3   : > { %v3948_v51 = vpack.c.bf16 %v3932_v6, %v3930_v55 }
 0xcb5   : > { %4003 = vmatprep.subr.bf16.mxu0 %v3948_v51 }
 0xcb6   : > { %4004 = vmatpush1.bf16.msra.mxu0 %v3947_v29 }
 0xcb7   : > { %6322 = vmatprep.subr.msk.bf16.mxu0 %vm655_vm0, %v4054_v4 }
 0xcb9   : > { %4022 = vmatmul.mubr.bf16.vlgmr.msra.gmra.mrb[152].mxu0 %v6613_v5 }
 0xcba   : > { %4238 = vmatpush1.bf16.msra.mxu0 %v4232_v23  ;;  %4031 = vmatprep.mubr.bf16.mxu0 %v8999_v10 }
 0xcc1   : > { %4032 = vmatmul.mubr.bf16.gmra.mrb[156].mxu0 %v6614_v53 }
 0xcc2   : > { %4269 = vmatprep.mubr.bf16.mxu0 %v8999_v10 }
 0xcc9   : > { %6323 = vmatmul.mubr.msk.bf16.vlgmr.msra.gmra.mrb[160].mxu0 %vm630_vm1, %v6615_v52 }
 0xcca   : > { %4279 = vmatprep.mubr.bf16.mxu0 %v8999_v10 }
 0xcd1   : > { %6324 = vmatmul.mubr.msk.bf16.gmra.mrb[164].mxu0 %vm630_vm1, %v6616_v21 }
 0xcd2   : > { %4289 = vmatprep.mubr.bf16.mxu0 %v8999_v10 }
 0xcd9   : > { %6325 = vmatmul.mubr.msk.bf16.gmra.mrb[168].mxu0 %vm630_vm1, %v6617_v30 }
 0xcda   : > { %4299 = vmatprep.mubr.bf16.mxu0 %v8999_v10 }
 0xce1   : > { %6326 = vmatmul.mubr.msk.bf16.gmra.mrb[172].mxu0 %vm630_vm1, %v6618_v59 }
 0xce2   : > { %4309 = vmatprep.mubr.bf16.mxu0 %v8999_v10 }
 0xce9   : > { %6327 = vmatmul.mubr.msk.bf16.gmra.mrb[176].mxu0 %vm630_vm1, %v6619_v40 }
 0xcea   : > { %4319 = vmatprep.mubr.bf16.mxu0 %v8999_v10 }
 0xcf1   : > { %6328 = vmatmul.mubr.msk.bf16.gmra.mrb[180].mxu0 %vm630_vm1, %v6620_v28 }
 0xcf2   : > { %4329 = vmatprep.mubr.bf16.mxu0 %v8999_v10 }
 0xcf9   : > { %6329 = vmatmul.mubr.msk.bf16.gmra.mrb[184].mxu0 %vm630_vm1, %v6621_v56 }
 0xcfa   : > { %4339 = vmatprep.mubr.bf16.mxu0 %v8999_v10 }
 0xd01   : > { %6330 = vmatmul.mubr.msk.bf16.gmra.mrb[188].mxu0 %vm630_vm1, %v6622_v47 }
 0xd02   : > { %4913 = vmatprep.mubr.bf16.mxu0 %v8999_v10 }
 0xd8c   : > { %v4023_v60 = vpop.f32.mrb[152].mxu0 }
 0xd8d   : > { %v4024_v26 = vadd.f32 %v4023_v60, %v3960_v11  ;;  %v4025_v14 = vpop.f32.mrb[153].mxu0 }
 0xd8e   : > { %v4026_v48 = vadd.f32 %v4025_v14, %v3960_v11  ;;  %v4027_v35 = vpop.f32.mrb[154].mxu0 }
 0xd8f   : > { %6304 = vst [vmem:[%s7952_s18 + $0xc0] sm:$0xff] %v4024_v26  ;;  %v4028_v44 = vadd.f32 %v4027_v35, %v3965_v24  ;;  %v4029_v18 = vpop.f32.mrb[155].mxu0 }
 0xd90   : > { %6305 = vst [vmem:[%s7952_s18 + $0xc8] sm:$0xff] %v4026_v48  ;;  %v4030_v16 = vadd.f32 %v4029_v18, %v3965_v24 }
 0xd91   : > { %6306 = vst [vmem:[%s7952_s18 + $0xd0] sm:$0xff] %v4028_v44 }
 0xd92   : > { %6307 = vst [vmem:[%s7952_s18 + $0xd8] sm:$0xff] %v4030_v16 }
 0xd94   : > { %v4033_v50 = vpop.f32.mrb[156].mxu0 }
 0xd95   : > { %v4034_v58 = vadd.f32 %v4033_v50, %v3970_v19  ;;  %v4035_v57 = vpop.f32.mrb[157].mxu0 }
 0xd96   : > { %v4036_v9 = vadd.f32 %v4035_v57, %v3970_v19  ;;  %v4037_v25 = vpop.f32.mrb[158].mxu0 }
 0xd97   : > { %6308 = vst [vmem:[%s7952_s18 + $0xe0] sm:$0xff] %v4034_v58  ;;  %v4038_v63 = vadd.f32 %v4037_v25, %v3975_v0  ;;  %v4039_v7 = vpop.f32.mrb[159].mxu0 }
 0xd98   : > { %6309 = vst [vmem:[%s7952_s18 + $0xe8] sm:$0xff] %v4036_v9  ;;  %v4040_v45 = vadd.f32 %v4039_v7, %v3975_v0 }
 0xd99   : > { %6310 = vst [vmem:[%s7952_s18 + $0xf0] sm:$0xff] %v4038_v63 }
 0xd9a   : > { %6311 = vst [vmem:[%s7952_s18 + $0xf8] sm:$0xff] %v4040_v45 }
 0xd9c   : > { %v4271_v31 = vpop.f32.mrb[160].mxu0 }
 0xd9d   : > { %v4272_v62 = vadd.f32 %v4271_v31, %v7754_v39  ;;  %v4273_v17 = vpop.f32.mrb[161].mxu0 }
 0xd9e   : > { %v4274_v34 = vadd.f32 %v4273_v17, %v7754_v39  ;;  %v4275_v15 = vpop.f32.mrb[162].mxu0 }
 0xd9f   : > { %v4276_v12 = vadd.f32 %v4275_v15, %v7759_v3  ;;  %v4277_v27 = vpop.f32.mrb[163].mxu0  ;;  %v4350_v41 = vmax.f32 %v4272_v62, 0.0 }
 0xda0   : > { %v4278_v38 = vadd.f32 %v4277_v27, %v7759_v3  ;;  %v4351_v22 = vmax.f32 %v4274_v34, 0.0 }
 0xda1   : > { %v4352_v8 = vmax.f32 %v4276_v12, 0.0 }
 0xda2   : > { %v4353_v33 = vmax.f32 %v4278_v38, 0.0 }
 0xda3   : > { %v4382_v54 = vpack.c.bf16 %v4352_v8, %v4350_v41 }
 0xda4   : > { %v4383_v43 = vpack.c.bf16 %v4353_v33, %v4351_v22  ;;  %v4281_v55 = vpop.f32.mrb[164].mxu0 }
 0xda5   : > { %v4282_v6 = vadd.f32 %v4281_v55, %v7763_v20  ;;  %v4283_v29 = vpop.f32.mrb[165].mxu0 }
 0xda6   : > { %v4284_v51 = vadd.f32 %v4283_v29, %v7763_v20  ;;  %v4285_v4 = vpop.f32.mrb[166].mxu0  ;;  %4438 = vmatprep.subr.bf16.mxu1 %v4383_v43 }
 0xda7   : > { %v4286_v39 = vadd.f32 %v4285_v4, %v7766_v36  ;;  %v4287_v2 = vpop.f32.mrb[167].mxu0  ;;  %4439 = vmatpush1.bf16.msra.mxu1 %v4382_v54  ;;  %v4354_v5 = vmax.f32 %v4282_v6, 0.0 }
 0xda8   : > { %v4288_v3 = vadd.f32 %v4287_v2, %v7766_v36  ;;  %v4355_v53 = vmax.f32 %v4284_v51, 0.0 }
 0xda9   : > { %v4356_v23 = vmax.f32 %v4286_v39, 0.0 }
 0xdaa   : > { %v4357_v52 = vmax.f32 %v4288_v3, 0.0 }
 0xdab   : > { %v4384_v21 = vpack.c.bf16 %v4356_v23, %v4354_v5 }
 0xdac   : > { %v4385_v30 = vpack.c.bf16 %v4357_v52, %v4355_v53  ;;  %v4291_v59 = vpop.f32.mrb[168].mxu0  ;;  %v9202_v53 = vld [vmem:[#allocation3_spill] sm:$0xff] }
 0xdad   : > { %v4292_v40 = vadd.f32 %v4291_v59, %v7771_v1  ;;  %v4293_v28 = vpop.f32.mrb[169].mxu0  ;;  %v9203_v59 = vld [vmem:[#allocation2_spill] sm:$0xff] }
 0xdae   : > { %v4294_v20 = vadd.f32 %v4293_v28, %v7771_v1  ;;  %v4295_v56 = vpop.f32.mrb[170].mxu0  ;;  %4440 = vmatprep.subr.bf16.mxu1 %v4385_v30 }
 0xdaf   : > { %v4296_v47 = vadd.f32 %v4295_v56, %v7773_v46  ;;  %v4297_v11 = vpop.f32.mrb[171].mxu0  ;;  %4441 = vmatpush1.bf16.msra.mxu1 %v4384_v21  ;;  %v4358_v60 = vmax.f32 %v4292_v40, 0.0 }
 0xdb0   : > { %v4298_v36 = vadd.f32 %v4297_v11, %v7773_v46  ;;  %v4359_v14 = vmax.f32 %v4294_v20, 0.0 }
 0xdb1   : > { %v4360_v26 = vmax.f32 %v4296_v47, 0.0 }
 0xdb2   : > { %v4361_v24 = vmax.f32 %v4298_v36, 0.0 }
 0xdb3   : > { %v4386_v48 = vpack.c.bf16 %v4360_v26, %v4358_v60 }
 0xdb4   : > { %v4387_v35 = vpack.c.bf16 %v4361_v24, %v4359_v14  ;;  %v4301_v44 = vpop.f32.mrb[172].mxu0  ;;  %v9204_v14 = vld [vmem:[#allocation5_spill] sm:$0xff] }
 0xdb5   : > { %v4302_v18 = vadd.f32 %v4301_v44, %v7779_v37  ;;  %v4303_v16 = vpop.f32.mrb[173].mxu0 }
 0xdb6   : > { %v4304_v1 = vadd.f32 %v4303_v16, %v7779_v37  ;;  %v4305_v19 = vpop.f32.mrb[174].mxu0  ;;  %4442 = vmatprep.subr.bf16.mxu1 %v4387_v35 }
 0xdb7   : > { %v4306_v50 = vadd.f32 %v4305_v19, %v7781_v13  ;;  %v4307_v58 = vpop.f32.mrb[175].mxu0  ;;  %4443 = vmatpush1.bf16.msra.mxu1 %v4386_v48  ;;  %v4362_v57 = vmax.f32 %v4302_v18, 0.0  ;;  %v9205_v18 = vld [vmem:[#allocation4_spill] sm:$0xff] }
 0xdb8   : > { %v4308_v46 = vadd.f32 %v4307_v58, %v7781_v13  ;;  %v4363_v9 = vmax.f32 %v4304_v1, 0.0 }
 0xdb9   : > { %v4364_v0 = vmax.f32 %v4306_v50, 0.0 }
 0xdba   : > { %v4365_v25 = vmax.f32 %v4308_v46, 0.0 }
 0xdbb   : > { %v4388_v63 = vpack.c.bf16 %v4364_v0, %v4362_v57 }
 0xdbc   : > { %v4389_v7 = vpack.c.bf16 %v4365_v25, %v4363_v9  ;;  %v4311_v45 = vpop.f32.mrb[176].mxu0  ;;  %v6623_v25 = vld [vmem:[%s8830_s5] sm:$0xff]  }
 0xdbd   : > { %v4312_v31 = vadd.f32 %v4311_v45, %v7785_v49  ;;  %v4313_v62 = vpop.f32.mrb[177].mxu0  ;;  %v9206_v45 = vld [vmem:[#allocation83_spill] sm:$0xff] }
 0xdbe   : > { %v4314_v37 = vadd.f32 %v4313_v62, %v7785_v49  ;;  %v4315_v17 = vpop.f32.mrb[178].mxu0  ;;  %4444 = vmatprep.subr.bf16.mxu1 %v4389_v7 }
 0xdbf   : > { %v4316_v34 = vadd.f32 %v4315_v17, %v7790_v61  ;;  %v4317_v15 = vpop.f32.mrb[179].mxu0  ;;  %4445 = vmatpush1.bf16.msra.mxu1 %v4388_v63  ;;  %v4366_v12 = vmax.f32 %v4312_v31, 0.0  ;;  %v6624_v63 = vld [vmem:[%s8830_s5 + $0x8] sm:$0xff]  }
 0xdc0   : > { %v4318_v13 = vadd.f32 %v4317_v15, %v7790_v61  ;;  %v4367_v38 = vmax.f32 %v4314_v37, 0.0 }
 0xdc1   : > { %v4368_v27 = vmax.f32 %v4316_v34, 0.0  ;;  %v9207_v34 = vld [vmem:[#allocation84_spill] sm:$0xff] }
 0xdc2   : > { %v4369_v41 = vmax.f32 %v4318_v13, 0.0 }
 0xdc3   : > { %v4390_v8 = vpack.c.bf16 %v4368_v27, %v4366_v12 }
 0xdc4   : > { %v4391_v22 = vpack.c.bf16 %v4369_v41, %v4367_v38  ;;  %v4321_v33 = vpop.f32.mrb[180].mxu0 }
 0xdc5   : > { %v4322_v54 = vadd.f32 %v4321_v33, %v7793_v42  ;;  %v4323_v43 = vpop.f32.mrb[181].mxu0 }
 0xdc6   : > { %v4324_v49 = vadd.f32 %v4323_v43, %v7793_v42  ;;  %v4325_v55 = vpop.f32.mrb[182].mxu0  ;;  %4446 = vmatprep.subr.bf16.mxu1 %v4391_v22  ;;  %v9208_v43 = vld [vmem:[#allocation85_spill] sm:$0xff] }
 0xdc7   : > { %v4326_v6 = vadd.f32 %v4325_v55, %v7796_v32  ;;  %v4327_v29 = vpop.f32.mrb[183].mxu0  ;;  %4447 = vmatpush1.bf16.msra.mxu1 %v4390_v8  ;;  %v4370_v51 = vmax.f32 %v4322_v54, 0.0 }
 0xdc8   : > { %v4328_v61 = vadd.f32 %v4327_v29, %v7796_v32  ;;  %v4371_v39 = vmax.f32 %v4324_v49, 0.0 }
 0xdc9   : > { %v4372_v4 = vmax.f32 %v4326_v6, 0.0 }
 0xdca   : > { %v4373_v2 = vmax.f32 %v4328_v61, 0.0  ;;  %v9209_v61 = vld [vmem:[#allocation86_spill] sm:$0xff] }
 0xdcb   : > { %v4392_v3 = vpack.c.bf16 %v4372_v4, %v4370_v51 }
 0xdcc   : > { %v4393_v5 = vpack.c.bf16 %v4373_v2, %v4371_v39  ;;  %v4331_v23 = vpop.f32.mrb[184].mxu0 }
 0xdcd   : > { %v4332_v52 = vadd.f32 %v4331_v23, %v9202_v53  ;;  %v4333_v21 = vpop.f32.mrb[185].mxu0 }
 0xdce   : > { %v4334_v42 = vadd.f32 %v4333_v21, %v9202_v53  ;;  %v4335_v30 = vpop.f32.mrb[186].mxu0  ;;  %4448 = vmatprep.subr.bf16.mxu1 %v4393_v5  ;;  %v6625_v21 = vld [vmem:[%s8832_s7] sm:$0xff]  }
 0xdcf   : > { %v4336_v40 = vadd.f32 %v4335_v30, %v9203_v59  ;;  %v4337_v28 = vpop.f32.mrb[187].mxu0  ;;  %4449 = vmatpush1.bf16.msra.mxu1 %v4392_v3  ;;  %v4374_v20 = vmax.f32 %v4332_v52, 0.0  ;;  %v6627_v30 = vld [vmem:[%s8832_s7 + $0x10] sm:$0xff]  }
 0xdd0   : > { %v4338_v32 = vadd.f32 %v4337_v28, %v9203_v59  ;;  %v4375_v47 = vmax.f32 %v4334_v42, 0.0  ;;  %v6626_v42 = vld [vmem:[%s8832_s7 + $0x8] sm:$0xff]   ;;  %v6628_v59 = vld [vmem:[%s8832_s7 + $0x18] sm:$0xff]  }
 0xdd1   : > { %v4376_v56 = vmax.f32 %v4336_v40, 0.0  ;;  %v6629_v40 = vld [vmem:[%s8832_s7 + $0x20] sm:$0xff]   ;;  %v6630_v28 = vld [vmem:[%s8832_s7 + $0x28] sm:$0xff]  }
 0xdd2   : > { %v4377_v11 = vmax.f32 %v4338_v32, 0.0  ;;  %v6631_v32 = vld [vmem:[%s8832_s7 + $0x30] sm:$0xff]  }
 0xdd3   : > { %v4394_v36 = vpack.c.bf16 %v4376_v56, %v4374_v20  ;;  %v6632_v20 = vld [vmem:[%s8832_s7 + $0x38] sm:$0xff]  }
 0xdd4   : > { %v4395_v60 = vpack.c.bf16 %v4377_v11, %v4375_v47  ;;  %v4341_v26 = vpop.f32.mrb[188].mxu0  ;;  %v9210_v47 = vld [vmem:[#allocation87_spill] sm:$0xff] }
 0xdd5   : > { %v4342_v24 = vadd.f32 %v4341_v26, %v9204_v14  ;;  %v4343_v48 = vpop.f32.mrb[189].mxu0 }
 0xdd6   : > { %v4344_v35 = vadd.f32 %v4343_v48, %v9204_v14  ;;  %v4345_v44 = vpop.f32.mrb[190].mxu0  ;;  %4450 = vmatprep.subr.bf16.mxu1 %v4395_v60  ;;  %v9211_v14 = vld [vmem:[#allocation88_spill] sm:$0xff] }
 0xdd7   : > { %v4346_v16 = vadd.f32 %v4345_v44, %v9205_v18  ;;  %v4347_v1 = vpop.f32.mrb[191].mxu0  ;;  %4451 = vmatpush1.bf16.msra.mxu1 %v4394_v36  ;;  %v4378_v50 = vmax.f32 %v4342_v24, 0.0 }
 0xdd8   : > { %v4348_v19 = vadd.f32 %v4347_v1, %v9205_v18  ;;  %v4379_v46 = vmax.f32 %v4344_v35, 0.0 }
 0xdd9   : > { %v4380_v58 = vmax.f32 %v4346_v16, 0.0 }
 0xdda   : > { %v4381_v57 = vmax.f32 %v4348_v19, 0.0 }
 0xddb   : > { %v4396_v0 = vpack.c.bf16 %v4380_v58, %v4378_v50 }
 0xddc   : > { %v4397_v9 = vpack.c.bf16 %v4381_v57, %v4379_v46  ;;  %v9212_v46 = vld [vmem:[#allocation89_spill] sm:$0xff] }
 0xdde   : > { %4452 = vmatprep.subr.bf16.mxu1 %v4397_v9 }
 0xddf   : > { %4453 = vmatpush1.bf16.msra.mxu1 %v4396_v0 }
 0xde2   : > { %4471 = vmatmul.mubr.bf16.vlgmr.msra.gmra.mrb[160].mxu1 %v6623_v25 }
 0xde3   : > { %4480 = vmatprep.mubr.bf16.mxu1 %v8999_v10 }
 0xdea   : > { %4481 = vmatmul.mubr.bf16.gmra.mrb[164].mxu1 %v6624_v63  ;;  %v9213_v63 = vld [vmem:[#allocation90_spill] sm:$0xff] }
 0xdeb   : > { %4712 = vmatprep.mubr.bf16.mxu1 %v8999_v10 }
 0xeb5   : > { %v4472_v7 = vpop.f32.mrb[160].mxu1 }
 0xeb6   : > { %v4473_v31 = vadd.f32 %v4472_v7, %v9206_v45  ;;  %v4474_v62 = vpop.f32.mrb[161].mxu1 }
 0xeb7   : > { %v4475_v37 = vadd.f32 %v4474_v62, %v9206_v45  ;;  %v4476_v17 = vpop.f32.mrb[162].mxu1 }
 0xeb8   : > { %v4477_v15 = vadd.f32 %v4476_v17, %v9207_v34  ;;  %v4478_v13 = vpop.f32.mrb[163].mxu1  ;;  %v4491_v27 = vmax.f32 %v4473_v31, 0.0 }
 0xeb9   : > { %v4479_v12 = vadd.f32 %v4478_v13, %v9207_v34  ;;  %v4492_v41 = vmax.f32 %v4475_v37, 0.0 }
 0xeba   : > { %v4493_v38 = vmax.f32 %v4477_v15, 0.0 }
 0xebb   : > { %v4494_v8 = vmax.f32 %v4479_v12, 0.0 }
 0xebc   : > { %v4499_v22 = vpack.c.bf16 %v4493_v38, %v4491_v27  ;;  %v9214_v27 = vld [vmem:[#allocation91_spill] sm:$0xff] }
 0xebd   : > { %v4500_v33 = vpack.c.bf16 %v4494_v8, %v4492_v41  ;;  %v4482_v54 = vpop.f32.mrb[164].mxu1 }
 0xebe   : > { %v4483_v49 = vadd.f32 %v4482_v54, %v9208_v43  ;;  %v4484_v55 = vpop.f32.mrb[165].mxu1 }
 0xebf   : > { %v4485_v6 = vadd.f32 %v4484_v55, %v9208_v43  ;;  %v4486_v29 = vpop.f32.mrb[166].mxu1  ;;  %4680 = vmatprep.subr.bf16.mxu1 %v4500_v33  ;;  %v9215_v33 = vld [vmem:[#allocation92_spill] sm:$0xff] }
 0xec0   : > { %v4487_v51 = vadd.f32 %v4486_v29, %v9209_v61  ;;  %v4488_v4 = vpop.f32.mrb[167].mxu1  ;;  %4681 = vmatpush1.bf16.msra.mxu1 %v4499_v22  ;;  %v4495_v2 = vmax.f32 %v4483_v49, 0.0 }
 0xec1   : > { %v4489_v39 = vadd.f32 %v4488_v4, %v9209_v61  ;;  %v4496_v5 = vmax.f32 %v4485_v6, 0.0 }
 0xec2   : > { %v4497_v3 = vmax.f32 %v4487_v51, 0.0 }
 0xec3   : > { %v4498_v23 = vmax.f32 %v4489_v39, 0.0 }
 0xec4   : > { %v4501_v53 = vpack.c.bf16 %v4497_v3, %v4495_v2  ;;  %v9216_v2 = vld [vmem:[#allocation93_spill] sm:$0xff] }
 0xec5   : > { %v4502_v52 = vpack.c.bf16 %v4498_v23, %v4496_v5 }
 0xec7   : > { %4682 = vmatprep.subr.bf16.mxu1 %v4502_v52  ;;  %v9217_v52 = vld [vmem:[#allocation94_spill] sm:$0xff] }
 0xec8   : > { %4683 = vmatpush1.bf16.msra.mxu1 %v4501_v53 }
 0xecb   : > { %6357 = vmatmul.mubr.msk.bf16.vlgmr.msra.gmra.mrb[168].mxu1 %vm1080_vm2, %v6625_v21 }
 0xecc   : > { %4722 = vmatprep.mubr.bf16.mxu1 %v8999_v10 }
 0xed3   : > { %6358 = vmatmul.mubr.msk.bf16.gmra.mrb[172].mxu1 %vm1080_vm2, %v6626_v42 }
 0xed4   : > { %4732 = vmatprep.mubr.bf16.mxu1 %v8999_v10 }
 0xedb   : > { %6359 = vmatmul.mubr.msk.bf16.gmra.mrb[176].mxu1 %vm1080_vm2, %v6627_v30 }
 0xedc   : > { %4742 = vmatprep.mubr.bf16.mxu1 %v8999_v10 }
 0xee3   : > { %6360 = vmatmul.mubr.msk.bf16.gmra.mrb[180].mxu1 %vm1080_vm2, %v6628_v59 }
 0xee4   : > { %4752 = vmatprep.mubr.bf16.mxu1 %v8999_v10 }
 0xeeb   : > { %6361 = vmatmul.mubr.msk.bf16.gmra.mrb[184].mxu1 %vm1080_vm2, %v6629_v40 }
 0xeec   : > { %4762 = vmatprep.mubr.bf16.mxu1 %v8999_v10 }
 0xef3   : > { %6362 = vmatmul.mubr.msk.bf16.gmra.mrb[188].mxu1 %vm1080_vm2, %v6630_v28 }
 0xef4   : > { %4772 = vmatprep.mubr.bf16.mxu1 %v8999_v10 }
 0xefb   : > { %6363 = vmatmul.mubr.msk.bf16.gmra.mrb[192].mxu1 %vm1080_vm2, %v6631_v32 }
 0xefc   : > { %4782 = vmatprep.mubr.bf16.mxu1 %v8999_v10 }
 0xf03   : > { %6364 = vmatmul.mubr.msk.bf16.gmra.mrb[196].mxu1 %vm1080_vm2, %v6632_v20 }
 0xf04   : > { %5363 = vmatprep.mubr.bf16.mxu1 %v8999_v10 }
 0xf9e   : > { %v4714_v56 = vpop.f32.mrb[168].mxu1 }
 0xf9f   : > { %v4715_v11 = vadd.f32 %v4714_v56, %v9210_v47  ;;  %v4716_v36 = vpop.f32.mrb[169].mxu1 }
 0xfa0   : > { %v4717_v60 = vadd.f32 %v4716_v36, %v9210_v47  ;;  %v4718_v26 = vpop.f32.mrb[170].mxu1 }
 0xfa1   : > { %v4719_v24 = vadd.f32 %v4718_v26, %v9211_v14  ;;  %v4720_v48 = vpop.f32.mrb[171].mxu1  ;;  %v4793_v44 = vmax.f32 %v4715_v11, 0.0  ;;  %v9218_v11 = vld [vmem:[#allocation95_spill] sm:$0xff] }
 0xfa2   : > { %v4721_v35 = vadd.f32 %v4720_v48, %v9211_v14  ;;  %v4794_v16 = vmax.f32 %v4717_v60, 0.0 }
 0xfa3   : > { %v4795_v18 = vmax.f32 %v4719_v24, 0.0  ;;  %v9219_v24 = vld [vmem:[#allocation96_spill] sm:$0xff] }
 0xfa4   : > { %v4796_v1 = vmax.f32 %v4721_v35, 0.0 }
 0xfa5   : > { %v4825_v19 = vpack.c.bf16 %v4795_v18, %v4793_v44 }
 0xfa6   : > { %v4826_v50 = vpack.c.bf16 %v4796_v1, %v4794_v16  ;;  %v4724_v58 = vpop.f32.mrb[172].mxu1 }
 0xfa7   : > { %v4725_v57 = vadd.f32 %v4724_v58, %v9212_v46  ;;  %v4726_v0 = vpop.f32.mrb[173].mxu1 }
 0xfa8   : > { %v4727_v9 = vadd.f32 %v4726_v0, %v9212_v46  ;;  %v4728_v25 = vpop.f32.mrb[174].mxu1  ;;  %4881 = vmatprep.subr.bf16.mxu0 %v4826_v50 }
 0xfa9   : > { %v4729_v7 = vadd.f32 %v4728_v25, %v9213_v63  ;;  %v4730_v45 = vpop.f32.mrb[175].mxu1  ;;  %4882 = vmatpush1.bf16.msra.mxu0 %v4825_v19  ;;  %v4797_v62 = vmax.f32 %v4725_v57, 0.0  ;;  %v9220_v57 = vld [vmem:[#allocation97_spill] sm:$0xff] }
 0xfaa   : > { %v4731_v31 = vadd.f32 %v4730_v45, %v9213_v63  ;;  %v4798_v17 = vmax.f32 %v4727_v9, 0.0 }
 0xfab   : > { %v4799_v37 = vmax.f32 %v4729_v7, 0.0  ;;  %v9221_v7 = vld [vmem:[#allocation98_spill] sm:$0xff] }
 0xfac   : > { %v4800_v34 = vmax.f32 %v4731_v31, 0.0 }
 0xfad   : > { %v4827_v15 = vpack.c.bf16 %v4799_v37, %v4797_v62 }
 0xfae   : > { %v4828_v13 = vpack.c.bf16 %v4800_v34, %v4798_v17  ;;  %v4734_v12 = vpop.f32.mrb[176].mxu1 }
 0xfaf   : > { %v4735_v38 = vadd.f32 %v4734_v12, %v9214_v27  ;;  %v4736_v41 = vpop.f32.mrb[177].mxu1 }
 0xfb0   : > { %v4737_v8 = vadd.f32 %v4736_v41, %v9214_v27  ;;  %v4738_v22 = vpop.f32.mrb[178].mxu1  ;;  %4883 = vmatprep.subr.bf16.mxu0 %v4828_v13 }
 0xfb1   : > { %v4739_v54 = vadd.f32 %v4738_v22, %v9215_v33  ;;  %v4740_v43 = vpop.f32.mrb[179].mxu1  ;;  %4884 = vmatpush1.bf16.msra.mxu0 %v4827_v15  ;;  %v4801_v55 = vmax.f32 %v4735_v38, 0.0  ;;  %v9222_v38 = vld [vmem:[#allocation99_spill] sm:$0xff] }
 0xfb2   : > { %v4741_v49 = vadd.f32 %v4740_v43, %v9215_v33  ;;  %v4802_v29 = vmax.f32 %v4737_v8, 0.0 }
 0xfb3   : > { %v4803_v6 = vmax.f32 %v4739_v54, 0.0  ;;  %v9223_v54 = vld [vmem:[#allocation100_spill] sm:$0xff] }
 0xfb4   : > { %v4804_v61 = vmax.f32 %v4741_v49, 0.0 }
 0xfb5   : > { %v4829_v51 = vpack.c.bf16 %v4803_v6, %v4801_v55 }
 0xfb6   : > { %v4830_v4 = vpack.c.bf16 %v4804_v61, %v4802_v29  ;;  %v4744_v39 = vpop.f32.mrb[180].mxu1 }
 0xfb7   : > { %v4745_v3 = vadd.f32 %v4744_v39, %v9216_v2  ;;  %v4746_v5 = vpop.f32.mrb[181].mxu1 }
 0xfb8   : > { %v4747_v23 = vadd.f32 %v4746_v5, %v9216_v2  ;;  %v4748_v53 = vpop.f32.mrb[182].mxu1  ;;  %4885 = vmatprep.subr.bf16.mxu0 %v4830_v4 }
 0xfb9   : > { %v4749_v21 = vadd.f32 %v4748_v53, %v9217_v52  ;;  %v4750_v42 = vpop.f32.mrb[183].mxu1  ;;  %4886 = vmatpush1.bf16.msra.mxu0 %v4829_v51  ;;  %v4805_v59 = vmax.f32 %v4745_v3, 0.0  ;;  %v9224_v3 = vld [vmem:[#allocation101_spill] sm:$0xff] }
 0xfba   : > { %v4751_v30 = vadd.f32 %v4750_v42, %v9217_v52  ;;  %v4806_v28 = vmax.f32 %v4747_v23, 0.0 }
 0xfbb   : > { %v4807_v40 = vmax.f32 %v4749_v21, 0.0  ;;  %v9225_v21 = vld [vmem:[#allocation102_spill] sm:$0xff] }
 0xfbc   : > { %v4808_v32 = vmax.f32 %v4751_v30, 0.0 }
 0xfbd   : > { %v4831_v20 = vpack.c.bf16 %v4807_v40, %v4805_v59 }
 0xfbe   : > { %v4832_v56 = vpack.c.bf16 %v4808_v32, %v4806_v28  ;;  %v4754_v47 = vpop.f32.mrb[184].mxu1  ;;  %v6376_v32 = vld [vmem:[%s7743_s30 + $0x28] sm:$0xff] }
 0xfbf   : > { %v4755_v36 = vadd.f32 %v4754_v47, %v9218_v11  ;;  %v4756_v60 = vpop.f32.mrb[185].mxu1 }
 0xfc0   : > { %v4757_v26 = vadd.f32 %v4756_v60, %v9218_v11  ;;  %v4758_v14 = vpop.f32.mrb[186].mxu1  ;;  %4887 = vmatprep.subr.bf16.mxu0 %v4832_v56  ;;  %v4947_v60 = vpack.c.bf16 %v6376_v32, %v6376_v32 }
 0xfc1   : > { %v4759_v48 = vadd.f32 %v4758_v14, %v9219_v24  ;;  %v4760_v35 = vpop.f32.mrb[187].mxu1  ;;  %4888 = vmatpush1.bf16.msra.mxu0 %v4831_v20  ;;  %v4809_v18 = vmax.f32 %v4755_v36, 0.0  ;;  %v6375_v20 = vld [vmem:[%s7743_s30 + $0x20] sm:$0xff] }
 0xfc2   : > { %v4761_v44 = vadd.f32 %v4760_v35, %v9219_v24  ;;  %v4810_v1 = vmax.f32 %v4757_v26, 0.0  ;;  %v4946_v26 = vpack.c.bf16 %v6375_v20, %v6375_v20  ;;  %v6633_v14 = vld [vmem:[%s8833_s8] sm:$0xff]  }
 0xfc3   : > { %v4811_v16 = vmax.f32 %v4759_v48, 0.0  ;;  %v6634_v48 = vld [vmem:[%s8833_s8 + $0x8] sm:$0xff]   ;;  %v6635_v35 = vld [vmem:[%s8828_s3 + $0x40] sm:$0xff]  }
 0xfc4   : > { %v4812_v19 = vmax.f32 %v4761_v44, 0.0  ;;  %v5125_v24 = vsel %vm655_vm0, %v4946_v26, 0  ;;  %v6636_v44 = vld [vmem:[%s8828_s3 + $0x48] sm:$0xff]  }
 0xfc5   : > { %v4833_v50 = vpack.c.bf16 %v4811_v16, %v4809_v18  ;;  %v6637_v18 = vld [vmem:[%s8828_s3 + $0x50] sm:$0xff]   ;;  %v6638_v16 = vld [vmem:[%s8828_s3 + $0x58] sm:$0xff]  }
 0xfc6   : > { %v4834_v58 = vpack.c.bf16 %v4812_v19, %v4810_v1  ;;  %v4764_v46 = vpop.f32.mrb[188].mxu1  ;;  %v6639_v1 = vld [vmem:[%s8828_s3 + $0x60] sm:$0xff]   ;;  %v6640_v19 = vld [vmem:[%s8828_s3 + $0x68] sm:$0xff]  }
 0xfc7   : > { %v4765_v0 = vadd.f32 %v4764_v46, %v9220_v57  ;;  %v4766_v9 = vpop.f32.mrb[189].mxu1  ;;  %v4852_v46 = vpop.permute.xlu0 %4851 }
 0xfc8   : > { %v4767_v25 = vadd.f32 %v4766_v9, %v9220_v57  ;;  %v4768_v63 = vpop.f32.mrb[190].mxu1  ;;  %4889 = vmatprep.subr.bf16.mxu0 %v4834_v58  ;;  %v6642_v58 = vld [vmem:[%s8828_s3 + $0x78] sm:$0xff]  }
 0xfc9   : > { %v4769_v45 = vadd.f32 %v4768_v63, %v9221_v7  ;;  %v4770_v31 = vpop.f32.mrb[191].mxu1  ;;  %4890 = vmatpush1.bf16.msra.mxu0 %v4833_v50  ;;  %v4813_v37 = vmax.f32 %v4765_v0, 0.0  ;;  %v6641_v50 = vld [vmem:[%s8828_s3 + $0x70] sm:$0xff]  }
 0xfca   : > { %v4771_v62 = vadd.f32 %v4770_v31, %v9221_v7  ;;  %v4814_v34 = vmax.f32 %v4767_v25, 0.0  ;;  %v4857_v25 = vpop.permute.xlu1 %4856 }
 0xfcb   : > { %v4815_v17 = vmax.f32 %v4769_v45, 0.0 }
 0xfcc   : > { %v4816_v15 = vmax.f32 %v4771_v62, 0.0 }
 0xfcd   : > { %v4835_v13 = vpack.c.bf16 %v4815_v17, %v4813_v37  ;;  %v4862_v37 = vpop.permute.xlu0 %4861 }
 0xfce   : > { %v4836_v12 = vpack.c.bf16 %v4816_v15, %v4814_v34  ;;  %v4774_v27 = vpop.f32.mrb[192].mxu1 }
 0xfcf   : > { %v4775_v41 = vadd.f32 %v4774_v27, %v9222_v38  ;;  %v4776_v8 = vpop.f32.mrb[193].mxu1 }
 0xfd0   : > { %v4777_v22 = vadd.f32 %v4776_v8, %v9222_v38  ;;  %v4778_v33 = vpop.f32.mrb[194].mxu1  ;;  %4891 = vmatprep.subr.bf16.mxu0 %v4836_v12 }
 0xfd1   : > { %v4779_v43 = vadd.f32 %v4778_v33, %v9223_v54  ;;  %v4780_v49 = vpop.f32.mrb[195].mxu1  ;;  %4892 = vmatpush1.bf16.msra.mxu0 %v4835_v13  ;;  %v4817_v6 = vmax.f32 %v4775_v41, 0.0  ;;  %v4867_v13 = vpop.permute.xlu1 %4866  ;;  %v9226_v33 = vld [vmem:[#allocation103_spill] sm:$0xff] }
 0xfd2   : > { %v4781_v55 = vadd.f32 %v4780_v49, %v9223_v54  ;;  %v4818_v61 = vmax.f32 %v4777_v22, 0.0 }
 0xfd3   : > { %v4819_v29 = vmax.f32 %v4779_v43, 0.0 }
 0xfd4   : > { %v4820_v51 = vmax.f32 %v4781_v55, 0.0 }
 0xfd5   : > { %v4837_v4 = vpack.c.bf16 %v4819_v29, %v4817_v6  ;;  %v9227_v6 = vld [vmem:[#allocation104_spill] sm:$0xff] }
 0xfd6   : > { %v4838_v39 = vpack.c.bf16 %v4820_v51, %v4818_v61  ;;  %v4784_v2 = vpop.f32.mrb[196].mxu1 }
 0xfd7   : > { %v4785_v5 = vadd.f32 %v4784_v2, %v9224_v3  ;;  %v4786_v23 = vpop.f32.mrb[197].mxu1 }
 0xfd8   : > { %v4787_v53 = vadd.f32 %v4786_v23, %v9224_v3  ;;  %v4788_v52 = vpop.f32.mrb[198].mxu1  ;;  %4893 = vmatprep.subr.bf16.mxu0 %v4838_v39 }
 0xfd9   : > { %v4789_v42 = vadd.f32 %v4788_v52, %v9225_v21  ;;  %v4790_v30 = vpop.f32.mrb[199].mxu1  ;;  %4894 = vmatpush1.bf16.msra.mxu0 %v4837_v4  ;;  %v4821_v40 = vmax.f32 %v4785_v5, 0.0  ;;  %v9228_v52 = vld [vmem:[#allocation105_spill] sm:$0xff] }
 0xfda   : > { %v4791_v59 = vadd.f32 %v4790_v30, %v9225_v21  ;;  %v4822_v56 = vmax.f32 %v4787_v53, 0.0 }
 0xfdb   : > { %v4823_v28 = vmax.f32 %v4789_v42, 0.0 }
 0xfdc   : > { %v4824_v47 = vmax.f32 %v4791_v59, 0.0 }
 0xfdd   : > { %v4839_v11 = vpack.c.bf16 %v4823_v28, %v4821_v40  ;;  %v9229_v40 = vld [vmem:[#allocation106_spill] sm:$0xff] }
 0xfde   : > { %v4840_v36 = vpack.c.bf16 %v4824_v47, %v4822_v56 }
 0xfe0   : > { %4895 = vmatprep.subr.bf16.mxu0 %v4840_v36 }
 0xfe1   : > { %4896 = vmatpush1.bf16.msra.mxu0 %v4839_v11 }
 0xfe2   : > { %6417 = vmatprep.subr.msk.bf16.mxu0 %vm655_vm0, %v4947_v60 }
 0xfe4   : > { %4914 = vmatmul.mubr.bf16.vlgmr.msra.gmra.mrb[192].mxu0 %v6633_v14 }
 0xfe5   : > { %5131 = vmatpush1.bf16.msra.mxu0 %v5125_v24  ;;  %4923 = vmatprep.mubr.bf16.mxu0 %v8999_v10  ;;  %v9230_v24 = vld [vmem:[#allocation107_spill] sm:$0xff] }
 0xfec   : > { %4924 = vmatmul.mubr.bf16.gmra.mrb[196].mxu0 %v6634_v48 }
 0xfed   : > { %5162 = vmatprep.mubr.bf16.mxu0 %v8999_v10 }
 0xff4   : > { %6418 = vmatmul.mubr.msk.bf16.vlgmr.msra.gmra.mrb[200].mxu0 %vm630_vm1, %v6635_v35 }
 0xff5   : > { %5172 = vmatprep.mubr.bf16.mxu0 %v8999_v10 }
 0xffc   : > { %6419 = vmatmul.mubr.msk.bf16.gmra.mrb[204].mxu0 %vm630_vm1, %v6636_v44 }
 0xffd   : > { %5182 = vmatprep.mubr.bf16.mxu0 %v8999_v10 }
0x1004   : > { %6420 = vmatmul.mubr.msk.bf16.gmra.mrb[208].mxu0 %vm630_vm1, %v6637_v18 }
0x1005   : > { %5192 = vmatprep.mubr.bf16.mxu0 %v8999_v10 }
0x100c   : > { %6421 = vmatmul.mubr.msk.bf16.gmra.mrb[212].mxu0 %vm630_vm1, %v6638_v16  ;;  %v9231_v16 = vld [vmem:[#allocation108_spill] sm:$0xff] }
0x100d   : > { %5202 = vmatprep.mubr.bf16.mxu0 %v8999_v10 }
0x1014   : > { %6422 = vmatmul.mubr.msk.bf16.gmra.mrb[216].mxu0 %vm630_vm1, %v6639_v1 }
0x1015   : > { %5212 = vmatprep.mubr.bf16.mxu0 %v8999_v10 }
0x101c   : > { %6423 = vmatmul.mubr.msk.bf16.gmra.mrb[220].mxu0 %vm630_vm1, %v6640_v19 }
0x101d   : > { %5222 = vmatprep.mubr.bf16.mxu0 %v8999_v10 }
0x1024   : > { %6424 = vmatmul.mubr.msk.bf16.gmra.mrb[224].mxu0 %vm630_vm1, %v6641_v50 }
0x1025   : > { %5232 = vmatprep.mubr.bf16.mxu0 %v8999_v10 }
0x102c   : > { %6425 = vmatmul.mubr.msk.bf16.gmra.mrb[228].mxu0 %vm630_vm1, %v6642_v58 }
0x102d   : > { %5806 = vmatprep.mubr.bf16.mxu0 %v8999_v10 }
0x10b7   : > { %v4915_v57 = vpop.f32.mrb[192].mxu0 }
0x10b8   : > { %v4916_v0 = vadd.f32 %v4915_v57, %v4852_v46  ;;  %v4917_v9 = vpop.f32.mrb[193].mxu0 }
0x10b9   : > { %v4918_v63 = vadd.f32 %v4917_v9, %v4852_v46  ;;  %v4919_v7 = vpop.f32.mrb[194].mxu0 }
0x10ba   : > { %6367 = vst [vmem:[%s7952_s18 + $0x100] sm:$0xff] %v4916_v0  ;;  %v4920_v45 = vadd.f32 %v4919_v7, %v4857_v25  ;;  %v4921_v31 = vpop.f32.mrb[195].mxu0  ;;  %v9232_v7 = vld [vmem:[#allocation109_spill] sm:$0xff] }
0x10bb   : > { %6368 = vst [vmem:[%s7952_s18 + $0x108] sm:$0xff] %v4918_v63  ;;  %v4922_v62 = vadd.f32 %v4921_v31, %v4857_v25 }
0x10bc   : > { %6369 = vst [vmem:[%s7952_s18 + $0x110] sm:$0xff] %v4920_v45 }
0x10bd   : > { %6370 = vst [vmem:[%s7952_s18 + $0x118] sm:$0xff] %v4922_v62 }
0x10bf   : > { %v4925_v17 = vpop.f32.mrb[196].mxu0 }
0x10c0   : > { %v4926_v34 = vadd.f32 %v4925_v17, %v4862_v37  ;;  %v4927_v15 = vpop.f32.mrb[197].mxu0  ;;  %v9233_v17 = vld [vmem:[#allocation110_spill] sm:$0xff] }
0x10c1   : > { %v4928_v12 = vadd.f32 %v4927_v15, %v4862_v37  ;;  %v4929_v27 = vpop.f32.mrb[198].mxu0 }
0x10c2   : > { %6371 = vst [vmem:[%s7952_s18 + $0x120] sm:$0xff] %v4926_v34  ;;  %v4930_v38 = vadd.f32 %v4929_v27, %v4867_v13  ;;  %v4931_v41 = vpop.f32.mrb[199].mxu0 }
0x10c3   : > { %6372 = vst [vmem:[%s7952_s18 + $0x128] sm:$0xff] %v4928_v12  ;;  %v4932_v8 = vadd.f32 %v4931_v41, %v4867_v13 }
0x10c4   : > { %6373 = vst [vmem:[%s7952_s18 + $0x130] sm:$0xff] %v4930_v38 }
0x10c5   : > { %6374 = vst [vmem:[%s7952_s18 + $0x138] sm:$0xff] %v4932_v8 }
0x10c7   : > { %v5164_v22 = vpop.f32.mrb[200].mxu0 }
0x10c8   : > { %v5165_v54 = vadd.f32 %v5164_v22, %v9226_v33  ;;  %v5166_v43 = vpop.f32.mrb[201].mxu0 }
0x10c9   : > { %v5167_v49 = vadd.f32 %v5166_v43, %v9226_v33  ;;  %v5168_v55 = vpop.f32.mrb[202].mxu0 }
0x10ca   : > { %v5169_v29 = vadd.f32 %v5168_v55, %v9227_v6  ;;  %v5170_v61 = vpop.f32.mrb[203].mxu0  ;;  %v5243_v4 = vmax.f32 %v5165_v54, 0.0  ;;  %v9234_v54 = vld [vmem:[#allocation111_spill] sm:$0xff] }
0x10cb   : > { %v5171_v51 = vadd.f32 %v5170_v61, %v9227_v6  ;;  %v5244_v2 = vmax.f32 %v5167_v49, 0.0 }
0x10cc   : > { %v5245_v39 = vmax.f32 %v5169_v29, 0.0  ;;  %v9235_v29 = vld [vmem:[#allocation112_spill] sm:$0xff] }
0x10cd   : > { %v5246_v3 = vmax.f32 %v5171_v51, 0.0 }
0x10ce   : > { %v5275_v5 = vpack.c.bf16 %v5245_v39, %v5243_v4 }
0x10cf   : > { %v5276_v23 = vpack.c.bf16 %v5246_v3, %v5244_v2  ;;  %v5174_v53 = vpop.f32.mrb[204].mxu0 }
0x10d0   : > { %v5175_v21 = vadd.f32 %v5174_v53, %v9228_v52  ;;  %v5176_v42 = vpop.f32.mrb[205].mxu0 }
0x10d1   : > { %v5177_v30 = vadd.f32 %v5176_v42, %v9228_v52  ;;  %v5178_v59 = vpop.f32.mrb[206].mxu0  ;;  %5331 = vmatprep.subr.bf16.mxu1 %v5276_v23 }
0x10d2   : > { %v5179_v28 = vadd.f32 %v5178_v59, %v9229_v40  ;;  %v5180_v32 = vpop.f32.mrb[207].mxu0  ;;  %5332 = vmatpush1.bf16.msra.mxu1 %v5275_v5  ;;  %v5247_v56 = vmax.f32 %v5175_v21, 0.0  ;;  %v9236_v21 = vld [vmem:[#allocation113_spill] sm:$0xff] }
0x10d3   : > { %v5181_v20 = vadd.f32 %v5180_v32, %v9229_v40  ;;  %v5248_v11 = vmax.f32 %v5177_v30, 0.0 }
0x10d4   : > { %v5249_v47 = vmax.f32 %v5179_v28, 0.0  ;;  %v9237_v28 = vld [vmem:[#allocation114_spill] sm:$0xff] }
0x10d5   : > { %v5250_v36 = vmax.f32 %v5181_v20, 0.0 }
0x10d6   : > { %v5277_v60 = vpack.c.bf16 %v5249_v47, %v5247_v56 }
0x10d7   : > { %v5278_v26 = vpack.c.bf16 %v5250_v36, %v5248_v11  ;;  %v5184_v14 = vpop.f32.mrb[208].mxu0 }
0x10d8   : > { %v5185_v48 = vadd.f32 %v5184_v14, %v9230_v24  ;;  %v5186_v35 = vpop.f32.mrb[209].mxu0 }
0x10d9   : > { %v5187_v44 = vadd.f32 %v5186_v35, %v9230_v24  ;;  %v5188_v18 = vpop.f32.mrb[210].mxu0  ;;  %5333 = vmatprep.subr.bf16.mxu1 %v5278_v26 }
0x10da   : > { %v5189_v1 = vadd.f32 %v5188_v18, %v9231_v16  ;;  %v5190_v19 = vpop.f32.mrb[211].mxu0  ;;  %5334 = vmatpush1.bf16.msra.mxu1 %v5277_v60  ;;  %v5251_v58 = vmax.f32 %v5185_v48, 0.0  ;;  %v9238_v48 = vld [vmem:[#allocation115_spill] sm:$0xff] }
0x10db   : > { %v5191_v50 = vadd.f32 %v5190_v19, %v9231_v16  ;;  %v5252_v57 = vmax.f32 %v5187_v44, 0.0 }
0x10dc   : > { %v5253_v46 = vmax.f32 %v5189_v1, 0.0  ;;  %v9239_v1 = vld [vmem:[#allocation116_spill] sm:$0xff] }
0x10dd   : > { %v5254_v0 = vmax.f32 %v5191_v50, 0.0 }
0x10de   : > { %v5279_v9 = vpack.c.bf16 %v5253_v46, %v5251_v58 }
0x10df   : > { %v5280_v25 = vpack.c.bf16 %v5254_v0, %v5252_v57  ;;  %v5194_v63 = vpop.f32.mrb[212].mxu0 }
0x10e0   : > { %v5195_v45 = vadd.f32 %v5194_v63, %v9232_v7  ;;  %v5196_v31 = vpop.f32.mrb[213].mxu0 }
0x10e1   : > { %v5197_v62 = vadd.f32 %v5196_v31, %v9232_v7  ;;  %v5198_v37 = vpop.f32.mrb[214].mxu0  ;;  %5335 = vmatprep.subr.bf16.mxu1 %v5280_v25 }
0x10e2   : > { %v5199_v34 = vadd.f32 %v5198_v37, %v9233_v17  ;;  %v5200_v15 = vpop.f32.mrb[215].mxu0  ;;  %5336 = vmatpush1.bf16.msra.mxu1 %v5279_v9  ;;  %v5255_v12 = vmax.f32 %v5195_v45, 0.0  ;;  %v9240_v45 = vld [vmem:[#allocation117_spill] sm:$0xff] }
0x10e3   : > { %v5201_v13 = vadd.f32 %v5200_v15, %v9233_v17  ;;  %v5256_v38 = vmax.f32 %v5197_v62, 0.0 }
0x10e4   : > { %v5257_v27 = vmax.f32 %v5199_v34, 0.0  ;;  %v9241_v34 = vld [vmem:[#allocation118_spill] sm:$0xff] }
0x10e5   : > { %v5258_v41 = vmax.f32 %v5201_v13, 0.0 }
0x10e6   : > { %v5281_v8 = vpack.c.bf16 %v5257_v27, %v5255_v12 }
0x10e7   : > { %v5282_v22 = vpack.c.bf16 %v5258_v41, %v5256_v38  ;;  %v5204_v33 = vpop.f32.mrb[216].mxu0 }
0x10e8   : > { %v5205_v43 = vadd.f32 %v5204_v33, %v9234_v54  ;;  %v5206_v49 = vpop.f32.mrb[217].mxu0 }
0x10e9   : > { %v5207_v55 = vadd.f32 %v5206_v49, %v9234_v54  ;;  %v5208_v6 = vpop.f32.mrb[218].mxu0  ;;  %5337 = vmatprep.subr.bf16.mxu1 %v5282_v22  ;;  %v6643_v54 = vld [vmem:[%s8830_s5 + $0x10] sm:$0xff]  }
0x10ea   : > { %v5209_v61 = vadd.f32 %v5208_v6, %v9235_v29  ;;  %v5210_v51 = vpop.f32.mrb[219].mxu0  ;;  %5338 = vmatpush1.bf16.msra.mxu1 %v5281_v8  ;;  %v5259_v39 = vmax.f32 %v5205_v43, 0.0  ;;  %v6644_v43 = vld [vmem:[%s8830_s5 + $0x18] sm:$0xff]  }
0x10eb   : > { %v5211_v4 = vadd.f32 %v5210_v51, %v9235_v29  ;;  %v5260_v3 = vmax.f32 %v5207_v55, 0.0  ;;  %v9242_v55 = vld [vmem:[#allocation119_spill] sm:$0xff] }
0x10ec   : > { %v5261_v2 = vmax.f32 %v5209_v61, 0.0 }
0x10ed   : > { %v5262_v5 = vmax.f32 %v5211_v4, 0.0  ;;  %v9243_v4 = vld [vmem:[#allocation120_spill] sm:$0xff] }
0x10ee   : > { %v5283_v23 = vpack.c.bf16 %v5261_v2, %v5259_v39 }
0x10ef   : > { %v5284_v53 = vpack.c.bf16 %v5262_v5, %v5260_v3  ;;  %v5214_v52 = vpop.f32.mrb[220].mxu0 }
0x10f0   : > { %v5215_v42 = vadd.f32 %v5214_v52, %v9236_v21  ;;  %v5216_v30 = vpop.f32.mrb[221].mxu0 }
0x10f1   : > { %v5217_v59 = vadd.f32 %v5216_v30, %v9236_v21  ;;  %v5218_v40 = vpop.f32.mrb[222].mxu0  ;;  %5339 = vmatprep.subr.bf16.mxu1 %v5284_v53 }
0x10f2   : > { %v5219_v32 = vadd.f32 %v5218_v40, %v9237_v28  ;;  %v5220_v20 = vpop.f32.mrb[223].mxu0  ;;  %5340 = vmatpush1.bf16.msra.mxu1 %v5283_v23  ;;  %v5263_v47 = vmax.f32 %v5215_v42, 0.0 }
0x10f3   : > { %v5221_v56 = vadd.f32 %v5220_v20, %v9237_v28  ;;  %v5264_v36 = vmax.f32 %v5217_v59, 0.0  ;;  %v9244_v59 = vld [vmem:[#allocation121_spill] sm:$0xff] }
0x10f4   : > { %v5265_v11 = vmax.f32 %v5219_v32, 0.0 }
0x10f5   : > { %v5266_v60 = vmax.f32 %v5221_v56, 0.0  ;;  %v9245_v56 = vld [vmem:[#allocation122_spill] sm:$0xff] }
0x10f6   : > { %v5285_v26 = vpack.c.bf16 %v5265_v11, %v5263_v47 }
0x10f7   : > { %v5286_v14 = vpack.c.bf16 %v5266_v60, %v5264_v36  ;;  %v5224_v24 = vpop.f32.mrb[224].mxu0 }
0x10f8   : > { %v5225_v35 = vadd.f32 %v5224_v24, %v9238_v48  ;;  %v5226_v44 = vpop.f32.mrb[225].mxu0 }
0x10f9   : > { %v5227_v18 = vadd.f32 %v5226_v44, %v9238_v48  ;;  %v5228_v16 = vpop.f32.mrb[226].mxu0  ;;  %5341 = vmatprep.subr.bf16.mxu1 %v5286_v14  ;;  %v6645_v44 = vld [vmem:[%s8832_s7 + $0x40] sm:$0xff]  }
0x10fa   : > { %v5229_v19 = vadd.f32 %v5228_v16, %v9239_v1  ;;  %v5230_v50 = vpop.f32.mrb[227].mxu0  ;;  %5342 = vmatpush1.bf16.msra.mxu1 %v5285_v26  ;;  %v5267_v46 = vmax.f32 %v5225_v35, 0.0  ;;  %v6647_v16 = vld [vmem:[%s8832_s7 + $0x50] sm:$0xff]  }
0x10fb   : > { %v5231_v58 = vadd.f32 %v5230_v50, %v9239_v1  ;;  %v5268_v0 = vmax.f32 %v5227_v18, 0.0  ;;  %v6646_v18 = vld [vmem:[%s8832_s7 + $0x48] sm:$0xff]   ;;  %v6648_v1 = vld [vmem:[%s8832_s7 + $0x58] sm:$0xff]  }
0x10fc   : > { %v5269_v57 = vmax.f32 %v5229_v19, 0.0  ;;  %v6649_v19 = vld [vmem:[%s8832_s7 + $0x60] sm:$0xff]   ;;  %v6650_v50 = vld [vmem:[%s8832_s7 + $0x68] sm:$0xff]  }
0x10fd   : > { %v5270_v9 = vmax.f32 %v5231_v58, 0.0  ;;  %v6651_v58 = vld [vmem:[%s8832_s7 + $0x70] sm:$0xff]  }
0x10fe   : > { %v5287_v25 = vpack.c.bf16 %v5269_v57, %v5267_v46  ;;  %v6652_v46 = vld [vmem:[%s8832_s7 + $0x78] sm:$0xff]  }
0x10ff   : > { %v5288_v63 = vpack.c.bf16 %v5270_v9, %v5268_v0  ;;  %v5234_v7 = vpop.f32.mrb[228].mxu0  ;;  %v9246_v0 = vld [vmem:[#allocation123_spill] sm:$0xff] }
0x1100   : > { %v5235_v31 = vadd.f32 %v5234_v7, %v9240_v45  ;;  %v5236_v62 = vpop.f32.mrb[229].mxu0 }
0x1101   : > { %v5237_v37 = vadd.f32 %v5236_v62, %v9240_v45  ;;  %v5238_v17 = vpop.f32.mrb[230].mxu0  ;;  %5343 = vmatprep.subr.bf16.mxu1 %v5288_v63  ;;  %v9247_v45 = vld [vmem:[#allocation124_spill] sm:$0xff] }
0x1102   : > { %v5239_v15 = vadd.f32 %v5238_v17, %v9241_v34  ;;  %v5240_v13 = vpop.f32.mrb[231].mxu0  ;;  %5344 = vmatpush1.bf16.msra.mxu1 %v5287_v25  ;;  %v5271_v27 = vmax.f32 %v5235_v31, 0.0 }
0x1103   : > { %v5241_v12 = vadd.f32 %v5240_v13, %v9241_v34  ;;  %v5272_v41 = vmax.f32 %v5237_v37, 0.0 }
0x1104   : > { %v5273_v38 = vmax.f32 %v5239_v15, 0.0 }
0x1105   : > { %v5274_v8 = vmax.f32 %v5241_v12, 0.0 }
0x1106   : > { %v5289_v22 = vpack.c.bf16 %v5273_v38, %v5271_v27 }
0x1107   : > { %v5290_v33 = vpack.c.bf16 %v5274_v8, %v5272_v41  ;;  %v9248_v41 = vld [vmem:[#allocation125_spill] sm:$0xff] }
0x1109   : > { %5345 = vmatprep.subr.bf16.mxu1 %v5290_v33 }
0x110a   : > { %5346 = vmatpush1.bf16.msra.mxu1 %v5289_v22 }
0x110d   : > { %5364 = vmatmul.mubr.bf16.vlgmr.msra.gmra.mrb[200].mxu1 %v6643_v54 }
0x110e   : > { %5373 = vmatprep.mubr.bf16.mxu1 %v8999_v10 }
0x1115   : > { %5374 = vmatmul.mubr.bf16.gmra.mrb[204].mxu1 %v6644_v43  ;;  %v9249_v43 = vld [vmem:[#allocation126_spill] sm:$0xff] }
0x1116   : > { %5605 = vmatprep.mubr.bf16.mxu1 %v8999_v10 }
0x11e0   : > { %v5365_v49 = vpop.f32.mrb[200].mxu1 }
0x11e1   : > { %v5366_v6 = vadd.f32 %v5365_v49, %v9242_v55  ;;  %v5367_v29 = vpop.f32.mrb[201].mxu1 }
0x11e2   : > { %v5368_v61 = vadd.f32 %v5367_v29, %v9242_v55  ;;  %v5369_v51 = vpop.f32.mrb[202].mxu1 }
0x11e3   : > { %v5370_v39 = vadd.f32 %v5369_v51, %v9243_v4  ;;  %v5371_v2 = vpop.f32.mrb[203].mxu1  ;;  %v5384_v5 = vmax.f32 %v5366_v6, 0.0 }
0x11e4   : > { %v5372_v3 = vadd.f32 %v5371_v2, %v9243_v4  ;;  %v5385_v53 = vmax.f32 %v5368_v61, 0.0 }
0x11e5   : > { %v5386_v23 = vmax.f32 %v5370_v39, 0.0 }
0x11e6   : > { %v5387_v52 = vmax.f32 %v5372_v3, 0.0 }
0x11e7   : > { %v5392_v21 = vpack.c.bf16 %v5386_v23, %v5384_v5  ;;  %v9250_v5 = vld [vmem:[#allocation127_spill] sm:$0xff] }
0x11e8   : > { %v5393_v42 = vpack.c.bf16 %v5387_v52, %v5385_v53  ;;  %v5375_v30 = vpop.f32.mrb[204].mxu1 }
0x11e9   : > { %v5376_v40 = vadd.f32 %v5375_v30, %v9244_v59  ;;  %v5377_v28 = vpop.f32.mrb[205].mxu1 }
0x11ea   : > { %v5378_v32 = vadd.f32 %v5377_v28, %v9244_v59  ;;  %v5379_v20 = vpop.f32.mrb[206].mxu1  ;;  %5573 = vmatprep.subr.bf16.mxu1 %v5393_v42  ;;  %v9251_v42 = vld [vmem:[#allocation128_spill] sm:$0xff] }
0x11eb   : > { %v5380_v47 = vadd.f32 %v5379_v20, %v9245_v56  ;;  %v5381_v11 = vpop.f32.mrb[207].mxu1  ;;  %5574 = vmatpush1.bf16.msra.mxu1 %v5392_v21  ;;  %v5388_v60 = vmax.f32 %v5376_v40, 0.0 }
0x11ec   : > { %v5382_v36 = vadd.f32 %v5381_v11, %v9245_v56  ;;  %v5389_v14 = vmax.f32 %v5378_v32, 0.0 }
0x11ed   : > { %v5390_v26 = vmax.f32 %v5380_v47, 0.0 }
0x11ee   : > { %v5391_v24 = vmax.f32 %v5382_v36, 0.0 }
0x11ef   : > { %v5394_v48 = vpack.c.bf16 %v5390_v26, %v5388_v60  ;;  %v9252_v60 = vld [vmem:[#allocation129_spill] sm:$0xff] }
0x11f0   : > { %v5395_v35 = vpack.c.bf16 %v5391_v24, %v5389_v14 }
0x11f2   : > { %5575 = vmatprep.subr.bf16.mxu1 %v5395_v35  ;;  %v9253_v35 = vld [vmem:[#allocation130_spill] sm:$0xff] }
0x11f3   : > { %5576 = vmatpush1.bf16.msra.mxu1 %v5394_v48 }
0x11f6   : > { %6476 = vmatmul.mubr.msk.bf16.vlgmr.msra.gmra.mrb[208].mxu1 %vm1080_vm2, %v6645_v44 }
0x11f7   : > { %5615 = vmatprep.mubr.bf16.mxu1 %v8999_v10 }
0x11fe   : > { %6477 = vmatmul.mubr.msk.bf16.gmra.mrb[212].mxu1 %vm1080_vm2, %v6646_v18 }
0x11ff   : > { %5625 = vmatprep.mubr.bf16.mxu1 %v8999_v10 }
0x1206   : > { %6478 = vmatmul.mubr.msk.bf16.gmra.mrb[216].mxu1 %vm1080_vm2, %v6647_v16 }
0x1207   : > { %5635 = vmatprep.mubr.bf16.mxu1 %v8999_v10 }
0x120e   : > { %6479 = vmatmul.mubr.msk.bf16.gmra.mrb[220].mxu1 %vm1080_vm2, %v6648_v1 }
0x120f   : > { %5645 = vmatprep.mubr.bf16.mxu1 %v8999_v10 }
0x1216   : > { %6480 = vmatmul.mubr.msk.bf16.gmra.mrb[224].mxu1 %vm1080_vm2, %v6649_v19 }
0x1217   : > { %5655 = vmatprep.mubr.bf16.mxu1 %v8999_v10 }
0x121e   : > { %6481 = vmatmul.mubr.msk.bf16.gmra.mrb[228].mxu1 %vm1080_vm2, %v6650_v50 }
0x121f   : > { %5665 = vmatprep.mubr.bf16.mxu1 %v8999_v10 }
0x1226   : > { %6482 = vmatmul.mubr.msk.bf16.gmra.mrb[232].mxu1 %vm1080_vm2, %v6651_v58 }
0x1227   : > { %5675 = vmatprep.mubr.bf16.mxu1 %v8999_v10 }
0x122e   : > { %6483 = vmatmul.mubr.msk.bf16.gmra.mrb[236].mxu1 %vm1080_vm2, %v6652_v46 }
0x12c9   : > { %v5607_v57 = vpop.f32.mrb[208].mxu1 }
0x12ca   : > { %v5608_v9 = vadd.f32 %v5607_v57, %v9246_v0  ;;  %v5609_v25 = vpop.f32.mrb[209].mxu1 }
0x12cb   : > { %v5610_v63 = vadd.f32 %v5609_v25, %v9246_v0  ;;  %v5611_v7 = vpop.f32.mrb[210].mxu1 }
0x12cc   : > { %v5612_v31 = vadd.f32 %v5611_v7, %v9247_v45  ;;  %v5613_v62 = vpop.f32.mrb[211].mxu1  ;;  %v5686_v17 = vmax.f32 %v5608_v9, 0.0  ;;  %v9254_v9 = vld [vmem:[#allocation131_spill] sm:$0xff] }
0x12cd   : > { %v5614_v37 = vadd.f32 %v5613_v62, %v9247_v45  ;;  %v5687_v15 = vmax.f32 %v5610_v63, 0.0 }
0x12ce   : > { %v5688_v34 = vmax.f32 %v5612_v31, 0.0  ;;  %v9255_v31 = vld [vmem:[#allocation132_spill] sm:$0xff] }
0x12cf   : > { %v5689_v13 = vmax.f32 %v5614_v37, 0.0 }
0x12d0   : > { %v5718_v12 = vpack.c.bf16 %v5688_v34, %v5686_v17 }
0x12d1   : > { %v5719_v27 = vpack.c.bf16 %v5689_v13, %v5687_v15  ;;  %v5617_v38 = vpop.f32.mrb[212].mxu1 }
0x12d2   : > { %v5618_v8 = vadd.f32 %v5617_v38, %v9248_v41  ;;  %v5619_v22 = vpop.f32.mrb[213].mxu1 }
0x12d3   : > { %v5620_v33 = vadd.f32 %v5619_v22, %v9248_v41  ;;  %v5621_v54 = vpop.f32.mrb[214].mxu1  ;;  %5774 = vmatprep.subr.bf16.mxu0 %v5719_v27 }
0x12d4   : > { %v5622_v49 = vadd.f32 %v5621_v54, %v9249_v43  ;;  %v5623_v55 = vpop.f32.mrb[215].mxu1  ;;  %5775 = vmatpush1.bf16.msra.mxu0 %v5718_v12  ;;  %v5690_v29 = vmax.f32 %v5618_v8, 0.0  ;;  %v9256_v8 = vld [vmem:[#allocation133_spill] sm:$0xff] }
0x12d5   : > { %v5624_v6 = vadd.f32 %v5623_v55, %v9249_v43  ;;  %v5691_v51 = vmax.f32 %v5620_v33, 0.0 }
0x12d6   : > { %v5692_v61 = vmax.f32 %v5622_v49, 0.0  ;;  %v9257_v49 = vld [vmem:[#allocation134_spill] sm:$0xff] }
0x12d7   : > { %v5693_v4 = vmax.f32 %v5624_v6, 0.0 }
0x12d8   : > { %v5720_v39 = vpack.c.bf16 %v5692_v61, %v5690_v29 }
0x12d9   : > { %v5721_v2 = vpack.c.bf16 %v5693_v4, %v5691_v51  ;;  %v5627_v3 = vpop.f32.mrb[216].mxu1 }
0x12da   : > { %v5628_v23 = vadd.f32 %v5627_v3, %v9250_v5  ;;  %v5629_v53 = vpop.f32.mrb[217].mxu1 }
0x12db   : > { %v5630_v52 = vadd.f32 %v5629_v53, %v9250_v5  ;;  %v5631_v21 = vpop.f32.mrb[218].mxu1  ;;  %5776 = vmatprep.subr.bf16.mxu0 %v5721_v2 }
0x12dc   : > { %v5632_v30 = vadd.f32 %v5631_v21, %v9251_v42  ;;  %v5633_v59 = vpop.f32.mrb[219].mxu1  ;;  %5777 = vmatpush1.bf16.msra.mxu0 %v5720_v39  ;;  %v5694_v28 = vmax.f32 %v5628_v23, 0.0  ;;  %v9258_v23 = vld [vmem:[#allocation135_spill] sm:$0xff] }
0x12dd   : > { %v5634_v40 = vadd.f32 %v5633_v59, %v9251_v42  ;;  %v5695_v20 = vmax.f32 %v5630_v52, 0.0 }
0x12de   : > { %v5696_v32 = vmax.f32 %v5632_v30, 0.0  ;;  %v9259_v30 = vld [vmem:[#allocation136_spill] sm:$0xff] }
0x12df   : > { %v5697_v56 = vmax.f32 %v5634_v40, 0.0 }
0x12e0   : > { %v5722_v47 = vpack.c.bf16 %v5696_v32, %v5694_v28 }
0x12e1   : > { %v5723_v11 = vpack.c.bf16 %v5697_v56, %v5695_v20  ;;  %v5637_v36 = vpop.f32.mrb[220].mxu1 }
0x12e2   : > { %v5638_v26 = vadd.f32 %v5637_v36, %v9252_v60  ;;  %v5639_v14 = vpop.f32.mrb[221].mxu1 }
0x12e3   : > { %v5640_v24 = vadd.f32 %v5639_v14, %v9252_v60  ;;  %v5641_v48 = vpop.f32.mrb[222].mxu1  ;;  %5778 = vmatprep.subr.bf16.mxu0 %v5723_v11 }
0x12e4   : > { %v5642_v44 = vadd.f32 %v5641_v48, %v9253_v35  ;;  %v5643_v18 = vpop.f32.mrb[223].mxu1  ;;  %5779 = vmatpush1.bf16.msra.mxu0 %v5722_v47  ;;  %v5698_v1 = vmax.f32 %v5638_v26, 0.0  ;;  %v9260_v26 = vld [vmem:[#allocation137_spill] sm:$0xff] }
0x12e5   : > { %v5644_v16 = vadd.f32 %v5643_v18, %v9253_v35  ;;  %v5699_v50 = vmax.f32 %v5640_v24, 0.0 }
0x12e6   : > { %v5700_v19 = vmax.f32 %v5642_v44, 0.0  ;;  %v9261_v44 = vld [vmem:[#allocation138_spill] sm:$0xff] }
0x12e7   : > { %v5701_v58 = vmax.f32 %v5644_v16, 0.0 }
0x12e8   : > { %v5724_v46 = vpack.c.bf16 %v5700_v19, %v5698_v1 }
0x12e9   : > { %v5725_v57 = vpack.c.bf16 %v5701_v58, %v5699_v50  ;;  %v5647_v0 = vpop.f32.mrb[224].mxu1 }
0x12ea   : > { %v5648_v25 = vadd.f32 %v5647_v0, %v9254_v9  ;;  %v5649_v63 = vpop.f32.mrb[225].mxu1 }
0x12eb   : > { %v5650_v7 = vadd.f32 %v5649_v63, %v9254_v9  ;;  %v5651_v45 = vpop.f32.mrb[226].mxu1  ;;  %5780 = vmatprep.subr.bf16.mxu0 %v5725_v57  ;;  %v6653_v9 = vld [vmem:[%s8833_s8 + $0x10] sm:$0xff]   ;;  %v5745_v63 = vpop.permute.xlu0 %5744 }
0x12ec   : > { %v5652_v62 = vadd.f32 %v5651_v45, %v9255_v31  ;;  %v5653_v37 = vpop.f32.mrb[227].mxu1  ;;  %5781 = vmatpush1.bf16.msra.mxu0 %v5724_v46  ;;  %v5702_v34 = vmax.f32 %v5648_v25, 0.0  ;;  %v6654_v25 = vld [vmem:[%s8833_s8 + $0x18] sm:$0xff]  }
0x12ed   : > { %v5654_v17 = vadd.f32 %v5653_v37, %v9255_v31  ;;  %v5703_v13 = vmax.f32 %v5650_v7, 0.0 }
0x12ee   : > { %v5704_v15 = vmax.f32 %v5652_v62, 0.0  ;;  %v5750_v62 = vpop.permute.xlu1 %5749 }
0x12ef   : > { %v5705_v12 = vmax.f32 %v5654_v17, 0.0 }
0x12f0   : > { %v5726_v27 = vpack.c.bf16 %v5704_v15, %v5702_v34 }
0x12f1   : > { %v5727_v38 = vpack.c.bf16 %v5705_v12, %v5703_v13  ;;  %v5657_v41 = vpop.f32.mrb[228].mxu1  ;;  %v5755_v13 = vpop.permute.xlu0 %5754 }
0x12f2   : > { %v5658_v22 = vadd.f32 %v5657_v41, %v9256_v8  ;;  %v5659_v33 = vpop.f32.mrb[229].mxu1  ;;  %v5760_v41 = vpop.permute.xlu1 %5759 }
0x12f3   : > { %v5660_v54 = vadd.f32 %v5659_v33, %v9256_v8  ;;  %v5661_v43 = vpop.f32.mrb[230].mxu1  ;;  %5782 = vmatprep.subr.bf16.mxu0 %v5727_v38 }
0x12f4   : > { %v5662_v55 = vadd.f32 %v5661_v43, %v9257_v49  ;;  %v5663_v6 = vpop.f32.mrb[231].mxu1  ;;  %5783 = vmatpush1.bf16.msra.mxu0 %v5726_v27  ;;  %v5706_v61 = vmax.f32 %v5658_v22, 0.0 }
0x12f5   : > { %v5664_v29 = vadd.f32 %v5663_v6, %v9257_v49  ;;  %v5707_v4 = vmax.f32 %v5660_v54, 0.0 }
0x12f6   : > { %v5708_v51 = vmax.f32 %v5662_v55, 0.0 }
0x12f7   : > { %v5709_v39 = vmax.f32 %v5664_v29, 0.0 }
0x12f8   : > { %v5728_v2 = vpack.c.bf16 %v5708_v51, %v5706_v61 }
0x12f9   : > { %v5729_v3 = vpack.c.bf16 %v5709_v39, %v5707_v4  ;;  %v5667_v5 = vpop.f32.mrb[232].mxu1 }
0x12fa   : > { %v5668_v53 = vadd.f32 %v5667_v5, %v9258_v23  ;;  %v5669_v52 = vpop.f32.mrb[233].mxu1 }
0x12fb   : > { %v5670_v21 = vadd.f32 %v5669_v52, %v9258_v23  ;;  %v5671_v42 = vpop.f32.mrb[234].mxu1  ;;  %5784 = vmatprep.subr.bf16.mxu0 %v5729_v3 }
0x12fc   : > { %v5672_v59 = vadd.f32 %v5671_v42, %v9259_v30  ;;  %v5673_v40 = vpop.f32.mrb[235].mxu1  ;;  %5785 = vmatpush1.bf16.msra.mxu0 %v5728_v2  ;;  %v5710_v32 = vmax.f32 %v5668_v53, 0.0 }
0x12fd   : > { %v5674_v28 = vadd.f32 %v5673_v40, %v9259_v30  ;;  %v5711_v56 = vmax.f32 %v5670_v21, 0.0 }
0x12fe   : > { %v5712_v20 = vmax.f32 %v5672_v59, 0.0 }
0x12ff   : > { %v5713_v47 = vmax.f32 %v5674_v28, 0.0 }
0x1300   : > { %v5730_v11 = vpack.c.bf16 %v5712_v20, %v5710_v32 }
0x1301   : > { %v5731_v36 = vpack.c.bf16 %v5713_v47, %v5711_v56  ;;  %v5677_v60 = vpop.f32.mrb[236].mxu1 }
0x1302   : > { %v5678_v14 = vadd.f32 %v5677_v60, %v9260_v26  ;;  %v5679_v24 = vpop.f32.mrb[237].mxu1 }
0x1303   : > { %v5680_v48 = vadd.f32 %v5679_v24, %v9260_v26  ;;  %v5681_v35 = vpop.f32.mrb[238].mxu1  ;;  %5786 = vmatprep.subr.bf16.mxu0 %v5731_v36 }
0x1304   : > { %v5682_v18 = vadd.f32 %v5681_v35, %v9261_v44  ;;  %v5683_v16 = vpop.f32.mrb[239].mxu1  ;;  %5787 = vmatpush1.bf16.msra.mxu0 %v5730_v11  ;;  %v5714_v19 = vmax.f32 %v5678_v14, 0.0 }
0x1305   : > { %v5684_v1 = vadd.f32 %v5683_v16, %v9261_v44  ;;  %v5715_v58 = vmax.f32 %v5680_v48, 0.0 }
0x1306   : > { %v5716_v50 = vmax.f32 %v5682_v18, 0.0 }
0x1307   : > { %v5717_v46 = vmax.f32 %v5684_v1, 0.0 }
0x1308   : > { %v5732_v57 = vpack.c.bf16 %v5716_v50, %v5714_v19 }
0x1309   : > { %v5733_v0 = vpack.c.bf16 %v5717_v46, %v5715_v58 }
0x130b   : > { %5788 = vmatprep.subr.bf16.mxu0 %v5733_v0 }
0x130c   : > { %5789 = vmatpush1.bf16.msra.mxu0 %v5732_v57 }
0x130f   : > { %5807 = vmatmul.mubr.bf16.vlgmr.msra.gmra.mrb[232].mxu0 %v6653_v9 }
0x1310   : > { %5816 = vmatprep.mubr.bf16.mxu0 %v8999_v10 }
0x1317   : > { %5817 = vmatmul.mubr.bf16.gmra.mrb[236].mxu0 %v6654_v25 }
0x13e2   : > { %v5808_v7 = vpop.f32.mrb[232].mxu0 }
0x13e3   : > { %v5809_v45 = vadd.f32 %v5808_v7, %v5745_v63  ;;  %v5810_v31 = vpop.f32.mrb[233].mxu0 }
0x13e4   : > { %v5811_v37 = vadd.f32 %v5810_v31, %v5745_v63  ;;  %v5812_v17 = vpop.f32.mrb[234].mxu0 }
0x13e5   : > { %6494 = vst [vmem:[%s7952_s18 + $0x140] sm:$0xff] %v5809_v45  ;;  %v5813_v34 = vadd.f32 %v5812_v17, %v5750_v62  ;;  %v5814_v15 = vpop.f32.mrb[235].mxu0 }
0x13e6   : > { %6495 = vst [vmem:[%s7952_s18 + $0x148] sm:$0xff] %v5811_v37  ;;  %v5815_v10 = vadd.f32 %v5814_v15, %v5750_v62 }
0x13e7   : > { %6496 = vst [vmem:[%s7952_s18 + $0x150] sm:$0xff] %v5813_v34 }
0x13e8   : > { %6497 = vst [vmem:[%s7952_s18 + $0x158] sm:$0xff] %v5815_v10 }
0x13ea   : > { %v5818_v12 = vpop.f32.mrb[236].mxu0 }
0x13eb   : > { %v5819_v27 = vadd.f32 %v5818_v12, %v5755_v13  ;;  %v5820_v38 = vpop.f32.mrb[237].mxu0 }
0x13ec   : > { %v5821_v8 = vadd.f32 %v5820_v38, %v5755_v13  ;;  %v5822_v22 = vpop.f32.mrb[238].mxu0 }
0x13ed   : > { %6498 = vst [vmem:[%s7952_s18 + $0x160] sm:$0xff] %v5819_v27  ;;  %v5823_v33 = vadd.f32 %v5822_v22, %v5760_v41  ;;  %v5824_v54 = vpop.f32.mrb[239].mxu0 }
0x13ee   : > { %6499 = vst [vmem:[%s7952_s18 + $0x168] sm:$0xff] %v5821_v8  ;;  %v5825_v43 = vadd.f32 %v5824_v54, %v5760_v41 }
0x13ef   : > { %6500 = vst [vmem:[%s7952_s18 + $0x170] sm:$0xff] %v5823_v33 }
0x13f0   : > { %6501 = vst [vmem:[%s7952_s18 + $0x178] sm:$0xff] %v5825_v43 }
0x13f1 PF: > { %s20_s15 = sadd.s32 1, %s6677_s15   ;;  %s9262_s13 = smov %s6673_s14 }
0x13f2   : > { %p17_p5 = scmp.ge.s32.totalorder %s20_s15, 4   ;;  %s9263_s14 = smov %s9265_s16 }
0x13f4   :  { %19 = sbr.rel (!%p17_p5) target bundleno = 2 (0x2), region = 114 }

</bundles_post_ra>
